<compile_context>
chip_gen: v5e
topology: v5e:2x2
jax: 0.10.0
libtpu: 0.0.40
codegen_flags: <defaults>
</compile_context>

<pallas_src>
import functools
import math

import jax
import jax.numpy as jnp
from jax import lax
from jax.experimental import pallas as pl
from jax.experimental.pallas import tpu as pltpu


# ----------------------------- Pallas kernels -----------------------------

def _matmul_bias_kernel(p_ref, w_ref, b_ref, o_ref):
    # (tm, K)bf16 @ (K, OW)bf16 -> f32 accumulate, + (1, OW)f32 bias
    o_ref[...] = (jnp.dot(p_ref[...], w_ref[...],
                          preferred_element_type=jnp.float32) + b_ref[...])


def _dcn_convlstm_kernel(xm_ref, hp_ref, c_ref, mulc_ref,
                         wx_ref, wh_ref, b_ref, hc_ref, *, fp):
    # Two MXU dots accumulate into one f32 (tm, 4*Fp) pre-gate tensor:
    #   conv_x(x, offset, mask) + conv_h(h) + b_x
    xh = jnp.dot(xm_ref[...], wx_ref[...], preferred_element_type=jnp.float32)
    xh = xh + jnp.dot(hp_ref[...], wh_ref[...],
                      preferred_element_type=jnp.float32)
    xh = xh + b_ref[...]

    F = fp                       # per-gate width, padded to a multiple of 128
    c = c_ref[...]
    mc = mulc_ref[...]

    i_t = jax.nn.sigmoid(xh[:, 0:F] + mc[:, 0:F] * c)
    f_t = jax.nn.sigmoid(xh[:, F:2 * F] + mc[:, F:2 * F] * c)
    c_t = jnp.maximum(xh[:, 2 * F:3 * F], 0.0)
    c_next = i_t * c_t + f_t * c
    o_t = jax.nn.sigmoid(xh[:, 3 * F:4 * F] + mc[:, 2 * F:3 * F] * c_next)
    h_next = o_t * jnp.maximum(c_next, 0.0)

    # Single combined, lane-dense (128-aligned) writeback.
    hc_ref[:, 0:F] = h_next
    hc_ref[:, F:2 * F] = c_next


# ------------------------------ helpers ------------------------------------

def _round_up(a, b):
    return (a + b - 1) // b * b


def _pad_rows(a, rows_pad):
    r = a.shape[0]
    if r == rows_pad:
        return a
    return jnp.pad(a, ((0, rows_pad - r),) + ((0, 0),) * (a.ndim - 1))


def _pad_cols(a, cols):
    c = a.shape[-1]
    if c == cols:
        return a
    return jnp.pad(a, ((0, 0),) * (a.ndim - 1) + ((0, cols - c),))


def _pad_gates(w_mat, ngates, f, fp):
    """(..., ngates*f) -> (..., ngates*fp): zero-pad each gate block to fp."""
    if f == fp:
        return w_mat
    lead = w_mat.shape[:-1]
    w = w_mat.reshape(lead + (ngates, f))
    w = jnp.pad(w, [(0, 0)] * len(lead) + [(0, 0), (0, fp - f)])
    return w.reshape(lead + (ngates * fp,))


def _im2col(x_nhwc, k, pad):
    """Zero-padded im2col: (N,H,W,C) -> (N,H,W,k*k,C)."""
    N, H, W, C = x_nhwc.shape
    xp = jnp.pad(x_nhwc, ((0, 0), (pad, pad), (pad, pad), (0, 0)))
    cols = [xp[:, ky:ky + H, kx:kx + W, :]
            for ky in range(k) for kx in range(k)]
    return jnp.stack(cols, axis=3)


def _bilinear_sample_patches(x_nhwc, dy, dx, k, pad):
    """Deformable (DCNv2-style) bilinear sampling.

    x_nhwc: (N,H,W,C); dy, dx: (N,H,W,k*k) per-kernel-point offsets.
    Returns sampled patches (N,H,W,k*k,C), zero outside bounds.
    """
    # TODO(synk): data-dependent 4-corner gather stays in plain JAX glue; a
    # Pallas manual-DMA gather would remove this HBM round trip entirely.
    N, H, W, C = x_nhwc.shape
    kk = k * k
    ky = (jnp.arange(kk) // k).astype(jnp.float32)
    kx = (jnp.arange(kk) % k).astype(jnp.float32)
    hh = jnp.arange(H, dtype=jnp.float32)[None, :, None, None]
    ww = jnp.arange(W, dtype=jnp.float32)[None, None, :, None]
    ys = hh + ky[None, None, None, :] - pad + dy          # (N,H,W,kk)
    xs = ww + kx[None, None, None, :] - pad + dx
    y0 = jnp.floor(ys)
    x0 = jnp.floor(xs)
    y1 = y0 + 1.0
    x1 = x0 + 1.0
    wy1 = ys - y0
    wy0 = 1.0 - wy1
    wx1 = xs - x0
    wx0 = 1.0 - wx1

    n_idx = jnp.arange(N)[:, None, None, None]

    def gather(yi, xi):
        valid = ((yi >= 0) & (yi <= H - 1) & (xi >= 0) & (xi <= W - 1))
        yc = jnp.clip(yi, 0, H - 1).astype(jnp.int32)
        xc = jnp.clip(xi, 0, W - 1).astype(jnp.int32)
        vals = x_nhwc[n_idx, yc, xc, :]                   # (N,H,W,kk,C)
        return vals * valid[..., None].astype(x_nhwc.dtype)

    return (gather(y0, x0) * (wy0 * wx0)[..., None]
            + gather(y0, x1) * (wy0 * wx1)[..., None]
            + gather(y1, x0) * (wy1 * wx0)[..., None]
            + gather(y1, x1) * (wy1 * wx1)[..., None])


def _pick_row_tile(rows, hw, bytes_per_row, *, target_bytes=4 << 20,
                   budget_bytes=18 << 20):
    """Row-tile size: byte-targeted (amortize ~0.35us/step pipeline overhead),
    capped by a double-buffered VMEM budget (safe on v7x's 64 MiB), keeps at
    least 2 grid steps (megacore), multiple of 8, mul_c-friendly when possible.
    """
    cap = max(1, budget_bytes // (2 * max(1, bytes_per_row)))
    goal = max(1, target_bytes // max(1, bytes_per_row))
    tm = min(cap, goal)
    if rows > 16:                                  # keep >= 2 grid steps
        tm = min(tm, max(16, -(-rows // 2)))
    tm = max(16, min(tm, rows))
    tm = max(8, tm // 8 * 8)                       # sublane legality
    if hw > 0:
        step = hw * 8 // math.gcd(hw, 8)           # lcm(hw, 8)
        if tm >= step:
            tm = tm // step * step                 # tm % hw == 0
        else:
            for d in range(tm, 7, -1):             # divisor of hw, mult of 8
                if hw % d == 0 and d % 8 == 0:
                    tm = d
                    break
    return tm


# ---------------------------- module wrapper -------------------------------

def init_params(key, channels, filters, kernel_size, img_rowcol):
    k = kernel_size
    kx, kh, kb = jax.random.split(key, 3)
    scale = 0.1
    return {
        "w_x": scale * jax.random.normal(
            kx, (4 * filters, channels, k, k), jnp.float32),
        "b_x": scale * jax.random.normal(kb, (4 * filters,), jnp.float32),
        "w_h": scale * jax.random.normal(
            kh, (4 * filters, filters, k, k), jnp.float32),
        # nn.Parameter(torch.zeros(...)) in __init__
        "mul_c": jnp.zeros((1, 3 * filters, img_rowcol, img_rowcol),
                           jnp.float32),
        # init_offset() zeroes the offset/mask conv
        "w_off": jnp.zeros((3 * k * k, channels, k, k), jnp.float32),
        "b_off": jnp.zeros((3 * k * k,), jnp.float32),
    }


def dcn_convlstm2d_forward(params, x, h, c, *, kernel_size, filters):
    """x: (N,C,H,W); h,c: (N,filters,H,W) in PyTorch NCHW; returns NCHW."""
    k = kernel_size
    kk = k * k
    pad = k // 2
    N, C, H, W = x.shape
    F = filters
    Fp = _round_up(F, 128)            # per-gate lane-padded width
    OW = _round_up(3 * kk, 128)       # offset/mask conv output width (padded)
    HW = H * W
    rows = N * HW

    bytes_main = kk * C * 2 + kk * F * 2 + Fp * 4 + 3 * Fp * 4 + 2 * Fp * 4
    bytes_off = kk * C * 2 + OW * 4
    tm = _pick_row_tile(rows, HW, max(bytes_main, bytes_off))
    rows_pad = _round_up(rows, tm)
    grid = (rows_pad // tm,)
    cparams = pltpu.CompilerParams(dimension_semantics=("parallel",),
                                   vmem_limit_bytes=32 * 1024 * 1024)

    x_nhwc = jnp.transpose(x, (0, 2, 3, 1)).astype(jnp.float32)
    h_nhwc = jnp.transpose(h, (0, 2, 3, 1)).astype(jnp.float32)
    c_nhwc = jnp.transpose(c, (0, 2, 3, 1)).astype(jnp.float32)

    # ---- conv_offset_mask_x : standard conv -> im2col matmul (Pallas) ----
    xp_flat = _im2col(x_nhwc, k, pad).reshape(rows, kk * C).astype(jnp.bfloat16)
    xp_flat = _pad_rows(xp_flat, rows_pad)

    w_off = jnp.transpose(params["w_off"], (2, 3, 1, 0)).reshape(kk * C, 3 * kk)
    # Permute output columns to [dy_0..dy_kk-1 | dx_0..dx_kk-1 | mask_0..]:
    # PyTorch cat(o1,o2) == channels[0:2kk], read as interleaved (dy,dx).
    col_perm = jnp.concatenate([jnp.arange(kk) * 2,
                                jnp.arange(kk) * 2 + 1,
                                2 * kk + jnp.arange(kk)])
    w_off = _pad_cols(w_off[:, col_perm], OW).astype(jnp.bfloat16)
    b_off = _pad_cols(params["b_off"][col_perm].reshape(1, 3 * kk),
                      OW).astype(jnp.float32)

    off = pl.pallas_call(
        _matmul_bias_kernel,
        out_shape=jax.ShapeDtypeStruct((rows_pad, OW), jnp.float32),
        grid=grid,
        in_specs=[pl.BlockSpec((tm, kk * C), lambda i: (i, 0)),
                  pl.BlockSpec((kk * C, OW), lambda i: (0, 0)),
                  pl.BlockSpec((1, OW), lambda i: (0, 0))],
        out_specs=pl.BlockSpec((tm, OW), lambda i: (i, 0)),
        compiler_params=cparams,
    )(xp_flat, w_off, b_off)
    off = off[:rows].reshape(N, H, W, OW)
    dy = off[..., 0:kk]
    dx = off[..., kk:2 * kk]
    mask_raw = off[..., 2 * kk:3 * kk]

    # ---- deformable bilinear sampling; modulation mask folded here ----
    sampled = _bilinear_sample_patches(x_nhwc, dy, dx, k, pad)  # (N,H,W,kk,C)
    xm_flat = (sampled * jax.nn.sigmoid(mask_raw)[..., None]).reshape(
        rows, kk * C)
    xm_flat = _pad_rows(xm_flat.astype(jnp.bfloat16), rows_pad)

    # conv_h patches (separate stream: NO HBM concat with x patches).
    # TODO(synk): conv_h could avoid im2col entirely with a halo'd h BlockSpec
    # and k*k shifted in-kernel dots; kept as im2col here for robustness.
    hp_flat = _im2col(h_nhwc, k, pad).reshape(rows, kk * F)
    hp_flat = _pad_rows(hp_flat.astype(jnp.bfloat16), rows_pad)

    c_flat = _pad_rows(_pad_cols(c_nhwc.reshape(rows, F), Fp), rows_pad)

    # mul_c: streamed as (HW, 3*Fp) / (tm, 3*Fp), replicated via index_map.
    mulc_hw = _pad_gates(
        jnp.transpose(params["mul_c"], (0, 2, 3, 1)).reshape(HW, 3 * F),
        3, F, Fp)
    if tm % HW == 0:
        mulc_arg = jnp.tile(mulc_hw, (tm // HW, 1))          # (tm, 3Fp)
        mulc_spec = pl.BlockSpec((tm, 3 * Fp), lambda i: (0, 0))
    elif HW % tm == 0:
        bpi = HW // tm
        mulc_arg = mulc_hw                                   # (HW, 3Fp)
        mulc_spec = pl.BlockSpec((tm, 3 * Fp), lambda i: (i % bpi, 0))
    else:
        mulc_arg = _pad_rows(jnp.broadcast_to(
            mulc_hw[None], (N, HW, 3 * Fp)).reshape(rows, 3 * Fp), rows_pad)
        mulc_spec = pl.BlockSpec((tm, 3 * Fp), lambda i: (i, 0))

    # Weights: per-gate lane padding so gate slices land on 128 boundaries.
    w_x = _pad_gates(
        jnp.transpose(params["w_x"], (2, 3, 1, 0)).reshape(kk * C, 4 * F),
        4, F, Fp).astype(jnp.bfloat16)
    w_h = _pad_gates(
        jnp.transpose(params["w_h"], (2, 3, 1, 0)).reshape(kk * F, 4 * F),
        4, F, Fp).astype(jnp.bfloat16)
    b_x = _pad_gates(params["b_x"].reshape(1, 4 * F),
                     4, F, Fp).astype(jnp.float32)

    kern = functools.partial(_dcn_convlstm_kernel, fp=Fp)
    hc = pl.pallas_call(
        kern,
        out_shape=jax.ShapeDtypeStruct((rows_pad, 2 * Fp), jnp.float32),
        grid=grid,
        in_specs=[pl.BlockSpec((tm, kk * C), lambda i: (i, 0)),
                  pl.BlockSpec((tm, kk * F), lambda i: (i, 0)),
                  pl.BlockSpec((tm, Fp), lambda i: (i, 0)),
                  mulc_spec,
                  pl.BlockSpec((kk * C, 4 * Fp), lambda i: (0, 0)),
                  pl.BlockSpec((kk * F, 4 * Fp), lambda i: (0, 0)),
                  pl.BlockSpec((1, 4 * Fp), lambda i: (0, 0))],
        out_specs=pl.BlockSpec((tm, 2 * Fp), lambda i: (i, 0)),
        compiler_params=cparams,
    )(xm_flat, hp_flat, c_flat, mulc_arg, w_x, w_h, b_x)

    h_next = jnp.transpose(hc[:rows, 0:F].reshape(N, H, W, F), (0, 3, 1, 2))
    c_next = jnp.transpose(hc[:rows, Fp:Fp + F].reshape(N, H, W, F),
                           (0, 3, 1, 2))
    return h_next, c_next


# ------------------------- pure-JAX references ------------------------------

def _reference(params, x, h, c, kernel_size, filters):
    """Module-init path: offset conv is zero -> offsets=0, mask=0.5."""
    pad = kernel_size // 2
    dn = ("NCHW", "OIHW", "NCHW")

    def conv(inp, w):
        return lax.conv_general_dilated(inp, w, (1, 1),
                                        [(pad, pad), (pad, pad)],
                                        dimension_numbers=dn)

    x_cat = 0.5 * conv(x, params["w_x"]) + params["b_x"][None, :, None, None]
    h_cat = conv(h, params["w_h"])
    i_x, f_x, c_x, o_x = jnp.split(x_cat, 4, axis=1)
    i_h, f_h, c_h, o_h = jnp.split(h_cat, 4, axis=1)
    i_c, f_c, o_c = jnp.split(params["mul_c"], 3, axis=1)
    i_t = jax.nn.sigmoid(i_x + i_h + i_c * c)
    f_t = jax.nn.sigmoid(f_x + f_h + f_c * c)
    c_t = jnp.maximum(c_x + c_h, 0.0)
    c_next = i_t * c_t + f_t * c
    o_t = jax.nn.sigmoid(o_x + o_h + o_c * c_next)
    h_next = o_t * jnp.maximum(c_next, 0.0)
    return h_next, c_next


def _reference_dcn(params, x, h, c, kernel_size, filters):
    """Full deformable path in plain f32 JAX (validates non-zero offsets,
    the column permutation, the mask fold and the mul_c / gate padding)."""
    k = kernel_size
    kk = k * k
    pad = k // 2
    N, C, H, W = x.shape
    F = filters
    x_nhwc = jnp.transpose(x, (0, 2, 3, 1))
    h_nhwc = jnp.transpose(h, (0, 2, 3, 1))
    c_nhwc = jnp.transpose(c, (0, 2, 3, 1))

    xp = _im2col(x_nhwc, k, pad).reshape(N, H, W, kk * C)
    w_off = jnp.transpose(params["w_off"], (2, 3, 1, 0)).reshape(kk * C, 3 * kk)
    off = jnp.einsum("nhwk,ko->nhwo", xp, w_off) + params["b_off"]
    cat = off[..., 0:2 * kk]                  # == cat(o1, o2)
    dy = cat[..., 0::2]
    dx = cat[..., 1::2]
    mask = jax.nn.sigmoid(off[..., 2 * kk:3 * kk])

    sampled = _bilinear_sample_patches(x_nhwc, dy, dx, k, pad)
    xm = (sampled * mask[..., None]).reshape(N, H, W, kk * C)
    w_x = jnp.transpose(params["w_x"], (2, 3, 1, 0)).reshape(kk * C, 4 * F)
    x_cat = jnp.einsum("nhwk,ko->nhwo", xm, w_x) + params["b_x"]
    hp = _im2col(h_nhwc, k, pad).reshape(N, H, W, kk * F)
    w_h = jnp.transpose(params["w_h"], (2, 3, 1, 0)).reshape(kk * F, 4 * F)
    h_cat = jnp.einsum("nhwk,ko->nhwo", hp, w_h)
    mc = jnp.transpose(params["mul_c"], (0, 2, 3, 1))

    i_t = jax.nn.sigmoid(x_cat[..., 0:F] + h_cat[..., 0:F]
                         + mc[..., 0:F] * c_nhwc)
    f_t = jax.nn.sigmoid(x_cat[..., F:2 * F] + h_cat[..., F:2 * F]
                         + mc[..., F:2 * F] * c_nhwc)
    c_t = jnp.maximum(x_cat[..., 2 * F:3 * F] + h_cat[..., 2 * F:3 * F], 0.0)
    c_next = i_t * c_t + f_t * c_nhwc
    o_t = jax.nn.sigmoid(x_cat[..., 3 * F:4 * F] + h_cat[..., 3 * F:4 * F]
                         + mc[..., 2 * F:3 * F] * c_next)
    h_next = o_t * jnp.maximum(c_next, 0.0)
    return (jnp.transpose(h_next, (0, 3, 1, 2)),
            jnp.transpose(c_next, (0, 3, 1, 2)))


if __name__ == "__main__":
    batch, channels, filters, kernel_size, img = 2, 4, 8, 3, 16

    key = jax.random.PRNGKey(0)
    kp, kx, kh, kc, ko1, ko2, km = jax.random.split(key, 7)
    params = init_params(kp, channels, filters, kernel_size, img)

    x = jax.random.normal(kx, (batch, channels, img, img), jnp.float32)
    h = jax.random.normal(kh, (batch, filters, img, img), jnp.float32)
    c = jax.random.normal(kc, (batch, filters, img, img), jnp.float32)

    fwd = jax.jit(functools.partial(dcn_convlstm2d_forward,
                                    kernel_size=kernel_size, filters=filters))

    # 1) module-init path (zero offset conv -> offsets 0, mask = 0.5)
    h_next, c_next = fwd(params, x, h, c)
    jax.block_until_ready((h_next, c_next))
    h_ref, c_ref = _reference(params, x, h, c, kernel_size, filters)
    assert h_next.shape == h_ref.shape and c_next.shape == c_ref.shape
    assert jnp.allclose(h_next, h_ref, rtol=2e-2, atol=2e-2), \
        float(jnp.max(jnp.abs(h_next - h_ref)))
    assert jnp.allclose(c_next, c_ref, rtol=2e-2, atol=2e-2), \
        float(jnp.max(jnp.abs(c_next - c_ref)))

    # 2) non-zero offset/mask weights and mul_c: exercise the deformable path
    params_dcn = dict(params)
    params_dcn["w_off"] = 0.05 * jax.random.normal(
        ko1, params["w_off"].shape, jnp.float32)
    params_dcn["b_off"] = 0.05 * jax.random.normal(
        ko2, params["b_off"].shape, jnp.float32)
    params_dcn["mul_c"] = 0.1 * jax.random.normal(
        km, params["mul_c"].shape, jnp.float32)
    h2, c2 = fwd(params_dcn, x, h, c)
    jax.block_until_ready((h2, c2))
    h2r, c2r = _reference_dcn(params_dcn, x, h, c, kernel_size, filters)
    assert jnp.allclose(h2, h2r, rtol=5e-2, atol=5e-2), \
        float(jnp.max(jnp.abs(h2 - h2r)))
    assert jnp.allclose(c2, c2r, rtol=5e-2, atol=5e-2), \
        float(jnp.max(jnp.abs(c2 - c2r)))

    print("KERNEL_OK")
</pallas_src>

<mosaic_0001>
module attributes {stable_mosaic.version = 11 : i64} {
  func.func @_matmul_bias_kernel(%arg0: i32, %arg1: memref<256x36xbf16, #tpu.memory_space<vmem>>, %arg2: memref<36x128xbf16, #tpu.memory_space<vmem>>, %arg3: memref<1x128xf32, #tpu.memory_space<vmem>>, %arg4: memref<256x128xf32, #tpu.memory_space<vmem>>) attributes {dimension_semantics = [#tpu.dimension_semantics<parallel>], iteration_bounds = array<i64: 2>, scalar_prefetch = 0 : i64, scratch_operands = 0 : i64, tpu.core_type = #tpu.core_type<tc>, window_params = [{transform_indices = @transform_0, window_bounds = array<i64: 256, 36>}, {pipeline_mode = #tpu.pipeline_mode<synchronous>, transform_indices = @transform_1, window_bounds = array<i64: 36, 128>}, {pipeline_mode = #tpu.pipeline_mode<synchronous>, transform_indices = @transform_2, window_bounds = array<i64: 1, 128>}, {transform_indices = @transform_3, window_bounds = array<i64: 256, 128>}]} {
    %c0 = arith.constant 0 : index
    %c0_0 = arith.constant 0 : index
    %0 = vector.load %arg1[%c0, %c0_0] : memref<256x36xbf16, #tpu.memory_space<vmem>>, vector<256x36xbf16>
    %c0_1 = arith.constant 0 : index
    %c0_2 = arith.constant 0 : index
    %1 = vector.load %arg2[%c0_1, %c0_2] : memref<36x128xbf16, #tpu.memory_space<vmem>>, vector<36x128xbf16>
    %cst = arith.constant dense<0.000000e+00> : vector<256x128xf32>
    %2 = tpu.matmul %0, %1, %cst {dimension_numbers = #tpu.dot_dimension_numbers<[1], [0], [0], [1], [0, 0, 1, 1], [], []>} : vector<256x36xbf16>, vector<36x128xbf16>, vector<256x128xf32> -> vector<256x128xf32>
    %c0_3 = arith.constant 0 : index
    %c0_4 = arith.constant 0 : index
    %3 = vector.load %arg3[%c0_3, %c0_4] : memref<1x128xf32, #tpu.memory_space<vmem>>, vector<1x128xf32>
    %4 = vector.broadcast %3 : vector<1x128xf32> to vector<256x128xf32>
    %5 = arith.addf %2, %4 : vector<256x128xf32>
    %c0_5 = arith.constant 0 : index
    %c0_6 = arith.constant 0 : index
    %6 = vector.load %arg4[%c0_5, %c0_6] : memref<256x128xf32, #tpu.memory_space<vmem>>, vector<256x128xf32>
    tpu.vector_store %arg4[%c0_5, %c0_6], %5 {strides = array<i32>} : memref<256x128xf32, #tpu.memory_space<vmem>>, vector<256x128xf32>,
    return
  }
  func.func @transform_0(%arg0: i32) -> (i32, i32) {
    %c0_i32 = arith.constant 0 : i32
    %c0_i32_0 = arith.constant 0 : i32
    return %arg0, %c0_i32 : i32, i32
  }
  func.func @transform_1(%arg0: i32) -> (i32, i32) {
    %c0_i32 = arith.constant 0 : i32
    %c0_i32_0 = arith.constant 0 : i32
    %c0_i32_1 = arith.constant 0 : i32
    return %c0_i32, %c0_i32_0 : i32, i32
  }
  func.func @transform_2(%arg0: i32) -> (i32, i32) {
    %c0_i32 = arith.constant 0 : i32
    %c0_i32_0 = arith.constant 0 : i32
    %c0_i32_1 = arith.constant 0 : i32
    return %c0_i32, %c0_i32_0 : i32, i32
  }
  func.func @transform_3(%arg0: i32) -> (i32, i32) {
    %c0_i32 = arith.constant 0 : i32
    %c0_i32_0 = arith.constant 0 : i32
    return %arg0, %c0_i32 : i32, i32
  }
}

module attributes {stable_mosaic.version = 11 : i64} {
  func.func @_dcn_convlstm_kernel(%arg0: i32, %arg1: memref<256x36xbf16, #tpu.memory_space<vmem>>, %arg2: memref<256x72xbf16, #tpu.memory_space<vmem>>, %arg3: memref<256x128xf32, #tpu.memory_space<vmem>>, %arg4: memref<256x384xf32, #tpu.memory_space<vmem>>, %arg5: memref<36x512xbf16, #tpu.memory_space<vmem>>, %arg6: memref<72x512xbf16, #tpu.memory_space<vmem>>, %arg7: memref<1x512xf32, #tpu.memory_space<vmem>>, %arg8: memref<256x256xf32, #tpu.memory_space<vmem>>) attributes {dimension_semantics = [#tpu.dimension_semantics<parallel>], iteration_bounds = array<i64: 2>, scalar_prefetch = 0 : i64, scratch_operands = 0 : i64, tpu.core_type = #tpu.core_type<tc>, window_params = [{transform_indices = @transform_0, window_bounds = array<i64: 256, 36>}, {transform_indices = @transform_1, window_bounds = array<i64: 256, 72>}, {transform_indices = @transform_2, window_bounds = array<i64: 256, 128>}, {pipeline_mode = #tpu.pipeline_mode<synchronous>, transform_indices = @transform_3, window_bounds = array<i64: 256, 384>}, {pipeline_mode = #tpu.pipeline_mode<synchronous>, transform_indices = @transform_4, window_bounds = array<i64: 36, 512>}, {pipeline_mode = #tpu.pipeline_mode<synchronous>, transform_indices = @transform_5, window_bounds = array<i64: 72, 512>}, {pipeline_mode = #tpu.pipeline_mode<synchronous>, transform_indices = @transform_6, window_bounds = array<i64: 1, 512>}, {transform_indices = @transform_7, window_bounds = array<i64: 256, 256>}]} {
    %c0 = arith.constant 0 : index
    %c0_0 = arith.constant 0 : index
    %0 = vector.load %arg1[%c0, %c0_0] : memref<256x36xbf16, #tpu.memory_space<vmem>>, vector<256x36xbf16>
    %c0_1 = arith.constant 0 : index
    %c0_2 = arith.constant 0 : index
    %1 = vector.load %arg5[%c0_1, %c0_2] : memref<36x512xbf16, #tpu.memory_space<vmem>>, vector<36x512xbf16>
    %cst = arith.constant dense<0.000000e+00> : vector<256x512xf32>
    %2 = tpu.matmul %0, %1, %cst {dimension_numbers = #tpu.dot_dimension_numbers<[1], [0], [0], [1], [0, 0, 1, 1], [], []>} : vector<256x36xbf16>, vector<36x512xbf16>, vector<256x512xf32> -> vector<256x512xf32>
    %c0_3 = arith.constant 0 : index
    %c0_4 = arith.constant 0 : index
    %3 = vector.load %arg2[%c0_3, %c0_4] : memref<256x72xbf16, #tpu.memory_space<vmem>>, vector<256x72xbf16>
    %c0_5 = arith.constant 0 : index
    %c0_6 = arith.constant 0 : index
    %4 = vector.load %arg6[%c0_5, %c0_6] : memref<72x512xbf16, #tpu.memory_space<vmem>>, vector<72x512xbf16>
    %cst_7 = arith.constant dense<0.000000e+00> : vector<256x512xf32>
    %5 = tpu.matmul %3, %4, %cst_7 {dimension_numbers = #tpu.dot_dimension_numbers<[1], [0], [0], [1], [0, 0, 1, 1], [], []>} : vector<256x72xbf16>, vector<72x512xbf16>, vector<256x512xf32> -> vector<256x512xf32>
    %6 = arith.addf %2, %5 : vector<256x512xf32>
    %c0_8 = arith.constant 0 : index
    %c0_9 = arith.constant 0 : index
    %7 = vector.load %arg7[%c0_8, %c0_9] : memref<1x512xf32, #tpu.memory_space<vmem>>, vector<1x512xf32>
    %8 = vector.broadcast %7 : vector<1x512xf32> to vector<256x512xf32>
    %9 = arith.addf %6, %8 : vector<256x512xf32>
    %c0_10 = arith.constant 0 : index
    %c0_11 = arith.constant 0 : index
    %10 = vector.load %arg3[%c0_10, %c0_11] : memref<256x128xf32, #tpu.memory_space<vmem>>, vector<256x128xf32>
    %c0_12 = arith.constant 0 : index
    %c0_13 = arith.constant 0 : index
    %11 = vector.load %arg4[%c0_12, %c0_13] : memref<256x384xf32, #tpu.memory_space<vmem>>, vector<256x384xf32>
    %12 = vector.extract_strided_slice %9 {offsets = [0, 0], sizes = [256, 128], strides = [1, 1]} : vector<256x512xf32> to vector<256x128xf32>
    %13 = vector.extract_strided_slice %11 {offsets = [0, 0], sizes = [256, 128], strides = [1, 1]} : vector<256x384xf32> to vector<256x128xf32>
    %14 = arith.mulf %13, %10 : vector<256x128xf32>
    %15 = arith.addf %12, %14 : vector<256x128xf32>
    %16 = arith.negf %15 : vector<256x128xf32>
    %17 = math.exp %16 : vector<256x128xf32>
    %cst_14 = arith.constant 1.000000e+00 : f32
    %18 = vector.broadcast %cst_14 : f32 to vector<256x128xf32>
    %19 = arith.addf %18, %17 : vector<256x128xf32>
    %20 = arith.divf %18, %19 : vector<256x128xf32>
    %21 = vector.extract_strided_slice %9 {offsets = [0, 128], sizes = [256, 128], strides = [1, 1]} : vector<256x512xf32> to vector<256x128xf32>
    %22 = vector.extract_strided_slice %11 {offsets = [0, 128], sizes = [256, 128], strides = [1, 1]} : vector<256x384xf32> to vector<256x128xf32>
    %23 = arith.mulf %22, %10 : vector<256x128xf32>
    %24 = arith.addf %21, %23 : vector<256x128xf32>
    %25 = arith.negf %24 : vector<256x128xf32>
    %26 = math.exp %25 : vector<256x128xf32>
    %cst_15 = arith.constant 1.000000e+00 : f32
    %27 = vector.broadcast %cst_15 : f32 to vector<256x128xf32>
    %28 = arith.addf %27, %26 : vector<256x128xf32>
    %29 = arith.divf %27, %28 : vector<256x128xf32>
    %30 = vector.extract_strided_slice %9 {offsets = [0, 256], sizes = [256, 128], strides = [1, 1]} : vector<256x512xf32> to vector<256x128xf32>
    %cst_16 = arith.constant 0.000000e+00 : f32
    %31 = vector.broadcast %cst_16 : f32 to vector<256x128xf32>
    %32 = arith.maximumf %30, %31 : vector<256x128xf32>
    %33 = arith.mulf %20, %32 : vector<256x128xf32>
    %34 = arith.mulf %29, %10 : vector<256x128xf32>
    %35 = arith.addf %33, %34 : vector<256x128xf32>
    %36 = vector.extract_strided_slice %9 {offsets = [0, 384], sizes = [256, 128], strides = [1, 1]} : vector<256x512xf32> to vector<256x128xf32>
    %37 = vector.extract_strided_slice %11 {offsets = [0, 256], sizes = [256, 128], strides = [1, 1]} : vector<256x384xf32> to vector<256x128xf32>
    %38 = arith.mulf %37, %35 : vector<256x128xf32>
    %39 = arith.addf %36, %38 : vector<256x128xf32>
    %40 = arith.negf %39 : vector<256x128xf32>
    %41 = math.exp %40 : vector<256x128xf32>
    %cst_17 = arith.constant 1.000000e+00 : f32
    %42 = vector.broadcast %cst_17 : f32 to vector<256x128xf32>
    %43 = arith.addf %42, %41 : vector<256x128xf32>
    %44 = arith.divf %42, %43 : vector<256x128xf32>
    %cst_18 = arith.constant 0.000000e+00 : f32
    %45 = vector.broadcast %cst_18 : f32 to vector<256x128xf32>
    %46 = arith.maximumf %35, %45 : vector<256x128xf32>
    %47 = arith.mulf %44, %46 : vector<256x128xf32>
    %c0_19 = arith.constant 0 : index
    %c0_20 = arith.constant 0 : index
    %48 = vector.load %arg8[%c0_19, %c0_20] : memref<256x256xf32, #tpu.memory_space<vmem>>, vector<256x128xf32>
    tpu.vector_store %arg8[%c0_19, %c0_20], %47 {strides = array<i32>} : memref<256x256xf32, #tpu.memory_space<vmem>>, vector<256x128xf32>,
    %c0_21 = arith.constant 0 : index
    %c128 = arith.constant 128 : index
    %49 = vector.load %arg8[%c0_21, %c128] : memref<256x256xf32, #tpu.memory_space<vmem>>, vector<256x128xf32>
    tpu.vector_store %arg8[%c0_21, %c128], %35 {strides = array<i32>} : memref<256x256xf32, #tpu.memory_space<vmem>>, vector<256x128xf32>,
    return
  }
  func.func @transform_0(%arg0: i32) -> (i32, i32) {
    %c0_i32 = arith.constant 0 : i32
    %c0_i32_0 = arith.constant 0 : i32
    return %arg0, %c0_i32 : i32, i32
  }
  func.func @transform_1(%arg0: i32) -> (i32, i32) {
    %c0_i32 = arith.constant 0 : i32
    %c0_i32_0 = arith.constant 0 : i32
    return %arg0, %c0_i32 : i32, i32
  }
  func.func @transform_2(%arg0: i32) -> (i32, i32) {
    %c0_i32 = arith.constant 0 : i32
    %c0_i32_0 = arith.constant 0 : i32
    return %arg0, %c0_i32 : i32, i32
  }
  func.func @transform_3(%arg0: i32) -> (i32, i32) {
    %c0_i32 = arith.constant 0 : i32
    %c0_i32_0 = arith.constant 0 : i32
    %c0_i32_1 = arith.constant 0 : i32
    return %c0_i32, %c0_i32_0 : i32, i32
  }
  func.func @transform_4(%arg0: i32) -> (i32, i32) {
    %c0_i32 = arith.constant 0 : i32
    %c0_i32_0 = arith.constant 0 : i32
    %c0_i32_1 = arith.constant 0 : i32
    return %c0_i32, %c0_i32_0 : i32, i32
  }
  func.func @transform_5(%arg0: i32) -> (i32, i32) {
    %c0_i32 = arith.constant 0 : i32
    %c0_i32_0 = arith.constant 0 : i32
    %c0_i32_1 = arith.constant 0 : i32
    return %c0_i32, %c0_i32_0 : i32, i32
  }
  func.func @transform_6(%arg0: i32) -> (i32, i32) {
    %c0_i32 = arith.constant 0 : i32
    %c0_i32_0 = arith.constant 0 : i32
    %c0_i32_1 = arith.constant 0 : i32
    return %c0_i32, %c0_i32_0 : i32, i32
  }
  func.func @transform_7(%arg0: i32) -> (i32, i32) {
    %c0_i32 = arith.constant 0 : i32
    %c0_i32_0 = arith.constant 0 : i32
    return %arg0, %c0_i32 : i32, i32
  }
}

</mosaic_0001>

<bundles_post_ra>
// kernel: dcn_convlstm2d_forward.2
= control target key start
LH: loop header
LB: loop body
LE: loop exit
PB: predicated region body
PF: predicated region fallthrough
CT: control target
= control target key end

     0   :  { %s704_s12 = smov 0   ;;  %s839_s0 = inlined_call_operand.vmem [shape: bf16[512,36], index: 0, kind: input, shape index: {}]   ;;  %s840_s1 = inlined_call_operand.vmem [shape: bf16[36,128], index: 1, kind: input, shape index: {}]   ;;  %s841_s2 = inlined_call_operand.vmem [shape: f32[1,128], index: 2, kind: input, shape index: {}]   ;;  %s842_s3 = inlined_call_operand.vmem [shape: f32[512,128], index: 3, kind: output, shape index: {}]  }
   0x1 LB: > { %s541_s13 = sadd.s32 4294967295, %s682_s12   ;;  %p545_p0 = scmp.ge.s32.totalorder %s682_s12, 1  ;;  %s682_s12 = sphi %s704_s12, %s13_s12  }
   0x2   : > { %p138_p1 = scmp.lt.s32.totalorder %s682_s12, 3 }
   0x4   : > { %p139_p2 = pnand %p545_p0, %p138_p1 }
   0x5   : > { %s546_s16 = sshll.u32 (!%p139_p2), %s541_s13, 5 }
   0x6   : > { %142 = sbr.rel (%p139_p2) target bundleno = 221 (0xdd), region = 32  ;;  %p163_p3 = scmp.lt.s32.totalorder (!%p139_p2), %s546_s16, 63 }
   0xb   : > { %v211_v0 = vld [vmem:[%s840_s1 + $0x10] sm:$0x3]  ;;  %vm360_vm0 = vcmask 1041408   ;;  %s844_s16 = smov (!%p163_p3, %s546_s16), 63  ;;  %v657_v4 = vld [vmem:[%s840_s1 + $0x8] sm:$0xff]  ;;  %v656_v5 = vld [vmem:[%s840_s1] sm:$0xff] }
   0xc   : > { %v305_v1 = vunpack.c.l.b16 %v211_v0  ;;  %s547_s19 = sshll.u32 %s844_s16, 2  ;;  %vm311_vm1 = vcmask 293888   ;;  %s549_s25 = sshll.u32 %s844_s16, 3  ;;  %v765_v22 = vld [vmem:[%s841_s2] ss:$0 sm:$0xff] }
   0xd   : > { %s727_s24 = scalar_lea.vmem %s839_s0, %s547_s19  ;;  %s770_s30 = scalar_lea.vmem %s842_s3, %s549_s25 }
   0xe   : > { %v308_v2 = vpack.c.b16 %v305_v1, %v305_v1  ;;  %v640_v6 = vld [vmem:[%s727_s24] sm:$0xff]  ;;  %v641_v10 = vld [vmem:[%s727_s24 + $0x8] sm:$0xff]  ;;  %v642_v14 = vld [vmem:[%s727_s24 + $0x10] sm:$0xff] }
   0xf   : > { %v644_v7 = vld [vmem:[%s727_s24 + $0x20] sm:$0xff]  ;;  %v645_v11 = vld [vmem:[%s727_s24 + $0x28] sm:$0xff]  ;;  %v646_v15 = vld [vmem:[%s727_s24 + $0x30] sm:$0xff] }
  0x10   : > { %v362_v3 = vsel %vm360_vm0, %v308_v2, 0  ;;  %v648_v8 = vld [vmem:[%s727_s24 + $0x40] sm:$0xff]  ;;  %v649_v12 = vld [vmem:[%s727_s24 + $0x48] sm:$0xff]  ;;  %v650_v16 = vld [vmem:[%s727_s24 + $0x50] sm:$0xff] }
  0x11   : > { %369 = vmatpush.bf16.msra.mxu0 %v362_v3  ;;  %658 = vmatpush.bf16.msra.mxu1 %v362_v3  ;;  %v652_v9 = vld [vmem:[%s727_s24 + $0x60] sm:$0xff]  ;;  %v653_v13 = vld [vmem:[%s727_s24 + $0x68] sm:$0xff]  ;;  %v654_v17 = vld [vmem:[%s727_s24 + $0x70] sm:$0xff] }
  0x12   : > { %659 = vmatpush.bf16.msra.mxu2 %v362_v3  ;;  %660 = vmatpush.bf16.msra.mxu3 %v362_v3  ;;  %v643_v18 = vld [vmem:[%s727_s24 + $0x18] sm:$0xff] }
  0x13   : > { %v647_v19 = vld [vmem:[%s727_s24 + $0x38] sm:$0xff] }
  0x14   : > { %v651_v20 = vld [vmem:[%s727_s24 + $0x58] sm:$0xff] }
  0x15   : > { %370 = vmatpush.bf16.msra.mxu0 %v657_v4  ;;  %661 = vmatpush.bf16.msra.mxu1 %v657_v4  ;;  %v655_v21 = vld [vmem:[%s727_s24 + $0x78] sm:$0xff] }
  0x16   : > { %662 = vmatpush.bf16.msra.mxu2 %v657_v4  ;;  %663 = vmatpush.bf16.msra.mxu3 %v657_v4 }
  0x19   : > { %371 = vmatpush.bf16.msra.mxu0 %v656_v5  ;;  %664 = vmatpush.bf16.msra.mxu1 %v656_v5 }
  0x1a   : > { %665 = vmatpush.bf16.msra.mxu2 %v656_v5  ;;  %666 = vmatpush.bf16.msra.mxu3 %v656_v5 }
  0x1c   : > { %622 = vmatmul.msk.bf16.vlgmr.msra.gmra.mxu0 %vm311_vm1, %v640_v6  ;;  %626 = vmatmul.msk.bf16.vlgmr.msra.gmra.mxu1 %vm311_vm1, %v644_v7 }
  0x1d   : > { %630 = vmatmul.msk.bf16.vlgmr.msra.gmra.mxu2 %vm311_vm1, %v648_v8  ;;  %634 = vmatmul.msk.bf16.vlgmr.msra.gmra.mxu3 %vm311_vm1, %v652_v9 }
  0x2c   : > { %623 = vmatmul.msk.bf16.gmra.mxu0 %vm311_vm1, %v641_v10  ;;  %627 = vmatmul.msk.bf16.gmra.mxu1 %vm311_vm1, %v645_v11 }
  0x2d   : > { %631 = vmatmul.msk.bf16.gmra.mxu2 %vm311_vm1, %v649_v12  ;;  %635 = vmatmul.msk.bf16.gmra.mxu3 %vm311_vm1, %v653_v13 }
  0x3c   : > { %624 = vmatmul.msk.bf16.gmra.mxu0 %vm311_vm1, %v642_v14  ;;  %628 = vmatmul.msk.bf16.gmra.mxu1 %vm311_vm1, %v646_v15 }
  0x3d   : > { %632 = vmatmul.msk.bf16.gmra.mxu2 %vm311_vm1, %v650_v16  ;;  %636 = vmatmul.msk.bf16.gmra.mxu3 %vm311_vm1, %v654_v17 }
  0x4c   : > { %625 = vmatmul.msk.bf16.gmra.mxu0 %vm311_vm1, %v643_v18  ;;  %629 = vmatmul.msk.bf16.gmra.mxu1 %vm311_vm1, %v647_v19 }
  0x4d   : > { %633 = vmatmul.msk.bf16.gmra.mxu2 %vm311_vm1, %v651_v20  ;;  %637 = vmatmul.msk.bf16.gmra.mxu3 %vm311_vm1, %v655_v21 }
  0x99   : > { %v373_v23 = vpop.f32.mrf.mxu0  ;;  %v393_v24 = vpop.f32.mrf.mxu1 }
  0x9a   : > { %v374_v25 = vadd.f32 %v765_v22, %v373_v23  ;;  %v394_v26 = vadd.f32 %v765_v22, %v393_v24 }
  0x9c   : > { %453 = vst [vmem:[%s770_s30] sm:$0xff] %v374_v25 }
  0x9d   : > { %461 = vst [vmem:[%s770_s30 + $0x40] sm:$0xff] %v394_v26 }
  0xa0   : > { %v413_v27 = vpop.f32.mrf.mxu2  ;;  %v433_v28 = vpop.f32.mrf.mxu3 }
  0xa1   : > { %v414_v29 = vadd.f32 %v765_v22, %v413_v27  ;;  %v434_v30 = vadd.f32 %v765_v22, %v433_v28  ;;  %v375_v31 = vpop.f32.mrf.mxu0  ;;  %v395_v32 = vpop.f32.mrf.mxu1 }
  0xa2   : > { %v376_v33 = vadd.f32 %v765_v22, %v375_v31  ;;  %v396_v34 = vadd.f32 %v765_v22, %v395_v32 }
  0xa3   : > { %469 = vst [vmem:[%s770_s30 + $0x80] sm:$0xff] %v414_v29 }
  0xa4   : > { %477 = vst [vmem:[%s770_s30 + $0xc0] sm:$0xff] %v434_v30 }
  0xa5   : > { %454 = vst [vmem:[%s770_s30 + $0x8] sm:$0xff] %v376_v33 }
  0xa6   : > { %462 = vst [vmem:[%s770_s30 + $0x48] sm:$0xff] %v396_v34 }
  0xa8   : > { %v415_v35 = vpop.f32.mrf.mxu2  ;;  %v435_v36 = vpop.f32.mrf.mxu3 }
  0xa9   : > { %v416_v37 = vadd.f32 %v765_v22, %v415_v35  ;;  %v436_v38 = vadd.f32 %v765_v22, %v435_v36  ;;  %v378_v39 = vpop.f32.mrf.mxu0  ;;  %v398_v40 = vpop.f32.mrf.mxu1 }
  0xaa   : > { %v379_v41 = vadd.f32 %v765_v22, %v378_v39  ;;  %v399_v42 = vadd.f32 %v765_v22, %v398_v40 }
  0xab   : > { %470 = vst [vmem:[%s770_s30 + $0x88] sm:$0xff] %v416_v37 }
  0xac   : > { %478 = vst [vmem:[%s770_s30 + $0xc8] sm:$0xff] %v436_v38 }
  0xad   : > { %455 = vst [vmem:[%s770_s30 + $0x10] sm:$0xff] %v379_v41 }
  0xae   : > { %463 = vst [vmem:[%s770_s30 + $0x50] sm:$0xff] %v399_v42 }
  0xb0   : > { %v418_v43 = vpop.f32.mrf.mxu2  ;;  %v438_v44 = vpop.f32.mrf.mxu3 }
  0xb1   : > { %v419_v45 = vadd.f32 %v765_v22, %v418_v43  ;;  %v439_v46 = vadd.f32 %v765_v22, %v438_v44  ;;  %v380_v47 = vpop.f32.mrf.mxu0  ;;  %v400_v48 = vpop.f32.mrf.mxu1 }
  0xb2   : > { %v381_v49 = vadd.f32 %v765_v22, %v380_v47  ;;  %v401_v50 = vadd.f32 %v765_v22, %v400_v48 }
  0xb3   : > { %471 = vst [vmem:[%s770_s30 + $0x90] sm:$0xff] %v419_v45 }
  0xb4   : > { %479 = vst [vmem:[%s770_s30 + $0xd0] sm:$0xff] %v439_v46 }
  0xb5   : > { %456 = vst [vmem:[%s770_s30 + $0x18] sm:$0xff] %v381_v49 }
  0xb6   : > { %464 = vst [vmem:[%s770_s30 + $0x58] sm:$0xff] %v401_v50 }
  0xb8   : > { %v420_v51 = vpop.f32.mrf.mxu2  ;;  %v440_v52 = vpop.f32.mrf.mxu3 }
  0xb9   : > { %v421_v53 = vadd.f32 %v765_v22, %v420_v51  ;;  %v441_v54 = vadd.f32 %v765_v22, %v440_v52  ;;  %v383_v55 = vpop.f32.mrf.mxu0  ;;  %v403_v56 = vpop.f32.mrf.mxu1 }
  0xba   : > { %v384_v57 = vadd.f32 %v765_v22, %v383_v55  ;;  %v404_v58 = vadd.f32 %v765_v22, %v403_v56 }
  0xbb   : > { %472 = vst [vmem:[%s770_s30 + $0x98] sm:$0xff] %v421_v53 }
  0xbc   : > { %480 = vst [vmem:[%s770_s30 + $0xd8] sm:$0xff] %v441_v54 }
  0xbd   : > { %457 = vst [vmem:[%s770_s30 + $0x20] sm:$0xff] %v384_v57 }
  0xbe   : > { %465 = vst [vmem:[%s770_s30 + $0x60] sm:$0xff] %v404_v58 }
  0xc0   : > { %v423_v59 = vpop.f32.mrf.mxu2  ;;  %v443_v60 = vpop.f32.mrf.mxu3 }
  0xc1   : > { %v424_v61 = vadd.f32 %v765_v22, %v423_v59  ;;  %v444_v62 = vadd.f32 %v765_v22, %v443_v60  ;;  %v385_v63 = vpop.f32.mrf.mxu0  ;;  %v405_v0 = vpop.f32.mrf.mxu1 }
  0xc2   : > { %v386_v1 = vadd.f32 %v765_v22, %v385_v63  ;;  %v406_v2 = vadd.f32 %v765_v22, %v405_v0 }
  0xc3   : > { %473 = vst [vmem:[%s770_s30 + $0xa0] sm:$0xff] %v424_v61 }
  0xc4   : > { %481 = vst [vmem:[%s770_s30 + $0xe0] sm:$0xff] %v444_v62 }
  0xc5   : > { %458 = vst [vmem:[%s770_s30 + $0x28] sm:$0xff] %v386_v1 }
  0xc6   : > { %466 = vst [vmem:[%s770_s30 + $0x68] sm:$0xff] %v406_v2 }
  0xc8   : > { %v425_v3 = vpop.f32.mrf.mxu2  ;;  %v445_v4 = vpop.f32.mrf.mxu3 }
  0xc9   : > { %v426_v5 = vadd.f32 %v765_v22, %v425_v3  ;;  %v446_v6 = vadd.f32 %v765_v22, %v445_v4  ;;  %v388_v7 = vpop.f32.mrf.mxu0  ;;  %v408_v8 = vpop.f32.mrf.mxu1 }
  0xca   : > { %v389_v9 = vadd.f32 %v765_v22, %v388_v7  ;;  %v409_v10 = vadd.f32 %v765_v22, %v408_v8 }
  0xcb   : > { %474 = vst [vmem:[%s770_s30 + $0xa8] sm:$0xff] %v426_v5 }
  0xcc   : > { %482 = vst [vmem:[%s770_s30 + $0xe8] sm:$0xff] %v446_v6 }
  0xcd   : > { %459 = vst [vmem:[%s770_s30 + $0x30] sm:$0xff] %v389_v9 }
  0xce   : > { %467 = vst [vmem:[%s770_s30 + $0x70] sm:$0xff] %v409_v10 }
  0xd0   : > { %v428_v11 = vpop.f32.mrf.mxu2  ;;  %v448_v12 = vpop.f32.mrf.mxu3 }
  0xd1   : > { %v429_v13 = vadd.f32 %v765_v22, %v428_v11  ;;  %v449_v14 = vadd.f32 %v765_v22, %v448_v12  ;;  %v390_v15 = vpop.f32.mrf.mxu0  ;;  %v410_v16 = vpop.f32.mrf.mxu1 }
  0xd2   : > { %v391_v17 = vadd.f32 %v765_v22, %v390_v15  ;;  %v411_v18 = vadd.f32 %v765_v22, %v410_v16 }
  0xd3   : > { %475 = vst [vmem:[%s770_s30 + $0xb0] sm:$0xff] %v429_v13 }
  0xd4   : > { %483 = vst [vmem:[%s770_s30 + $0xf0] sm:$0xff] %v449_v14 }
  0xd5   : > { %460 = vst [vmem:[%s770_s30 + $0x38] sm:$0xff] %v391_v17 }
  0xd6   : > { %468 = vst [vmem:[%s770_s30 + $0x78] sm:$0xff] %v411_v18 }
  0xd8   : > { %v430_v19 = vpop.f32.mrf.mxu2  ;;  %v450_v20 = vpop.f32.mrf.mxu3 }
  0xd9   : > { %v431_v21 = vadd.f32 %v765_v22, %v430_v19  ;;  %v451_v23 = vadd.f32 %v765_v22, %v450_v20 }
  0xdb   : > { %476 = vst [vmem:[%s770_s30 + $0xb8] sm:$0xff] %v431_v21 }
  0xdc   : > { %484 = vst [vmem:[%s770_s30 + $0xf8] sm:$0xff] %v451_v23 }
  0xdd PF: > { %s13_s12 = sadd.s32 1, %s682_s12  }
  0xde   : > { %p10_p4 = scmp.ge.s32.totalorder %s13_s12, 4  }
  0xe0   :  { %12 = sbr.rel (!%p10_p4) target bundleno = 1 (0x1), region = 62 }

// kernel: dcn_convlstm2d_forward.3
= control target key start
LH: loop header
LB: loop body
LE: loop exit
PB: predicated region body
PF: predicated region fallthrough
CT: control target
= control target key end

     0   :  { %s5138_s24 = smov 0   ;;  %s8478_s0 = inlined_call_operand.vmem [shape: bf16[512,36], index: 0, kind: input, shape index: {}]   ;;  %s8479_s1 = inlined_call_operand.vmem [shape: bf16[512,72], index: 1, kind: input, shape index: {}]   ;;  %s8480_s2 = inlined_call_operand.vmem [shape: f32[512,128], index: 2, kind: input, shape index: {}]   ;;  %s8481_s3 = inlined_call_operand.vmem [shape: f32[256,384], index: 3, kind: input, shape index: {}]   ;;  %s8482_s4 = inlined_call_operand.vmem [shape: bf16[36,512], index: 4, kind: input, shape index: {}]   ;;  %s8483_s5 = inlined_call_operand.vmem [shape: bf16[72,512], index: 5, kind: input, shape index: {}]   ;;  %s8484_s6 = inlined_call_operand.vmem [shape: f32[1,512], index: 6, kind: input, shape index: {}]   ;;  %s8485_s7 = inlined_call_operand.vmem [shape: f32[512,256], index: 7, kind: output, shape index: {}]  }
   0x1 LB: > { %s4177_s25 = sadd.s32 4294967295, %s5096_s24   ;;  %p4181_p0 = scmp.ge.s32.totalorder %s5096_s24, 1  ;;  %s5096_s24 = sphi %s5138_s24, %s17_s24  }
   0x2   : > { %p260_p1 = scmp.lt.s32.totalorder %s5096_s24, 3 }
   0x4   : > { %p261_p2 = pnand %p4181_p0, %p260_p1 }
   0x6   : > { %264 = sbr.rel (%p261_p2) target bundleno = 1005 (0x3ed), region = 48 }
   0xb   : > { %v419_v0 = vld [vmem:[%s8483_s5 + $0x80] sm:$0xff]  ;;  %v420_v1 = vld [vmem:[%s8483_s5 + $0x88] sm:$0xff]  ;;  %vm640_vm0 = vcmask 1043456   ;;  %v4696_v7 = vld [vmem:[%s8483_s5 + $0x6c] sm:$0xf0]  ;;  %s4182_s20 = sshll.u32 %s4177_s25, 5 }
   0xc   : > { %v551_v2 = vunpack.c.l.b16 %v419_v0  ;;  %v552_v3 = vunpack.c.h.b16 %v419_v0  ;;  %v553_v4 = vunpack.c.l.b16 %v420_v1  ;;  %v554_v5 = vunpack.c.h.b16 %v420_v1  ;;  %v4305_v6 = vld [vmem:[%s8483_s5 + $0x60] sm:$0xf]  ;;  %v4694_v12 = vld [vmem:[%s8483_s5 + $0x64] sm:$0xf]  ;;  %v4307_v13 = vld [vmem:[%s8483_s5 + $0x70] sm:$0xf0] }
   0xd   : > { %v4313_v14 = vld [vmem:[%s8483_s5 + $0x68] sm:$0xf]  ;;  %v4697_v15 = vld [vmem:[%s8483_s5 + $0x74] sm:$0xf0]  ;;  %v4695_v16 = vld [vmem:[%s8483_s5 + $0x6c] sm:$0xf]  ;;  %v4306_v22 = vor.u32 %v4696_v7, %v4305_v6  ;;  %v4310_v23 = vor.u32 %v4694_v12, %v4307_v13 }
   0xe   : > { %v571_v8 = vpack.c.b16 %v551_v2, %v551_v2  ;;  %v572_v9 = vpack.c.b16 %v552_v3, %v552_v3  ;;  %v573_v10 = vpack.c.b16 %v553_v4, %v553_v4  ;;  %v574_v11 = vpack.c.b16 %v554_v5, %v554_v5  ;;  %v4315_v17 = vld [vmem:[%s8483_s5 + $0x78] sm:$0xf0]  ;;  %v4289_v24 = vld [vmem:[%s8483_s5 + $0x40] sm:$0xf]  ;;  %v4692_v25 = vld [vmem:[%s8483_s5 + $0x4c] sm:$0xf0] }
   0xf   : > { %v4314_v26 = vor.u32 %v4697_v15, %v4313_v14  ;;  %v4318_v27 = vor.u32 %v4695_v16, %v4315_v17  ;;  %v4690_v28 = vld [vmem:[%s8483_s5 + $0x44] sm:$0xf]  ;;  %v4291_v29 = vld [vmem:[%s8483_s5 + $0x50] sm:$0xf0]  ;;  %v4297_v30 = vld [vmem:[%s8483_s5 + $0x48] sm:$0xf]  ;;  %v4290_v35 = vor.u32 %v4692_v25, %v4289_v24 }
  0x10   : > { %v642_v18 = vsel %vm640_vm0, %v571_v8, 0  ;;  %v645_v19 = vsel %vm640_vm0, %v572_v9, 0  ;;  %v648_v20 = vsel %vm640_vm0, %v573_v10, 0  ;;  %v651_v21 = vsel %vm640_vm0, %v574_v11, 0  ;;  %v4693_v31 = vld [vmem:[%s8483_s5 + $0x54] sm:$0xf0] }
  0x11   : > { %656 = vmatpush.bf16.msra.mxu0 %v642_v18  ;;  %745 = vmatpush.bf16.msra.mxu1 %v645_v19  ;;  %v4691_v32 = vld [vmem:[%s8483_s5 + $0x4c] sm:$0xf]  ;;  %v4299_v33 = vld [vmem:[%s8483_s5 + $0x58] sm:$0xf0]  ;;  %v4273_v34 = vld [vmem:[%s8483_s5 + $0x20] sm:$0xf]  ;;  %v4294_v36 = vor.u32 %v4690_v28, %v4291_v29  ;;  %v4298_v40 = vor.u32 %v4693_v31, %v4297_v30 }
  0x12   : > { %834 = vmatpush.bf16.msra.mxu2 %v648_v20  ;;  %923 = vmatpush.bf16.msra.mxu3 %v651_v21  ;;  %v4688_v37 = vld [vmem:[%s8483_s5 + $0x2c] sm:$0xf0]  ;;  %v4686_v38 = vld [vmem:[%s8483_s5 + $0x24] sm:$0xf]  ;;  %v4275_v39 = vld [vmem:[%s8483_s5 + $0x30] sm:$0xf0]  ;;  %v4302_v41 = vor.u32 %v4691_v32, %v4299_v33 }
  0x13   : > { %v4281_v42 = vld [vmem:[%s8483_s5 + $0x28] sm:$0xf]  ;;  %v4689_v43 = vld [vmem:[%s8483_s5 + $0x34] sm:$0xf0]  ;;  %v4687_v44 = vld [vmem:[%s8483_s5 + $0x2c] sm:$0xf]  ;;  %v4274_v51 = vor.u32 %v4688_v37, %v4273_v34  ;;  %v4278_v52 = vor.u32 %v4686_v38, %v4275_v39 }
  0x14   : > { %v4283_v45 = vld [vmem:[%s8483_s5 + $0x38] sm:$0xf0]  ;;  %p304_p3 = scmp.lt.s32.totalorder %s4182_s20, 63  ;;  %v369_v46 = vld [vmem:[%s8482_s4 + $0x40] sm:$0x33]  ;;  %v4282_v55 = vor.u32 %v4689_v43, %v4281_v42  ;;  %vm1188_vm1 = vcmask 1041408  }
  0x15   : > { %657 = vmatpush.bf16.msra.mxu0 %v4306_v22  ;;  %746 = vmatpush.bf16.msra.mxu1 %v4310_v23  ;;  %v4257_v47 = vld [vmem:[%s8483_s5] sm:$0xf]  ;;  %v1115_v48 = vunpack.c.l.b16 %v369_v46  ;;  %v1116_v49 = vunpack.c.h.b16 %v369_v46  ;;  %v370_v50 = vld [vmem:[%s8482_s4 + $0x48] sm:$0x33]  ;;  %v4684_v53 = vld [vmem:[%s8483_s5 + $0xc] sm:$0xf0]  ;;  %v4286_v56 = vor.u32 %v4687_v44, %v4283_v45 }
  0x16   : > { %835 = vmatpush.bf16.msra.mxu2 %v4314_v26  ;;  %924 = vmatpush.bf16.msra.mxu3 %v4318_v27  ;;  %v4682_v54 = vld [vmem:[%s8483_s5 + $0x4] sm:$0xf]  ;;  %s8845_s20 = smov (!%p304_p3, %s4182_s20), 63  ;;  %v4259_v57 = vld [vmem:[%s8483_s5 + $0x10] sm:$0xf0]  ;;  %v1117_v62 = vunpack.c.l.b16 %v370_v50  ;;  %v1118_v63 = vunpack.c.h.b16 %v370_v50  ;;  %v4258_v2 = vor.u32 %v4684_v53, %v4257_v47  ;;  %vm591_vm2 = vcmask 588800  }
  0x17   : > { %v4265_v58 = vld [vmem:[%s8483_s5 + $0x8] sm:$0xf]  ;;  %v4685_v59 = vld [vmem:[%s8483_s5 + $0x14] sm:$0xf0]  ;;  %v4683_v60 = vld [vmem:[%s8483_s5 + $0xc] sm:$0xf]  ;;  %v1127_v0 = vpack.c.b16 %v1115_v48, %v1115_v48  ;;  %v1128_v1 = vpack.c.b16 %v1116_v49, %v1116_v49  ;;  %v4262_v3 = vor.u32 %v4682_v54, %v4259_v57 }
  0x18   : > { %v4267_v61 = vld [vmem:[%s8483_s5 + $0x18] sm:$0xf0]  ;;  %s4183_s12 = sshll.u32 %s8845_s20, 2  ;;  %v4266_v4 = vor.u32 %v4685_v59, %v4265_v58  ;;  %v1129_v6 = vpack.c.b16 %v1117_v62, %v1117_v62  ;;  %v1130_v7 = vpack.c.b16 %v1118_v63, %v1118_v63  ;;  %v4465_v16 = vld [vmem:[%s8482_s4 + $0x20] sm:$0xf]  ;;  %vm1139_vm3 = vcmask 293888  }
  0x19   : > { %658 = vmatpush.bf16.msra.mxu0 %v4290_v35  ;;  %747 = vmatpush.bf16.msra.mxu1 %v4294_v36  ;;  %s5268_s15 = scalar_lea.vmem %s8479_s1, %s4183_s12  ;;  %v4270_v5 = vor.u32 %v4683_v60, %v4267_v61  ;;  %v1190_v9 = vsel %vm1188_vm1, %v1127_v0, 0  ;;  %v1193_v10 = vsel %vm1188_vm1, %v1128_v1, 0  ;;  %v4664_v17 = vld [vmem:[%s8482_s4 + $0x2c] sm:$0xf0]  ;;  %v4662_v18 = vld [vmem:[%s8482_s4 + $0x24] sm:$0xf]  ;;  %s5531_s9 = scalar_lea.vmem %s8478_s0, %s4183_s12 }
  0x1a   : > { %836 = vmatpush.bf16.msra.mxu2 %v4298_v40  ;;  %925 = vmatpush.bf16.msra.mxu3 %v4302_v41  ;;  %v4666_v8 = vld [vmem:[%s5268_s15] sm:$0xff]  ;;  %v1196_v11 = vsel %vm1188_vm1, %v1129_v6, 0  ;;  %v1199_v12 = vsel %vm1188_vm1, %v1130_v7, 0  ;;  %v4667_v13 = vld [vmem:[%s5268_s15 + $0x8] sm:$0xff]  ;;  %v4668_v14 = vld [vmem:[%s5268_s15 + $0x10] sm:$0xff]  ;;  %v4466_v19 = vor.u32 %v4664_v17, %v4465_v16  ;;  %s4187_s12 = sshll.u32 %s8845_s20, 3 }
  0x1b   : > { %v4669_v15 = vld [vmem:[%s5268_s15 + $0x18] sm:$0xff]  ;;  %v4467_v20 = vld [vmem:[%s8482_s4 + $0x30] sm:$0xf0]  ;;  %v4670_v22 = vld [vmem:[%s5268_s15 + $0x20] sm:$0xff]  ;;  %s5705_s13 = scalar_lea.vmem %s8480_s2, %s4187_s12  ;;  %s4641_s16 = sshll.u32 %s8845_s20, 4 }
  0x1c   : > { %v4470_v21 = vor.u32 %v4662_v18, %v4467_v20  ;;  %v4473_v23 = vld [vmem:[%s8482_s4 + $0x28] sm:$0xf]  ;;  %v4665_v24 = vld [vmem:[%s8482_s4 + $0x34] sm:$0xf0]  ;;  %v4663_v27 = vld [vmem:[%s8482_s4 + $0x2c] sm:$0xf]  ;;  %s5887_s18 = scalar_lea.vmem %s8485_s7, %s4641_s16 }
  0x1d   : > { %659 = vmatpush.bf16.msra.mxu0 %v4274_v51  ;;  %748 = vmatpush.bf16.msra.mxu1 %v4278_v52  ;;  %v4474_v25 = vor.u32 %v4665_v24, %v4473_v23  ;;  %v4671_v26 = vld [vmem:[%s5268_s15 + $0x28] sm:$0xff]  ;;  %v4475_v28 = vld [vmem:[%s8482_s4 + $0x38] sm:$0xf0]  ;;  %v4672_v30 = vld [vmem:[%s5268_s15 + $0x30] sm:$0xff] }
  0x1e   : > { %837 = vmatpush.bf16.msra.mxu2 %v4282_v55  ;;  %926 = vmatpush.bf16.msra.mxu3 %v4286_v56  ;;  %v4478_v29 = vor.u32 %v4663_v27, %v4475_v28  ;;  %v4673_v31 = vld [vmem:[%s5268_s15 + $0x38] sm:$0xff]  ;;  %v4674_v32 = vld [vmem:[%s5268_s15 + $0x40] sm:$0xff]  ;;  %v4675_v39 = vld [vmem:[%s5268_s15 + $0x48] sm:$0xff] }
  0x1f   : > { %v4449_v42 = vld [vmem:[%s8482_s4] sm:$0xf]  ;;  %v4660_v43 = vld [vmem:[%s8482_s4 + $0xc] sm:$0xf0]  ;;  %v4658_v44 = vld [vmem:[%s8482_s4 + $0x4] sm:$0xf] }
  0x20   : > { %v4450_v47 = vor.u32 %v4660_v43, %v4449_v42  ;;  %v4451_v48 = vld [vmem:[%s8482_s4 + $0x10] sm:$0xf0]  ;;  %v4457_v59 = vld [vmem:[%s8482_s4 + $0x8] sm:$0xf]  ;;  %v4661_v60 = vld [vmem:[%s8482_s4 + $0x14] sm:$0xf0] }
  0x21   : > { %660 = vmatpush.bf16.msra.mxu0 %v4258_v2  ;;  %749 = vmatpush.bf16.msra.mxu1 %v4262_v3  ;;  %v4454_v49 = vor.u32 %v4658_v44, %v4451_v48  ;;  %v4676_v56 = vld [vmem:[%s5268_s15 + $0x50] sm:$0xff]  ;;  %v4458_v61 = vor.u32 %v4661_v60, %v4457_v59  ;;  %v4659_v2 = vld [vmem:[%s8482_s4 + $0xc] sm:$0xf]  ;;  %v4459_v3 = vld [vmem:[%s8482_s4 + $0x18] sm:$0xf0] }
  0x22   : > { %838 = vmatpush.bf16.msra.mxu2 %v4266_v4  ;;  %927 = vmatpush.bf16.msra.mxu3 %v4270_v5  ;;  %v4462_v4 = vor.u32 %v4659_v2, %v4459_v3  ;;  %v4677_v7 = vld [vmem:[%s5268_s15 + $0x58] sm:$0xff]  ;;  %v4678_v16 = vld [vmem:[%s5268_s15 + $0x60] sm:$0xff]  ;;  %v4680_v42 = vld [vmem:[%s5268_s15 + $0x70] sm:$0xff] }
  0x24   : > { %4319 = vmatmul.msk.bf16.vlgmr.msra.gmra.mxu0 %vm591_vm2, %v4666_v8  ;;  %4335 = vmatmul.msk.bf16.vlgmr.msra.gmra.mxu1 %vm591_vm2, %v4666_v8 }
  0x25   : > { %1206 = vmatpush.bf16.msrb.mxu0 %v1190_v9  ;;  %1295 = vmatpush.bf16.msrb.mxu1 %v1193_v10 }
  0x26   : > { %4351 = vmatmul.msk.bf16.vlgmr.msra.gmra.mxu2 %vm591_vm2, %v4666_v8  ;;  %4367 = vmatmul.msk.bf16.vlgmr.msra.gmra.mxu3 %vm591_vm2, %v4666_v8 }
  0x27   : > { %1384 = vmatpush.bf16.msrb.mxu2 %v1196_v11  ;;  %1473 = vmatpush.bf16.msrb.mxu3 %v1199_v12 }
  0x29   : > { %1207 = vmatpush.bf16.msrb.mxu0 %v4466_v19  ;;  %1296 = vmatpush.bf16.msrb.mxu1 %v4470_v21 }
  0x2b   : > { %1385 = vmatpush.bf16.msrb.mxu2 %v4474_v25  ;;  %1474 = vmatpush.bf16.msrb.mxu3 %v4478_v29  ;;  %v4679_v25 = vld [vmem:[%s5268_s15 + $0x68] sm:$0xff] }
  0x2d   : > { %1208 = vmatpush.bf16.msrb.mxu0 %v4450_v47  ;;  %1297 = vmatpush.bf16.msrb.mxu1 %v4454_v49 }
  0x2f   : > { %1386 = vmatpush.bf16.msrb.mxu2 %v4458_v61  ;;  %1475 = vmatpush.bf16.msrb.mxu3 %v4462_v4  ;;  %v4681_v61 = vld [vmem:[%s5268_s15 + $0x78] sm:$0xff] }
  0x34   : > { %4320 = vmatmul.msk.bf16.gmra.mxu0 %vm591_vm2, %v4667_v13  ;;  %4336 = vmatmul.msk.bf16.gmra.mxu1 %vm591_vm2, %v4667_v13 }
  0x36   : > { %4352 = vmatmul.msk.bf16.gmra.mxu2 %vm591_vm2, %v4667_v13  ;;  %4368 = vmatmul.msk.bf16.gmra.mxu3 %vm591_vm2, %v4667_v13 }
  0x44   : > { %4321 = vmatmul.msk.bf16.gmra.mxu0 %vm591_vm2, %v4668_v14  ;;  %4337 = vmatmul.msk.bf16.gmra.mxu1 %vm591_vm2, %v4668_v14 }
  0x46   : > { %4353 = vmatmul.msk.bf16.gmra.mxu2 %vm591_vm2, %v4668_v14  ;;  %4369 = vmatmul.msk.bf16.gmra.mxu3 %vm591_vm2, %v4668_v14 }
  0x54   : > { %4322 = vmatmul.msk.bf16.gmra.mxu0 %vm591_vm2, %v4669_v15  ;;  %4338 = vmatmul.msk.bf16.gmra.mxu1 %vm591_vm2, %v4669_v15 }
  0x56   : > { %4354 = vmatmul.msk.bf16.gmra.mxu2 %vm591_vm2, %v4669_v15  ;;  %4370 = vmatmul.msk.bf16.gmra.mxu3 %vm591_vm2, %v4669_v15 }
  0x64   : > { %4323 = vmatmul.msk.bf16.gmra.mxu0 %vm591_vm2, %v4670_v22  ;;  %4339 = vmatmul.msk.bf16.gmra.mxu1 %vm591_vm2, %v4670_v22 }
  0x66   : > { %4355 = vmatmul.msk.bf16.gmra.mxu2 %vm591_vm2, %v4670_v22  ;;  %4371 = vmatmul.msk.bf16.gmra.mxu3 %vm591_vm2, %v4670_v22 }
  0x74   : > { %4324 = vmatmul.msk.bf16.gmra.mxu0 %vm591_vm2, %v4671_v26  ;;  %4340 = vmatmul.msk.bf16.gmra.mxu1 %vm591_vm2, %v4671_v26 }
  0x76   : > { %4356 = vmatmul.msk.bf16.gmra.mxu2 %vm591_vm2, %v4671_v26  ;;  %4372 = vmatmul.msk.bf16.gmra.mxu3 %vm591_vm2, %v4671_v26 }
  0x84   : > { %4325 = vmatmul.msk.bf16.gmra.mxu0 %vm591_vm2, %v4672_v30  ;;  %4341 = vmatmul.msk.bf16.gmra.mxu1 %vm591_vm2, %v4672_v30 }
  0x86   : > { %4357 = vmatmul.msk.bf16.gmra.mxu2 %vm591_vm2, %v4672_v30  ;;  %4373 = vmatmul.msk.bf16.gmra.mxu3 %vm591_vm2, %v4672_v30 }
  0x94   : > { %4326 = vmatmul.msk.bf16.gmra.mxu0 %vm591_vm2, %v4673_v31  ;;  %4342 = vmatmul.msk.bf16.gmra.mxu1 %vm591_vm2, %v4673_v31 }
  0x96   : > { %4358 = vmatmul.msk.bf16.gmra.mxu2 %vm591_vm2, %v4673_v31  ;;  %4374 = vmatmul.msk.bf16.gmra.mxu3 %vm591_vm2, %v4673_v31 }
  0xa1   : > { %v5339_v33 = vpop.f32.mrf.mxu0  ;;  %v5341_v34 = vpop.f32.mrf.mxu1 }
  0xa4   : > { %4327 = vmatmul.msk.bf16.gmra.mxu0 %vm591_vm2, %v4674_v32  ;;  %4343 = vmatmul.msk.bf16.gmra.mxu1 %vm591_vm2, %v4674_v32 }
  0xa6   : > { %4359 = vmatmul.msk.bf16.gmra.mxu2 %vm591_vm2, %v4674_v32  ;;  %4375 = vmatmul.msk.bf16.gmra.mxu3 %vm591_vm2, %v4674_v32 }
  0xa9   : > { %v5347_v35 = vpop.f32.mrf.mxu2  ;;  %v5349_v36 = vpop.f32.mrf.mxu3 }
  0xaa   : > { %v5351_v37 = vpop.f32.mrf.mxu0  ;;  %v5353_v38 = vpop.f32.mrf.mxu1 }
  0xb1   : > { %v5356_v40 = vpop.f32.mrf.mxu2  ;;  %v5358_v41 = vpop.f32.mrf.mxu3 }
  0xb2   : > { %v5369_v45 = vpop.f32.mrf.mxu0  ;;  %v5371_v46 = vpop.f32.mrf.mxu1 }
  0xb4   : > { %4328 = vmatmul.msk.bf16.gmra.mxu0 %vm591_vm2, %v4675_v39  ;;  %4344 = vmatmul.msk.bf16.gmra.mxu1 %vm591_vm2, %v4675_v39 }
  0xb6   : > { %4360 = vmatmul.msk.bf16.gmra.mxu2 %vm591_vm2, %v4675_v39  ;;  %4376 = vmatmul.msk.bf16.gmra.mxu3 %vm591_vm2, %v4675_v39 }
  0xb9   : > { %v5380_v50 = vpop.f32.mrf.mxu2  ;;  %v5382_v51 = vpop.f32.mrf.mxu3 }
  0xba   : > { %v5384_v52 = vpop.f32.mrf.mxu0  ;;  %v5386_v53 = vpop.f32.mrf.mxu1 }
  0xc1   : > { %v5388_v54 = vpop.f32.mrf.mxu2  ;;  %v5390_v55 = vpop.f32.mrf.mxu3 }
  0xc2   : > { %v5393_v57 = vpop.f32.mrf.mxu0  ;;  %v5395_v58 = vpop.f32.mrf.mxu1 }
  0xc4   : > { %4329 = vmatmul.msk.bf16.gmra.mxu0 %vm591_vm2, %v4676_v56  ;;  %4345 = vmatmul.msk.bf16.gmra.mxu1 %vm591_vm2, %v4676_v56 }
  0xc6   : > { %4361 = vmatmul.msk.bf16.gmra.mxu2 %vm591_vm2, %v4676_v56  ;;  %4377 = vmatmul.msk.bf16.gmra.mxu3 %vm591_vm2, %v4676_v56 }
  0xc9   : > { %v5407_v62 = vpop.f32.mrf.mxu2  ;;  %v5409_v63 = vpop.f32.mrf.mxu3 }
  0xca   : > { %v5411_v0 = vpop.f32.mrf.mxu0  ;;  %v5413_v1 = vpop.f32.mrf.mxu1 }
  0xd1   : > { %v5421_v5 = vpop.f32.mrf.mxu2  ;;  %v5423_v6 = vpop.f32.mrf.mxu3 }
  0xd2   : > { %v5426_v8 = vpop.f32.mrf.mxu0  ;;  %v5428_v9 = vpop.f32.mrf.mxu1 }
  0xd4   : > { %4330 = vmatmul.msk.bf16.gmra.mxu0 %vm591_vm2, %v4677_v7  ;;  %4346 = vmatmul.msk.bf16.gmra.mxu1 %vm591_vm2, %v4677_v7 }
  0xd6   : > { %4362 = vmatmul.msk.bf16.gmra.mxu2 %vm591_vm2, %v4677_v7  ;;  %4378 = vmatmul.msk.bf16.gmra.mxu3 %vm591_vm2, %v4677_v7 }
  0xd9   : > { %v5434_v10 = vpop.f32.mrf.mxu2  ;;  %v5436_v11 = vpop.f32.mrf.mxu3 }
  0xda   : > { %v5438_v12 = vpop.f32.mrf.mxu0  ;;  %v5440_v13 = vpop.f32.mrf.mxu1 }
  0xe1   : > { %v5442_v14 = vpop.f32.mrf.mxu2  ;;  %v5444_v15 = vpop.f32.mrf.mxu3 }
  0xe2   : > { %v5447_v17 = vpop.f32.mrf.mxu0  ;;  %v5449_v18 = vpop.f32.mrf.mxu1 }
  0xe3   : > { %8486 = vst [vmem:[#allocation2_spill] sm:$0xff] %v5447_v17 }
  0xe4   : > { %8487 = vst [vmem:[#allocation3_spill] sm:$0xff] %v5449_v18  ;;  %4331 = vmatmul.msk.bf16.gmra.mxu0 %vm591_vm2, %v4678_v16  ;;  %4347 = vmatmul.msk.bf16.gmra.mxu1 %vm591_vm2, %v4678_v16 }
  0xe6   : > { %4363 = vmatmul.msk.bf16.gmra.mxu2 %vm591_vm2, %v4678_v16  ;;  %4379 = vmatmul.msk.bf16.gmra.mxu3 %vm591_vm2, %v4678_v16 }
  0xe9   : > { %v5455_v19 = vpop.f32.mrf.mxu2  ;;  %v5457_v20 = vpop.f32.mrf.mxu3 }
  0xea   : > { %8488 = vst [vmem:[#allocation4_spill] sm:$0xff] %v5455_v19  ;;  %v5459_v21 = vpop.f32.mrf.mxu0  ;;  %v5461_v22 = vpop.f32.mrf.mxu1 }
  0xeb   : > { %8489 = vst [vmem:[#allocation5_spill] sm:$0xff] %v5457_v20 }
  0xec   : > { %8490 = vst [vmem:[#allocation6_spill] sm:$0xff] %v5459_v21  ;;  %v5835_v21 = vld [vmem:[%s5705_s13 + $0x20] sm:$0xff] }
  0xed   : > { %8491 = vst [vmem:[#allocation7_spill] sm:$0xff] %v5461_v22 }
  0xf1   : > { %v5463_v23 = vpop.f32.mrf.mxu2  ;;  %v5465_v24 = vpop.f32.mrf.mxu3 }
  0xf2   : > { %8492 = vst [vmem:[#allocation8_spill] sm:$0xff] %v5463_v23  ;;  %v5468_v26 = vpop.f32.mrf.mxu0  ;;  %v5470_v27 = vpop.f32.mrf.mxu1 }
  0xf3   : > { %8493 = vst [vmem:[#allocation9_spill] sm:$0xff] %v5465_v24 }
  0xf4   : > { %8494 = vst [vmem:[#allocation10_spill] sm:$0xff] %v5468_v26  ;;  %4332 = vmatmul.msk.bf16.gmra.mxu0 %vm591_vm2, %v4679_v25  ;;  %4348 = vmatmul.msk.bf16.gmra.mxu1 %vm591_vm2, %v4679_v25 }
  0xf5   : > { %8495 = vst [vmem:[#allocation11_spill] sm:$0xff] %v5470_v27 }
  0xf6   : > { %4364 = vmatmul.msk.bf16.gmra.mxu2 %vm591_vm2, %v4679_v25  ;;  %4380 = vmatmul.msk.bf16.gmra.mxu3 %vm591_vm2, %v4679_v25 }
  0xf9   : > { %v5476_v28 = vpop.f32.mrf.mxu2  ;;  %v5478_v29 = vpop.f32.mrf.mxu3 }
  0xfa   : > { %8496 = vst [vmem:[#allocation12_spill] sm:$0xff] %v5476_v28  ;;  %v5480_v30 = vpop.f32.mrf.mxu0  ;;  %v5482_v31 = vpop.f32.mrf.mxu1 }
  0xfb   : > { %8497 = vst [vmem:[#allocation13_spill] sm:$0xff] %v5478_v29 }
  0xfc   : > { %8498 = vst [vmem:[#allocation14_spill] sm:$0xff] %v5480_v30  ;;  %v4651_v30 = vld [vmem:[%s5531_s9 + $0x48] sm:$0xff] }
  0xfd   : > { %8499 = vst [vmem:[#allocation15_spill] sm:$0xff] %v5482_v31 }
 0x101   : > { %v5484_v32 = vpop.f32.mrf.mxu2  ;;  %v5486_v39 = vpop.f32.mrf.mxu3 }
 0x102   : > { %8500 = vst [vmem:[#allocation16_spill] sm:$0xff] %v5484_v32  ;;  %v5489_v43 = vpop.f32.mrf.mxu0  ;;  %v5491_v44 = vpop.f32.mrf.mxu1 }
 0x103   : > { %8501 = vst [vmem:[#allocation17_spill] sm:$0xff] %v5486_v39 }
 0x104   : > { %8502 = vst [vmem:[#allocation18_spill] sm:$0xff] %v5489_v43  ;;  %4333 = vmatmul.msk.bf16.gmra.mxu0 %vm591_vm2, %v4680_v42  ;;  %4349 = vmatmul.msk.bf16.gmra.mxu1 %vm591_vm2, %v4680_v42 }
 0x105   : > { %8503 = vst [vmem:[#allocation19_spill] sm:$0xff] %v5491_v44 }
 0x106   : > { %4365 = vmatmul.msk.bf16.gmra.mxu2 %vm591_vm2, %v4680_v42  ;;  %4381 = vmatmul.msk.bf16.gmra.mxu3 %vm591_vm2, %v4680_v42 }
 0x109   : > { %v5497_v47 = vpop.f32.mrf.mxu2  ;;  %v5499_v48 = vpop.f32.mrf.mxu3 }
 0x10a   : > { %8504 = vst [vmem:[#allocation20_spill] sm:$0xff] %v5497_v47  ;;  %v5501_v49 = vpop.f32.mrf.mxu0  ;;  %v5503_v56 = vpop.f32.mrf.mxu1 }
 0x10b   : > { %8505 = vst [vmem:[#allocation21_spill] sm:$0xff] %v5499_v48 }
 0x10c   : > { %8506 = vst [vmem:[#allocation22_spill] sm:$0xff] %v5501_v49 }
 0x10d   : > { %8507 = vst [vmem:[#allocation23_spill] sm:$0xff] %v5503_v56 }
 0x111   : > { %v5505_v59 = vpop.f32.mrf.mxu2  ;;  %v5507_v60 = vpop.f32.mrf.mxu3 }
 0x112   : > { %8508 = vst [vmem:[#allocation24_spill] sm:$0xff] %v5505_v59  ;;  %v5510_v2 = vpop.f32.mrf.mxu0  ;;  %v5512_v3 = vpop.f32.mrf.mxu1 }
 0x113   : > { %8509 = vst [vmem:[#allocation25_spill] sm:$0xff] %v5507_v60 }
 0x114   : > { %8510 = vst [vmem:[#allocation26_spill] sm:$0xff] %v5510_v2  ;;  %4334 = vmatmul.msk.bf16.gmra.mxu0 %vm591_vm2, %v4681_v61  ;;  %4350 = vmatmul.msk.bf16.gmra.mxu1 %vm591_vm2, %v4681_v61 }
 0x115   : > { %8511 = vst [vmem:[#allocation27_spill] sm:$0xff] %v5512_v3  ;;  %v4643_v3 = vld [vmem:[%s5531_s9 + $0x8] sm:$0xff] }
 0x116   : > { %4366 = vmatmul.msk.bf16.gmra.mxu2 %vm591_vm2, %v4681_v61  ;;  %4382 = vmatmul.msk.bf16.gmra.mxu3 %vm591_vm2, %v4681_v61  ;;  %v4642_v61 = vld [vmem:[%s5531_s9] sm:$0xff] }
 0x119   : > { %v5518_v4 = vpop.f32.mrf.mxu2  ;;  %v5520_v7 = vpop.f32.mrf.mxu3 }
 0x11a   : > { %8512 = vst [vmem:[#allocation28_spill] sm:$0xff] %v5518_v4  ;;  %v5522_v16 = vpop.f32.mrf.mxu0  ;;  %v5524_v25 = vpop.f32.mrf.mxu1 }
 0x11b   : > { %8513 = vst [vmem:[#allocation29_spill] sm:$0xff] %v5520_v7 }
 0x11c   : > { %8514 = vst [vmem:[#allocation30_spill] sm:$0xff] %v5522_v16 }
 0x11d   : > { %8515 = vst [vmem:[#allocation31_spill] sm:$0xff] %v5524_v25 }
 0x121   : > { %v5533_v42 = vpop.f32.mrf.mxu2  ;;  %v5535_v60 = vpop.f32.mrf.mxu3 }
 0x122   : > { %8516 = vst [vmem:[#allocation32_spill] sm:$0xff] %v5533_v42  ;;  %v5538_v4 = vpop.f32.mrf.mxu0  ;;  %v5540_v7 = vpop.f32.mrf.mxu1 }
 0x123   : > { %8517 = vst [vmem:[#allocation33_spill] sm:$0xff] %v5535_v60 }
 0x124   : > { %8518 = vst [vmem:[#allocation34_spill] sm:$0xff] %v5538_v4  ;;  %4479 = vmatmul.msk.bf16.vlgmr.msrb.gmra.mxu0 %vm1139_vm3, %v4642_v61  ;;  %4495 = vmatmul.msk.bf16.vlgmr.msrb.gmra.mxu1 %vm1139_vm3, %v4642_v61 }
 0x125   : > { %8519 = vst [vmem:[#allocation35_spill] sm:$0xff] %v5540_v7 }
 0x126   : > { %4511 = vmatmul.msk.bf16.vlgmr.msrb.gmra.mxu2 %vm1139_vm3, %v4642_v61  ;;  %4527 = vmatmul.msk.bf16.vlgmr.msrb.gmra.mxu3 %vm1139_vm3, %v4642_v61 }
 0x129   : > { %v5546_v25 = vpop.f32.mrf.mxu2  ;;  %v5548_v42 = vpop.f32.mrf.mxu3 }
 0x12a   : > { %8520 = vst [vmem:[#allocation36_spill] sm:$0xff] %v5546_v25  ;;  %v5550_v16 = vpop.f32.mrf.mxu0  ;;  %v5552_v60 = vpop.f32.mrf.mxu1 }
 0x12b   : > { %8521 = vst [vmem:[#allocation37_spill] sm:$0xff] %v5548_v42  ;;  %v4644_v42 = vld [vmem:[%s5531_s9 + $0x10] sm:$0xff] }
 0x12c   : > { %8522 = vst [vmem:[#allocation38_spill] sm:$0xff] %v5550_v16 }
 0x12d   : > { %8523 = vst [vmem:[#allocation39_spill] sm:$0xff] %v5552_v60 }
 0x131   : > { %v5554_v4 = vpop.f32.mrf.mxu2  ;;  %v5556_v7 = vpop.f32.mrf.mxu3 }
 0x132   : > { %8524 = vst [vmem:[#allocation40_spill] sm:$0xff] %v5554_v4  ;;  %v5559_v2 = vpop.f32.mrf.mxu0  ;;  %v5561_v59 = vpop.f32.mrf.mxu1 }
 0x133   : > { %8525 = vst [vmem:[#allocation41_spill] sm:$0xff] %v5556_v7 }
 0x134   : > { %8526 = vst [vmem:[#allocation42_spill] sm:$0xff] %v5559_v2  ;;  %4480 = vmatmul.msk.bf16.gmra.mxu0 %vm1139_vm3, %v4643_v3  ;;  %4496 = vmatmul.msk.bf16.gmra.mxu1 %vm1139_vm3, %v4643_v3 }
 0x135   : > { %8527 = vst [vmem:[#allocation43_spill] sm:$0xff] %v5561_v59 }
 0x136   : > { %4512 = vmatmul.msk.bf16.gmra.mxu2 %vm1139_vm3, %v4643_v3  ;;  %4528 = vmatmul.msk.bf16.gmra.mxu3 %vm1139_vm3, %v4643_v3 }
 0x139   : > { %v5567_v61 = vpop.f32.mrf.mxu2  ;;  %v5569_v60 = vpop.f32.mrf.mxu3 }
 0x13a   : > { %8528 = vst [vmem:[#allocation44_spill] sm:$0xff] %v5567_v61  ;;  %v5571_v4 = vpop.f32.mrf.mxu0  ;;  %v5573_v7 = vpop.f32.mrf.mxu1 }
 0x13b   : > { %8529 = vst [vmem:[#allocation45_spill] sm:$0xff] %v5569_v60 }
 0x13c   : > { %8530 = vst [vmem:[#allocation46_spill] sm:$0xff] %v5571_v4 }
 0x13d   : > { %8531 = vst [vmem:[#allocation47_spill] sm:$0xff] %v5573_v7  ;;  %v4645_v7 = vld [vmem:[%s5531_s9 + $0x18] sm:$0xff] }
 0x141   : > { %v5575_v2 = vpop.f32.mrf.mxu2  ;;  %v5577_v59 = vpop.f32.mrf.mxu3 }
 0x142   : > { %8532 = vst [vmem:[#allocation48_spill] sm:$0xff] %v5575_v2  ;;  %v5580_v25 = vpop.f32.mrf.mxu0  ;;  %v5582_v16 = vpop.f32.mrf.mxu1 }
 0x143   : > { %8533 = vst [vmem:[#allocation49_spill] sm:$0xff] %v5577_v59 }
 0x144   : > { %8534 = vst [vmem:[#allocation50_spill] sm:$0xff] %v5580_v25  ;;  %4481 = vmatmul.msk.bf16.gmra.mxu0 %vm1139_vm3, %v4644_v42  ;;  %4497 = vmatmul.msk.bf16.gmra.mxu1 %vm1139_vm3, %v4644_v42 }
 0x145   : > { %8535 = vst [vmem:[#allocation51_spill] sm:$0xff] %v5582_v16 }
 0x146   : > { %4513 = vmatmul.msk.bf16.gmra.mxu2 %vm1139_vm3, %v4644_v42  ;;  %4529 = vmatmul.msk.bf16.gmra.mxu3 %vm1139_vm3, %v4644_v42 }
 0x149   : > { %v5588_v3 = vpop.f32.mrf.mxu2  ;;  %v5590_v60 = vpop.f32.mrf.mxu3 }
 0x14a   : > { %8536 = vst [vmem:[#allocation52_spill] sm:$0xff] %v5588_v3  ;;  %v5592_v2 = vpop.f32.mrf.mxu0  ;;  %v5594_v59 = vpop.f32.mrf.mxu1 }
 0x14b   : > { %8537 = vst [vmem:[#allocation53_spill] sm:$0xff] %v5590_v60 }
 0x14c   : > { %8538 = vst [vmem:[#allocation54_spill] sm:$0xff] %v5592_v2  ;;  %v4646_v2 = vld [vmem:[%s5531_s9 + $0x20] sm:$0xff] }
 0x14d   : > { %8539 = vst [vmem:[#allocation55_spill] sm:$0xff] %v5594_v59 }
 0x151   : > { %v5596_v25 = vpop.f32.mrf.mxu2  ;;  %v5598_v16 = vpop.f32.mrf.mxu3 }
 0x152   : > { %8540 = vst [vmem:[#allocation56_spill] sm:$0xff] %v5596_v25  ;;  %v5601_v4 = vpop.f32.mrf.mxu0  ;;  %v5603_v61 = vpop.f32.mrf.mxu1 }
 0x153   : > { %8541 = vst [vmem:[#allocation57_spill] sm:$0xff] %v5598_v16 }
 0x154   : > { %8542 = vst [vmem:[#allocation58_spill] sm:$0xff] %v5601_v4  ;;  %4482 = vmatmul.msk.bf16.gmra.mxu0 %vm1139_vm3, %v4645_v7  ;;  %4498 = vmatmul.msk.bf16.gmra.mxu1 %vm1139_vm3, %v4645_v7 }
 0x155   : > { %8543 = vst [vmem:[#allocation59_spill] sm:$0xff] %v5603_v61 }
 0x156   : > { %4514 = vmatmul.msk.bf16.gmra.mxu2 %vm1139_vm3, %v4645_v7  ;;  %4530 = vmatmul.msk.bf16.gmra.mxu3 %vm1139_vm3, %v4645_v7 }
 0x159   : > { %v5609_v42 = vpop.f32.mrf.mxu2  ;;  %v5611_v59 = vpop.f32.mrf.mxu3 }
 0x15a   : > { %8544 = vst [vmem:[#allocation60_spill] sm:$0xff] %v5609_v42  ;;  %v5613_v25 = vpop.f32.mrf.mxu0  ;;  %v5615_v16 = vpop.f32.mrf.mxu1 }
 0x15b   : > { %8545 = vst [vmem:[#allocation61_spill] sm:$0xff] %v5611_v59 }
 0x15c   : > { %8546 = vst [vmem:[#allocation62_spill] sm:$0xff] %v5613_v25  ;;  %v4647_v25 = vld [vmem:[%s5531_s9 + $0x28] sm:$0xff] }
 0x15d   : > { %8547 = vst [vmem:[#allocation63_spill] sm:$0xff] %v5615_v16 }
 0x161   : > { %v5617_v4 = vpop.f32.mrf.mxu2  ;;  %v5619_v61 = vpop.f32.mrf.mxu3 }
 0x162   : > { %8548 = vst [vmem:[#allocation64_spill] sm:$0xff] %v5617_v4  ;;  %v5622_v60 = vpop.f32.mrf.mxu0  ;;  %v5624_v3 = vpop.f32.mrf.mxu1 }
 0x163   : > { %8549 = vst [vmem:[#allocation65_spill] sm:$0xff] %v5619_v61 }
 0x164   : > { %8550 = vst [vmem:[#allocation66_spill] sm:$0xff] %v5622_v60  ;;  %4483 = vmatmul.msk.bf16.gmra.mxu0 %vm1139_vm3, %v4646_v2  ;;  %4499 = vmatmul.msk.bf16.gmra.mxu1 %vm1139_vm3, %v4646_v2 }
 0x165   : > { %8551 = vst [vmem:[#allocation67_spill] sm:$0xff] %v5624_v3 }
 0x166   : > { %4515 = vmatmul.msk.bf16.gmra.mxu2 %vm1139_vm3, %v4646_v2  ;;  %4531 = vmatmul.msk.bf16.gmra.mxu3 %vm1139_vm3, %v4646_v2 }
 0x169   : > { %v5630_v7 = vpop.f32.mrf.mxu2  ;;  %v5632_v16 = vpop.f32.mrf.mxu3 }
 0x16a   : > { %8552 = vst [vmem:[#allocation68_spill] sm:$0xff] %v5630_v7  ;;  %v5634_v4 = vpop.f32.mrf.mxu0  ;;  %v5636_v61 = vpop.f32.mrf.mxu1 }
 0x16b   : > { %8553 = vst [vmem:[#allocation69_spill] sm:$0xff] %v5632_v16 }
 0x16c   : > { %8554 = vst [vmem:[#allocation70_spill] sm:$0xff] %v5634_v4 }
 0x16d   : > { %8555 = vst [vmem:[#allocation71_spill] sm:$0xff] %v5636_v61  ;;  %v4648_v61 = vld [vmem:[%s5531_s9 + $0x30] sm:$0xff] }
 0x171   : > { %v5638_v60 = vpop.f32.mrf.mxu2  ;;  %v5640_v3 = vpop.f32.mrf.mxu3 }
 0x172   : > { %8556 = vst [vmem:[#allocation72_spill] sm:$0xff] %v5638_v60  ;;  %v5643_v59 = vpop.f32.mrf.mxu0  ;;  %v5645_v42 = vpop.f32.mrf.mxu1 }
 0x173   : > { %8557 = vst [vmem:[#allocation73_spill] sm:$0xff] %v5640_v3 }
 0x174   : > { %8558 = vst [vmem:[#allocation74_spill] sm:$0xff] %v5643_v59  ;;  %4484 = vmatmul.msk.bf16.gmra.mxu0 %vm1139_vm3, %v4647_v25  ;;  %4500 = vmatmul.msk.bf16.gmra.mxu1 %vm1139_vm3, %v4647_v25 }
 0x175   : > { %8559 = vst [vmem:[#allocation75_spill] sm:$0xff] %v5645_v42 }
 0x176   : > { %4516 = vmatmul.msk.bf16.gmra.mxu2 %vm1139_vm3, %v4647_v25  ;;  %4532 = vmatmul.msk.bf16.gmra.mxu3 %vm1139_vm3, %v4647_v25 }
 0x179   : > { %v5651_v2 = vpop.f32.mrf.mxu2  ;;  %v5653_v16 = vpop.f32.mrf.mxu3 }
 0x17a   : > { %8560 = vst [vmem:[#allocation76_spill] sm:$0xff] %v5651_v2  ;;  %v5655_v60 = vpop.f32.mrf.mxu0  ;;  %v5657_v3 = vpop.f32.mrf.mxu1 }
 0x17b   : > { %8561 = vst [vmem:[#allocation77_spill] sm:$0xff] %v5653_v16 }
 0x17c   : > { %8562 = vst [vmem:[#allocation78_spill] sm:$0xff] %v5655_v60  ;;  %v4649_v60 = vld [vmem:[%s5531_s9 + $0x38] sm:$0xff] }
 0x17d   : > { %8563 = vst [vmem:[#allocation79_spill] sm:$0xff] %v5657_v3 }
 0x181   : > { %v5659_v59 = vpop.f32.mrf.mxu2  ;;  %v5661_v42 = vpop.f32.mrf.mxu3 }
 0x182   : > { %8564 = vst [vmem:[#allocation80_spill] sm:$0xff] %v5659_v59  ;;  %v5664_v4 = vpop.f32.mrf.mxu0  ;;  %v5666_v7 = vpop.f32.mrf.mxu1 }
 0x183   : > { %8565 = vst [vmem:[#allocation81_spill] sm:$0xff] %v5661_v42 }
 0x184   : > { %8566 = vst [vmem:[#allocation82_spill] sm:$0xff] %v5664_v4  ;;  %4485 = vmatmul.msk.bf16.gmra.mxu0 %vm1139_vm3, %v4648_v61  ;;  %4501 = vmatmul.msk.bf16.gmra.mxu1 %vm1139_vm3, %v4648_v61 }
 0x185   : > { %8567 = vst [vmem:[#allocation83_spill] sm:$0xff] %v5666_v7 }
 0x186   : > { %4517 = vmatmul.msk.bf16.gmra.mxu2 %vm1139_vm3, %v4648_v61  ;;  %4533 = vmatmul.msk.bf16.gmra.mxu3 %vm1139_vm3, %v4648_v61 }
 0x189   : > { %v5672_v25 = vpop.f32.mrf.mxu2  ;;  %v5674_v3 = vpop.f32.mrf.mxu3 }
 0x18a   : > { %8568 = vst [vmem:[#allocation84_spill] sm:$0xff] %v5672_v25  ;;  %v5676_v59 = vpop.f32.mrf.mxu0  ;;  %v5678_v42 = vpop.f32.mrf.mxu1 }
 0x18b   : > { %8569 = vst [vmem:[#allocation85_spill] sm:$0xff] %v5674_v3 }
 0x18c   : > { %8570 = vst [vmem:[#allocation86_spill] sm:$0xff] %v5676_v59  ;;  %v4650_v59 = vld [vmem:[%s5531_s9 + $0x40] sm:$0xff] }
 0x18d   : > { %8571 = vst [vmem:[#allocation87_spill] sm:$0xff] %v5678_v42 }
 0x191   : > { %v5680_v4 = vpop.f32.mrf.mxu2  ;;  %v5682_v7 = vpop.f32.mrf.mxu3 }
 0x192   : > { %8572 = vst [vmem:[#allocation88_spill] sm:$0xff] %v5680_v4  ;;  %v5685_v16 = vpop.f32.mrf.mxu0  ;;  %v5687_v2 = vpop.f32.mrf.mxu1 }
 0x193   : > { %8573 = vst [vmem:[#allocation89_spill] sm:$0xff] %v5682_v7 }
 0x194   : > { %8574 = vst [vmem:[#allocation90_spill] sm:$0xff] %v5685_v16  ;;  %4486 = vmatmul.msk.bf16.gmra.mxu0 %vm1139_vm3, %v4649_v60  ;;  %4502 = vmatmul.msk.bf16.gmra.mxu1 %vm1139_vm3, %v4649_v60 }
 0x195   : > { %8575 = vst [vmem:[#allocation91_spill] sm:$0xff] %v5687_v2  ;;  %v1557_v2 = vld [vmem:[%s8484_s6] sm:$0xf] }
 0x196   : > { %4518 = vmatmul.msk.bf16.gmra.mxu2 %vm1139_vm3, %v4649_v60  ;;  %4534 = vmatmul.msk.bf16.gmra.mxu3 %vm1139_vm3, %v4649_v60  ;;  %v5711_v60 = vld [vmem:[%s5705_s13] sm:$0xff]  ;;  %v5723_v16 = vperm.slane %v1557_v2, 0  ;;  %v5725_v42 = vperm.slane %v1557_v2, 1  ;;  %v5754_v28 = vperm.slane %v1557_v2, 2 }
 0x199   : > { %v5693_v61 = vpop.f32.mrf.mxu2  ;;  %v5695_v3 = vpop.f32.mrf.mxu3 }
 0x19a   : > { %8576 = vst [vmem:[#allocation92_spill] sm:$0xff] %v5693_v61  ;;  %v5697_v4 = vpop.f32.mrf.mxu0  ;;  %v5699_v7 = vpop.f32.mrf.mxu1  ;;  %v1728_v61 = vld [vmem:[%s8481_s3 + $0x8] sm:$0xff] }
 0x19b   : > { %8577 = vst [vmem:[#allocation93_spill] sm:$0xff] %v5695_v3  ;;  %v1727_v3 = vld [vmem:[%s8481_s3] sm:$0xff]  ;;  %v2495_v39 = vmul.f32 %v1728_v61, %v5711_v60 }
 0x19c   : > { %8578 = vst [vmem:[#allocation94_spill] sm:$0xff] %v5697_v4  ;;  %v1823_v49 = vmul.f32 %v1727_v3, %v5711_v60 }
 0x19d   : > { %8579 = vst [vmem:[#allocation95_spill] sm:$0xff] %v5699_v7 }
 0x1a1   : > { %v5719_v7 = vpop.f32.mrf.mxu2  ;;  %v5721_v4 = vpop.f32.mrf.mxu3 }
 0x1a2   : > { %8580 = vst [vmem:[#allocation96_spill] sm:$0xff] %v5719_v7  ;;  %v1210_v25 = vpop.f32.mrf.mxu0  ;;  %v1299_v48 = vpop.f32.mrf.mxu1 }
 0x1a3   : > { %8581 = vst [vmem:[#allocation97_spill] sm:$0xff] %v5721_v4  ;;  %v1211_v56 = vadd.f32 %v1210_v25, %v5339_v33  ;;  %v1300_v47 = vadd.f32 %v1299_v48, %v5341_v34  ;;  %v5739_v25 = vld [vmem:[%s5705_s13 + $0x8] sm:$0xff]  ;;  %v1730_v34 = vld [vmem:[%s8481_s3 + $0x18] sm:$0xff] }
 0x1a4   : > { %4487 = vmatmul.msk.bf16.gmra.mxu0 %vm1139_vm3, %v4650_v59  ;;  %4503 = vmatmul.msk.bf16.gmra.mxu1 %vm1139_vm3, %v4650_v59  ;;  %v1824_v43 = vmul.f32 %v1730_v34, %v5739_v25 }
 0x1a5   : > { %v1567_v7 = vadd.f32 %v5723_v16, %v1211_v56  ;;  %v1568_v4 = vadd.f32 %v5725_v42, %v1300_v47  ;;  %v1731_v47 = vld [vmem:[%s8481_s3 + $0x20] sm:$0xff] }
 0x1a6   : > { %4519 = vmatmul.msk.bf16.gmra.mxu2 %vm1139_vm3, %v4650_v59  ;;  %4535 = vmatmul.msk.bf16.gmra.mxu3 %vm1139_vm3, %v4650_v59 }
 0x1a7   : > { %v1855_v44 = vadd.f32 %v1823_v49, %v1567_v7  ;;  %v2527_v33 = vadd.f32 %v2495_v39, %v1568_v4  ;;  %v2496_v7 = vmul.f32 %v1731_v47, %v5739_v25 }
 0x1a9   : > { %v4543_v48 = vmul.f32 -1.442695, %v1855_v44  ;;  %v4575_v56 = vmul.f32 -1.442695, %v2527_v33  ;;  %v1388_v3 = vpop.f32.mrf.mxu2  ;;  %v1477_v39 = vpop.f32.mrf.mxu3 }
 0x1aa   : > { %v1212_v61 = vpop.f32.mrf.mxu0  ;;  %v1301_v59 = vpop.f32.mrf.mxu1  ;;  %v1389_v34 = vadd.f32 %v1388_v3, %v5347_v35  ;;  %v1734_v3 = vld [vmem:[%s8481_s3 + $0x38] sm:$0xff] }
 0x1ab   : > { %4706 = vpow2.f32 %v4543_v48  ;;  %v1213_v49 = vadd.f32 %v1212_v61, %v5351_v37  ;;  %v1302_v4 = vadd.f32 %v1301_v59, %v5353_v38 }
 0x1ac   : > { %4708 = vpow2.f32 %v4575_v56  ;;  %v5760_v56 = vld [vmem:[%s5705_s13 + $0x10] sm:$0xff] }
 0x1ad   : > { %v1571_v32 = vadd.f32 %v5723_v16, %v1213_v49  ;;  %v1572_v44 = vadd.f32 %v5725_v42, %v1302_v4 }
 0x1af   : > { %v1856_v33 = vadd.f32 %v1824_v43, %v1571_v32  ;;  %v2528_v29 = vadd.f32 %v2496_v7, %v1572_v44  ;;  %v1733_v32 = vld [vmem:[%s8481_s3 + $0x30] sm:$0xff]  ;;  %v5777_v7 = vld [vmem:[%s5705_s13 + $0x18] sm:$0xff]  ;;  %v1736_v44 = vld [vmem:[%s8481_s3 + $0x48] sm:$0xff] }
 0x1b1   : > { %v4707_v31 = vpop.eup %4706  ;;  %v4544_v48 = vmul.f32 -1.442695, %v1856_v33  ;;  %v4576_v61 = vmul.f32 -1.442695, %v2528_v29  ;;  %v1478_v29 = vadd.f32 %v1477_v39, %v5349_v36  ;;  %v1390_v49 = vpop.f32.mrf.mxu2  ;;  %v5787_v33 = vadd.f32 %v5754_v28, %v1389_v34 }
 0x1b2   : > { %v4709_v37 = vpop.eup %4708  ;;  %v5757_v38 = vadd.f32 1.0, %v4707_v31  ;;  %v1215_v47 = vpop.f32.mrf.mxu0  ;;  %v5773_v31 = vperm.slane %v1557_v2, 3  ;;  %v1825_v2 = vmul.f32 %v1733_v32, %v5760_v56 }
 0x1b3   : > { %v1304_v43 = vpop.f32.mrf.mxu1  ;;  %v5765_v59 = vadd.f32 1.0, %v4709_v37  ;;  %4710 = vpow2.f32 %v4544_v48  ;;  %v1216_v35 = vadd.f32 %v1215_v47, %v5369_v45  ;;  %v1737_v45 = vld [vmem:[%s8481_s3 + $0x50] sm:$0xff]  ;;  %v1479_v36 = vpop.f32.mrf.mxu3  ;;  %v5797_v48 = vmul.f32 %v1736_v44, %v5777_v7 }
 0x1b4   : > { %4712 = vrcp.f32 %v5757_v38  ;;  %v1305_v4 = vadd.f32 %v1304_v43, %v5371_v46  ;;  %4488 = vmatmul.msk.bf16.gmra.mxu0 %vm1139_vm3, %v4651_v30  ;;  %4504 = vmatmul.msk.bf16.gmra.mxu1 %vm1139_vm3, %v4651_v30  ;;  %v2497_v46 = vmul.f32 %v1734_v3, %v5760_v56  ;;  %v5800_v34 = vmul.f32 %v1737_v45, %v5777_v7 }
 0x1b5   : > { %4714 = vrcp.f32 %v5765_v59  ;;  %v1575_v39 = vadd.f32 %v5723_v16, %v1216_v35  ;;  %v2024_v37 = vand.u32 2147483647, %v5757_v38  ;;  %v5804_v47 = vadd.f32 %v5773_v31, %v1478_v29 }
 0x1b6   : > { %4716 = vpow2.f32 %v4576_v61  ;;  %4520 = vmatmul.msk.bf16.gmra.mxu2 %vm1139_vm3, %v4651_v30  ;;  %4536 = vmatmul.msk.bf16.gmra.mxu3 %vm1139_vm3, %v4651_v30  ;;  %v1391_v61 = vadd.f32 %v1390_v49, %v5356_v40  ;;  %v1576_v32 = vadd.f32 %v5725_v42, %v1305_v4  ;;  %v2026_v30 = vand.u32 2147483648, %v5757_v38 }
 0x1b7   : > { %v2696_v35 = vand.u32 2147483647, %v5765_v59  ;;  %v1857_v44 = vadd.f32 %v1825_v2, %v1575_v39  ;;  %vm2020_vm4 = vweird.f32 %v5757_v38  ;;  %v1480_v29 = vadd.f32 %v1479_v36, %v5358_v41 }
 0x1b8   : > { %v2529_v27 = vadd.f32 %v2497_v46, %v1576_v32  ;;  %vm2692_vm5 = vweird.f32 %v5765_v59  ;;  %v2698_v49 = vand.u32 2147483648, %v5765_v59  ;;  %vm5819_vm6 = vcmp.eq.f32.partialorder %v2024_v37, 8.507059e+37 }
 0x1b9   : > { %v4711_v43 = vpop.eup %4710  ;;  %v4545_v4 = vmul.f32 -1.442695, %v1857_v44  ;;  %v5825_v41 = vadd.f32 %v5754_v28, %v1391_v61  ;;  %v2027_v46 = vor.u32 1.1754944e-38, %v2026_v30  ;;  %vm5827_vm7 = vcmp.eq.f32.partialorder %v2696_v35, 8.507059e+37  ;;  %v1393_v37 = vpop.f32.mrf.mxu2  ;;  %v1739_v61 = vld [vmem:[%s8481_s3 + $0x60] sm:$0xff] }
 0x1ba   : > { %v4713_v24 = vpop.eup %4712  ;;  %v5812_v45 = vadd.f32 1.0, %v4711_v43  ;;  %v1217_v23 = vpop.f32.mrf.mxu0  ;;  %v4577_v22 = vmul.f32 -1.442695, %v2529_v27  ;;  %v2699_v35 = vor.u32 1.1754944e-38, %v2698_v49  ;;  %v4652_v49 = vld [vmem:[%s5531_s9 + $0x50] sm:$0xff] }
 0x1bb   : > { %v4715_v26 = vpop.eup %4714  ;;  %v2016_v40 = vmul.f32 %v4713_v24, %v5757_v38  ;;  %v1218_v20 = vadd.f32 %v1217_v23, %v5384_v52  ;;  %vm2021_vm8 = vweird.f32 %v4713_v24  ;;  %v1394_v23 = vadd.f32 %v1393_v37, %v5380_v50 }
 0x1bc   : > { %v4717_v3 = vpop.eup %4716  ;;  %v2688_v2 = vmul.f32 %v4715_v26, %v5765_v59  ;;  %4718 = vrcp.f32 %v5812_v45  ;;  %vm2693_vm9 = vweird.f32 %v4715_v26  ;;  %vm2022_vm10 = vmor %vm2020_vm4, %vm2021_vm8  ;;  %vm2035_vm11 = vweird.f32 %v5812_v45 }
 0x1bd   : > { %v2017_v36 = vsub.f32 1.0, %v2016_v40  ;;  %v5831_v43 = vadd.f32 1.0, %v4717_v3  ;;  %4720 = vpow2.f32 %v4545_v4  ;;  %v1482_v3 = vpop.f32.mrf.mxu3  ;;  %v5843_v4 = vadd.f32 %v5773_v31, %v1480_v29  ;;  %vm2694_vm12 = vmor %vm2692_vm5, %vm2693_vm9 }
 0x1be   : > { %v2689_v44 = vsub.f32 1.0, %v2688_v2  ;;  %v1306_v2 = vpop.f32.mrf.mxu1  ;;  %v5855_v29 = vadd.f32 %v1482_v3, %v5382_v51  ;;  %v2041_v38 = vand.u32 2147483648, %v5812_v45 }
 0x1bf   : > { %v2018_v30 = vmul.f32 %v4713_v24, %v2017_v36  ;;  %4722 = vrcp.f32 %v5831_v43  ;;  %v5847_v36 = vmul.f32 %v1739_v61, %v5835_v21  ;;  %v2039_v61 = vand.u32 2147483647, %v5812_v45 }
 0x1c0   : > { %v2690_v40 = vmul.f32 %v4715_v26, %v2689_v44  ;;  %4724 = vpow2.f32 %v4577_v22  ;;  %v1579_v22 = vadd.f32 %v5723_v16, %v1218_v20  ;;  %v1307_v20 = vadd.f32 %v1306_v2, %v5386_v53 }
 0x1c1   : > { %v2019_v52 = vadd.f32 %v4713_v24, %v2018_v30  ;;  %v5880_v53 = vadd.f32 %v5754_v28, %v1394_v23  ;;  %v2042_v32 = vor.u32 1.1754944e-38, %v2041_v38  ;;  %v2711_v2 = vand.u32 2147483647, %v5831_v43 }
 0x1c2   : > { %v4719_v19 = vpop.eup %4718  ;;  %v2691_v44 = vadd.f32 %v4715_v26, %v2690_v40  ;;  %v1858_v3 = vadd.f32 %v5797_v48, %v1579_v22  ;;  %v2713_v22 = vand.u32 2147483648, %v5831_v43  ;;  %vm2040_vm0 = vcmp.eq.f32.partialorder %v2039_v61, 8.507059e+37 }
 0x1c3   : > { %v2023_v50 = vsel %vm2022_vm10, %v4713_v24, %v2019_v52  ;;  %v2031_v37 = vmul.f32 %v4719_v19, %v5812_v45  ;;  %v4721_v30 = vpop.eup %4720  ;;  %v8586_v52 = vmax.f32 %v5787_v33, 0.0  ;;  %vm2036_vm13 = vweird.f32 %v4719_v19 }
 0x1c4   : > { %v2028_v40 = vsel %vm5819_vm6, %v2027_v46, %v2023_v50  ;;  %v2695_v51 = vsel %vm2694_vm12, %v4715_v26, %v2691_v44  ;;  %v5873_v17 = vadd.f32 1.0, %v4721_v30  ;;  %4489 = vmatmul.msk.bf16.gmra.mxu0 %vm1139_vm3, %v4652_v49  ;;  %4505 = vmatmul.msk.bf16.gmra.mxu1 %vm1139_vm3, %v4652_v49  ;;  %v4546_v39 = vmul.f32 -1.442695, %v1858_v3  ;;  %vm2037_vm14 = vmor %vm2035_vm11, %vm2036_vm13 }
 0x1c5   : > { %v4723_v24 = vpop.eup %4722  ;;  %v2700_v59 = vsel %vm5827_vm7, %v2699_v35, %v2695_v51  ;;  %v3199_v27 = vmul.f32 %v8586_v52, %v2028_v40  ;;  %v2032_v18 = vsub.f32 1.0, %v2031_v37  ;;  %v1580_v50 = vadd.f32 %v5725_v42, %v1307_v20  ;;  %v1395_v37 = vpop.f32.mrf.mxu2 }
 0x1c6   : > { %v3231_v26 = vmul.f32 %v2700_v59, %v5711_v60  ;;  %v2703_v48 = vmul.f32 %v4723_v24, %v5831_v43  ;;  %4521 = vmatmul.msk.bf16.gmra.mxu2 %vm1139_vm3, %v4652_v49  ;;  %4537 = vmatmul.msk.bf16.gmra.mxu3 %vm1139_vm3, %v4652_v49  ;;  %v4725_v33 = vpop.eup %4724  ;;  %v1729_v60 = vld [vmem:[%s8481_s3 + $0x10] sm:$0xff]  ;;  %4726 = vrcp.f32 %v5873_v17  ;;  %vm2708_vm15 = vweird.f32 %v4723_v24 }
 0x1c7   : > { %v2033_v46 = vmul.f32 %v4719_v19, %v2032_v18  ;;  %v5896_v49 = vadd.f32 1.0, %v4725_v33  ;;  %4728 = vpow2.f32 %v4546_v39  ;;  %vm2707_vm1 = vweird.f32 %v5831_v43 }
 0x1c8   : > { %v5893_v35 = vadd.f32 %v3231_v26, %v3199_v27  ;;  %v2704_v23 = vsub.f32 1.0, %v2703_v48  ;;  %v3169_v30 = vmax.f32 %v5880_v53, 0.0  ;;  %vm2712_vm2 = vcmp.eq.f32.partialorder %v2711_v2, 8.507059e+37  ;;  %vm2709_vm4 = vmor %vm2707_vm1, %vm2708_vm15 }
 0x1c9   : > { %v2034_v44 = vadd.f32 %v4719_v19, %v2033_v46  ;;  %4730 = vrcp.f32 %v5896_v49  ;;  %v2714_v45 = vor.u32 1.1754944e-38, %v2713_v22  ;;  %v2054_v59 = vand.u32 2147483647, %v5873_v17  ;;  %v1220_v22 = vpop.f32.mrf.mxu0 }
 0x1ca   : > { %4063 = vst [vmem:[%s5887_s18 + $0x8] sm:$0xff] %v5893_v35  ;;  %v3295_v18 = vmul.f32 %v5893_v35, %v1729_v60  ;;  %v2705_v27 = vmul.f32 %v4723_v24, %v2704_v23  ;;  %v2530_v52 = vadd.f32 %v5800_v34, %v1580_v50  ;;  %v1396_v26 = vadd.f32 %v1395_v37, %v5388_v54 }
 0x1cb   : > { %v2038_v38 = vsel %vm2037_vm14, %v4719_v19, %v2034_v44  ;;  %v8587_v43 = vmax.f32 %v5825_v41, 0.0  ;;  %v2056_v60 = vand.u32 2147483648, %v5873_v17  ;;  %v2726_v46 = vand.u32 2147483647, %v5896_v49  ;;  %v1732_v41 = vld [vmem:[%s8481_s3 + $0x28] sm:$0xff] }
 0x1cc   : > { %v3327_v40 = vadd.f32 %v3295_v18, %v5804_v47  ;;  %v2043_v51 = vsel %vm2040_vm0, %v2042_v32, %v2038_v38  ;;  %v2706_v3 = vadd.f32 %v4723_v24, %v2705_v27  ;;  %v4727_v20 = vpop.eup %4726  ;;  %v4578_v32 = vmul.f32 -1.442695, %v2530_v52 }
 0x1cd   : > { %v3200_v48 = vmul.f32 %v8587_v43, %v2043_v51  ;;  %v2046_v39 = vmul.f32 %v4727_v20, %v5873_v17  ;;  %v4729_v47 = vpop.eup %4728  ;;  %vm2050_vm5 = vweird.f32 %v5873_v17  ;;  %v2728_v44 = vand.u32 2147483648, %v5896_v49 }
 0x1ce   : > { %v4607_v19 = vmul.f32 -1.442695, %v3327_v40  ;;  %v2710_v61 = vsel %vm2709_vm4, %v4723_v24, %v2706_v3  ;;  %v5918_v54 = vadd.f32 1.0, %v4729_v47  ;;  %vm2051_vm6 = vweird.f32 %v4727_v20 }
 0x1cf   : > { %v2715_v33 = vsel %vm2712_vm2, %v2714_v45, %v2710_v61  ;;  %v4731_v23 = vpop.eup %4730  ;;  %v2047_v2 = vsub.f32 1.0, %v2046_v39  ;;  %vm5929_vm7 = vcmp.eq.f32.partialorder %v2054_v59, 8.507059e+37  ;;  %v2057_v38 = vor.u32 1.1754944e-38, %v2056_v60  ;;  %v1484_v45 = vpop.f32.mrf.mxu3  ;;  %vm2052_vm10 = vmor %vm2050_vm5, %vm2051_vm6 }
 0x1d0   : > { %4732 = vpow2.f32 %v4607_v19  ;;  %v3232_v34 = vmul.f32 %v2715_v33, %v5739_v25  ;;  %v2718_v24 = vmul.f32 %v4731_v23, %v5896_v49  ;;  %v1309_v25 = vpop.f32.mrf.mxu1  ;;  %vm2722_vm8 = vweird.f32 %v5896_v49 }
 0x1d1   : > { %4734 = vpow2.f32 %v4578_v32  ;;  %v2048_v18 = vmul.f32 %v4727_v20, %v2047_v2  ;;  %vm5937_vm9 = vcmp.eq.f32.partialorder %v2726_v46, 8.507059e+37  ;;  %v1221_v52 = vadd.f32 %v1220_v22, %v5393_v57  ;;  %v1740_v57 = vld [vmem:[%s8481_s3 + $0x68] sm:$0xff] }
 0x1d2   : > { %v5926_v50 = vadd.f32 %v3232_v34, %v3200_v48  ;;  %4736 = vrcp.f32 %v5918_v54  ;;  %v2719_v27 = vsub.f32 1.0, %v2718_v24  ;;  %v2729_v19 = vor.u32 1.1754944e-38, %v2728_v44 }
 0x1d3   : > { %v2049_v51 = vadd.f32 %v4727_v20, %v2048_v18  ;;  %v5945_v61 = vadd.f32 %v5754_v28, %v1396_v26  ;;  %v1310_v43 = vadd.f32 %v1309_v25, %v5395_v58  ;;  %vm2723_vm11 = vweird.f32 %v4731_v23 }
 0x1d4   : > { %4064 = vst [vmem:[%s5887_s18 + $0x18] sm:$0xff] %v5926_v50  ;;  %v3296_v40 = vmul.f32 %v5926_v50, %v1732_v41  ;;  %v2720_v59 = vmul.f32 %v4731_v23, %v2719_v27  ;;  %v1583_v33 = vadd.f32 %v5723_v16, %v1221_v52  ;;  %v1485_v58 = vadd.f32 %v1484_v45, %v5390_v55  ;;  %vm2724_vm12 = vmor %vm2722_vm8, %vm2723_vm11 }
 0x1d5   : > { %v2053_v47 = vsel %vm2052_vm10, %v4727_v20, %v2049_v51  ;;  %v2069_v34 = vand.u32 2147483647, %v5918_v54  ;;  %v2071_v2 = vand.u32 2147483648, %v5918_v54  ;;  %v1584_v24 = vadd.f32 %v5725_v42, %v1310_v43 }
 0x1d6   : > { %v4733_v48 = vpop.eup %4732  ;;  %v3328_v39 = vadd.f32 %v3296_v40, %v5843_v4  ;;  %v2058_v26 = vsel %vm5929_vm7, %v2057_v38, %v2053_v47  ;;  %v2721_v46 = vadd.f32 %v4731_v23, %v2720_v59  ;;  %v1859_v41 = vadd.f32 %v5847_v36, %v1583_v33  ;;  %v1398_v59 = vpop.f32.mrf.mxu2 }
 0x1d7   : > { %v4735_v17 = vpop.eup %4734  ;;  %v5953_v60 = vadd.f32 1.0, %v4733_v48  ;;  %v2499_v55 = vmul.f32 %v1740_v57, %v5835_v21  ;;  %v3201_v22 = vmul.f32 %v3169_v30, %v2058_v26  ;;  %v3967_v25 = vmax.f32 %v5893_v35, 0.0  ;;  %v1742_v35 = vld [vmem:[%s8481_s3 + $0x78] sm:$0xff] }
 0x1d8   : > { %v5958_v32 = vpop.eup %4736  ;;  %v4608_v4 = vmul.f32 -1.442695, %v3328_v39  ;;  %v5960_v20 = vadd.f32 1.0, %v4735_v17  ;;  %v2725_v44 = vsel %vm2724_vm12, %v4731_v23, %v2721_v46  ;;  %v1578_v36 = vadd.f32 %v5773_v31, %v5855_v29  ;;  %v1735_v23 = vld [vmem:[%s8481_s3 + $0x40] sm:$0xff]  ;;  %v4653_v39 = vld [vmem:[%s5531_s9 + $0x58] sm:$0xff] }
 0x1d9   : > { %4738 = vrcp.f32 %v5953_v60  ;;  %v2061_v18 = vmul.f32 %v5958_v32, %v5918_v54  ;;  %v2730_v49 = vsel %vm5937_vm9, %v2729_v19, %v2725_v44  ;;  %vm2065_vm13 = vweird.f32 %v5918_v54  ;;  %4490 = vmatmul.msk.bf16.gmra.mxu0 %vm1139_vm3, %v4653_v39  ;;  %4506 = vmatmul.msk.bf16.gmra.mxu1 %vm1139_vm3, %v4653_v39 }
 0x1da   : > { %4740 = vpow2.f32 %v4608_v4  ;;  %v3233_v27 = vmul.f32 %v2730_v49, %v5760_v56  ;;  %v3170_v53 = vmax.f32 %v5945_v61, 0.0  ;;  %v3968_v30 = vmax.f32 %v5926_v50, 0.0  ;;  %4522 = vmatmul.msk.bf16.gmra.mxu2 %vm1139_vm3, %v4653_v39  ;;  %4538 = vmatmul.msk.bf16.gmra.mxu3 %vm1139_vm3, %v4653_v39 }
 0x1db   : > { %4742 = vrcp.f32 %v5960_v20  ;;  %v2062_v37 = vsub.f32 1.0, %v2061_v18  ;;  %v5988_v38 = vadd.f32 %v5773_v31, %v1485_v58  ;;  %v4547_v29 = vmul.f32 -1.442695, %v1859_v41 }
 0x1dc   : > { %v2531_v40 = vadd.f32 %v2499_v55, %v1584_v24  ;;  %v3496_v56 = vand.u32 2147483647, %v5953_v60  ;;  %v5991_v51 = vadd.f32 %v3233_v27, %v3201_v22  ;;  %vm5994_vm14 = vcmp.eq.f32.partialorder %v2069_v34, 8.507059e+37  ;;  %v1487_v55 = vpop.f32.mrf.mxu3 }
 0x1dd   : > { %v2063_v3 = vmul.f32 %v5958_v32, %v2062_v37  ;;  %v2072_v52 = vor.u32 1.1754944e-38, %v2071_v2  ;;  %vm3492_vm15 = vweird.f32 %v5953_v60  ;;  %v3498_v43 = vand.u32 2147483648, %v5953_v60 }
 0x1de   : > { %4744 = vpow2.f32 %v4547_v29  ;;  %v4579_v48 = vmul.f32 -1.442695, %v2531_v40  ;;  %4065 = vst [vmem:[%s5887_s18 + $0x28] sm:$0xff] %v5991_v51  ;;  %v3297_v57 = vmul.f32 %v5991_v51, %v1735_v23  ;;  %vm2066_vm0 = vweird.f32 %v5958_v32 }
 0x1df   : > { %v4739_v19 = vpop.eup %4738  ;;  %v2741_v17 = vand.u32 2147483647, %v5960_v20  ;;  %v2064_v58 = vadd.f32 %v5958_v32, %v2063_v3  ;;  %v1399_v4 = vadd.f32 %v1398_v59, %v5407_v62  ;;  %vm6013_vm1 = vcmp.eq.f32.partialorder %v3496_v56, 8.507059e+37  ;;  %vm6025_vm4 = vmor %vm2065_vm13, %vm2066_vm0 }
 0x1e0   : > { %v4741_v47 = vpop.eup %4740  ;;  %v3488_v33 = vmul.f32 %v4739_v19, %v5953_v60  ;;  %4746 = vpow2.f32 %v4579_v48  ;;  %v3329_v41 = vadd.f32 %v3297_v57, %v1578_v36  ;;  %vm3493_vm2 = vweird.f32 %v4739_v19  ;;  %v1222_v57 = vpop.f32.mrf.mxu0 }
 0x1e1   : > { %v4743_v26 = vpop.eup %4742  ;;  %v6007_v46 = vadd.f32 1.0, %v4741_v47  ;;  %v3499_v44 = vor.u32 1.1754944e-38, %v3498_v43  ;;  %v2743_v22 = vand.u32 2147483648, %v5960_v20  ;;  %v2068_v27 = vsel %vm6025_vm4, %v5958_v32, %v2064_v58  ;;  %vm3494_vm8 = vmor %vm3492_vm15, %vm3493_vm2 }
 0x1e2   : > { %v3489_v34 = vsub.f32 1.0, %v3488_v33  ;;  %v2733_v24 = vmul.f32 %v4743_v26, %v5960_v20  ;;  %v4609_v49 = vmul.f32 -1.442695, %v3329_v41  ;;  %vm2737_vm5 = vweird.f32 %v5960_v20 }
 0x1e3   : > { %4748 = vrcp.f32 %v6007_v46  ;;  %vm6034_vm6 = vcmp.eq.f32.partialorder %v2741_v17, 8.507059e+37  ;;  %v6039_v54 = vadd.f32 %v5754_v28, %v1399_v4  ;;  %v6042_v29 = vadd.f32 %v1487_v55, %v5409_v63  ;;  %v1311_v17 = vpop.f32.mrf.mxu1 }
 0x1e4   : > { %v3490_v18 = vmul.f32 %v4739_v19, %v3489_v34  ;;  %v2734_v36 = vsub.f32 1.0, %v2733_v24  ;;  %v4745_v37 = vpop.eup %4744  ;;  %4750 = vpow2.f32 %v4609_v49  ;;  %vm2738_vm7 = vweird.f32 %v4743_v26  ;;  %v6073_v24 = vld [vmem:[%s5705_s13 + $0x28] sm:$0xff] }
 0x1e5   : > { %v3969_v32 = vmax.f32 %v5991_v51, 0.0  ;;  %v2073_v59 = vsel %vm5994_vm14, %v2072_v52, %v2068_v27  ;;  %v2744_v43 = vor.u32 1.1754944e-38, %v2743_v22  ;;  %v6050_v48 = vadd.f32 1.0, %v4745_v37  ;;  %vm2739_vm9 = vmor %vm2737_vm5, %vm2738_vm7 }
 0x1e6   : > { %v3491_v40 = vadd.f32 %v4739_v19, %v3490_v18  ;;  %v2735_v56 = vmul.f32 %v4743_v26, %v2734_v36  ;;  %v4747_v3 = vpop.eup %4746  ;;  %v3511_v63 = vand.u32 2147483647, %v6007_v46  ;;  %v3513_v45 = vand.u32 2147483648, %v6007_v46 }
 0x1e7   : > { %v6053_v33 = vadd.f32 1.0, %v4747_v3  ;;  %4752 = vrcp.f32 %v6050_v48  ;;  %v3171_v52 = vmax.f32 %v6039_v54, 0.0  ;;  %v3202_v2 = vmul.f32 %v3170_v53, %v2073_v59 }
 0x1e8   : > { %v3495_v39 = vsel %vm3494_vm8, %v4739_v19, %v3491_v40  ;;  %v2736_v47 = vadd.f32 %v4743_v26, %v2735_v56  ;;  %v1223_v20 = vadd.f32 %v1222_v57, %v5411_v0  ;;  %vm3507_vm10 = vweird.f32 %v6007_v46  ;;  %v1743_v0 = vld [vmem:[%s8481_s3 + $0x80] sm:$0xff]  ;;  %v1225_v61 = vpop.f32.mrf.mxu0 }
 0x1e9   : > { %v4749_v58 = vpop.eup %4748  ;;  %v3500_v60 = vsel %vm6013_vm1, %v3499_v44, %v3495_v39  ;;  %4754 = vrcp.f32 %v6053_v33  ;;  %vm6081_vm11 = vcmp.eq.f32.partialorder %v3511_v63, 8.507059e+37  ;;  %v3514_v44 = vor.u32 1.1754944e-38, %v3513_v45 }
 0x1ea   : > { %v3999_v19 = vmul.f32 %v3967_v25, %v3500_v60  ;;  %v3503_v4 = vmul.f32 %v4749_v58, %v6007_v46  ;;  %v2740_v34 = vsel %vm2739_vm9, %v4743_v26, %v2736_v47  ;;  %v1312_v25 = vadd.f32 %v1311_v17, %v5413_v1  ;;  %v4751_v55 = vpop.eup %4750  ;;  %v1738_v1 = vld [vmem:[%s8481_s3 + $0x58] sm:$0xff] }
 0x1eb   : > { %v2745_v41 = vsel %vm6034_vm6, %v2744_v43, %v2740_v34  ;;  %v6089_v62 = vadd.f32 1.0, %v4751_v55  ;;  %v2084_v22 = vand.u32 2147483647, %v6050_v48  ;;  %v2086_v18 = vand.u32 2147483648, %v6050_v48 }
 0x1ec   : > { %4031 = vst [vmem:[%s5887_s18] sm:$0xff] %v3999_v19  ;;  %v3504_v26 = vsub.f32 1.0, %v3503_v4  ;;  %v3234_v53 = vmul.f32 %v2745_v41, %v5777_v7  ;;  %vm3508_vm12 = vweird.f32 %v4749_v58  ;;  %v1828_v7 = vmul.f32 %v1742_v35, %v6073_v24  ;;  %v1400_v19 = vpop.f32.mrf.mxu2 }
 0x1ed   : > { %v4753_v27 = vpop.eup %4752  ;;  %4756 = vrcp.f32 %v6089_v62  ;;  %v1587_v37 = vadd.f32 %v5723_v16, %v1223_v20  ;;  %v1588_v23 = vadd.f32 %v5725_v42, %v1312_v25  ;;  %v2500_v40 = vmul.f32 %v1743_v0, %v6073_v24  ;;  %vm3509_vm14 = vmor %vm3507_vm10, %vm3508_vm12  ;;  %v6131_v0 = vld [vmem:[%s5705_s13 + $0x30] sm:$0xff] }
 0x1ee   : > { %v3505_v49 = vmul.f32 %v4749_v58, %v3504_v26  ;;  %v6096_v36 = vadd.f32 %v3234_v53, %v3202_v2  ;;  %v2076_v59 = vmul.f32 %v4753_v27, %v6050_v48  ;;  %vm2080_vm13 = vweird.f32 %v6050_v48 }
 0x1ef   : > { %v4755_v43 = vpop.eup %4754  ;;  %vm6110_vm15 = vcmp.eq.f32.partialorder %v2084_v22, 8.507059e+37  ;;  %v2087_v63 = vor.u32 1.1754944e-38, %v2086_v18  ;;  %vm2752_vm0 = vweird.f32 %v6053_v33  ;;  %v2756_v47 = vand.u32 2147483647, %v6053_v33  ;;  %v1489_v18 = vpop.f32.mrf.mxu3 }
 0x1f0   : > { %v3506_v56 = vadd.f32 %v4749_v58, %v3505_v49  ;;  %4066 = vst [vmem:[%s5887_s18 + $0x38] sm:$0xff] %v6096_v36  ;;  %v3298_v3 = vmul.f32 %v6096_v36, %v1738_v1  ;;  %v2748_v60 = vmul.f32 %v4755_v43, %v6053_v33  ;;  %v2077_v45 = vsub.f32 1.0, %v2076_v59  ;;  %v1314_v49 = vpop.f32.mrf.mxu1 }
 0x1f1   : > { %vm2081_vm1 = vweird.f32 %v4753_v27  ;;  %v1860_v4 = vadd.f32 %v1828_v7, %v1587_v37  ;;  %v2532_v34 = vadd.f32 %v2500_v40, %v1588_v23  ;;  %vm6122_vm2 = vcmp.eq.f32.partialorder %v2756_v47, 8.507059e+37 }
 0x1f2   : > { %v3510_v57 = vsel %vm3509_vm14, %v4749_v58, %v3506_v56  ;;  %v3330_v17 = vadd.f32 %v3298_v3, %v5988_v38  ;;  %v2749_v20 = vsub.f32 1.0, %v2748_v60  ;;  %v2078_v58 = vmul.f32 %v4753_v27, %v2077_v45  ;;  %vm2082_vm4 = vmor %vm2080_vm13, %vm2081_vm1 }
 0x1f3   : > { %v3515_v46 = vsel %vm6081_vm11, %v3514_v44, %v3510_v57  ;;  %v4757_v35 = vpop.eup %4756  ;;  %v2758_v25 = vand.u32 2147483648, %v6053_v33  ;;  %v4548_v55 = vmul.f32 -1.442695, %v1860_v4  ;;  %v4580_v26 = vmul.f32 -1.442695, %v2532_v34  ;;  %v1745_v44 = vld [vmem:[%s8481_s3 + $0x90] sm:$0xff] }
 0x1f4   : > { %v4000_v2 = vmul.f32 %v3968_v30, %v3515_v46  ;;  %v4610_v41 = vmul.f32 -1.442695, %v3330_v17  ;;  %v3518_v53 = vmul.f32 %v4757_v35, %v6089_v62  ;;  %v3526_v50 = vand.u32 2147483647, %v6089_v62 }
 0x1f5   : > { %v2079_v30 = vadd.f32 %v4753_v27, %v2078_v58  ;;  %v3528_v1 = vand.u32 2147483648, %v6089_v62  ;;  %v2750_v22 = vmul.f32 %v4755_v43, %v2749_v20  ;;  %vm2753_vm5 = vweird.f32 %v4755_v43 }
 0x1f6   : > { %4032 = vst [vmem:[%s5887_s18 + $0x10] sm:$0xff] %v4000_v2  ;;  %4758 = vpow2.f32 %v4610_v41  ;;  %v3519_v7 = vsub.f32 1.0, %v3518_v53  ;;  %v1226_v23 = vadd.f32 %v1225_v61, %v5426_v8  ;;  %v2759_v3 = vor.u32 1.1754944e-38, %v2758_v25  ;;  %vm2754_vm7 = vmor %vm2752_vm0, %vm2753_vm5  ;;  %v1746_v8 = vld [vmem:[%s8481_s3 + $0x98] sm:$0xff]  ;;  %v4654_v25 = vld [vmem:[%s5531_s9 + $0x60] sm:$0xff] }
 0x1f7   : > { %4760 = vpow2.f32 %v4548_v55  ;;  %v2083_v37 = vsel %vm2082_vm4, %v4753_v27, %v2079_v30  ;;  %v2751_v56 = vadd.f32 %v4755_v43, %v2750_v22  ;;  %v1829_v59 = vmul.f32 %v1745_v44, %v6131_v0  ;;  %v1492_v53 = vpop.f32.mrf.mxu3  ;;  %v1227_v30 = vpop.f32.mrf.mxu0  ;;  %4491 = vmatmul.msk.bf16.gmra.mxu0 %vm1139_vm3, %v4654_v25  ;;  %4507 = vmatmul.msk.bf16.gmra.mxu1 %vm1139_vm3, %v4654_v25 }
 0x1f8   : > { %4762 = vpow2.f32 %v4580_v26  ;;  %v2088_v40 = vsel %vm6110_vm15, %v2087_v63, %v2083_v37  ;;  %v3520_v47 = vmul.f32 %v4757_v35, %v3519_v7  ;;  %vm3523_vm6 = vweird.f32 %v4757_v35  ;;  %4523 = vmatmul.msk.bf16.gmra.mxu2 %vm1139_vm3, %v4654_v25  ;;  %4539 = vmatmul.msk.bf16.gmra.mxu3 %vm1139_vm3, %v4654_v25 }
 0x1f9   : > { %v1591_v48 = vadd.f32 %v5723_v16, %v1226_v23  ;;  %v1315_v57 = vadd.f32 %v1314_v49, %v5428_v9  ;;  %vm3522_vm8 = vweird.f32 %v6089_v62  ;;  %v3529_v27 = vor.u32 1.1754944e-38, %v3528_v1  ;;  %v1403_v9 = vpop.f32.mrf.mxu2 }
 0x1fa   : > { %v2755_v39 = vsel %vm2754_vm7, %v4755_v43, %v2751_v56  ;;  %v1401_v63 = vadd.f32 %v1400_v19, %v5421_v5  ;;  %v3521_v60 = vadd.f32 %v4757_v35, %v3520_v47  ;;  %v3203_v45 = vmul.f32 %v3171_v52, %v2088_v40  ;;  %vm3524_vm9 = vmor %vm3522_vm8, %vm3523_vm6 }
 0x1fb   : > { %v2760_v33 = vsel %vm6122_vm2, %v2759_v3, %v2755_v39  ;;  %v1861_v46 = vadd.f32 %v1829_v59, %v1591_v48  ;;  %v1592_v43 = vadd.f32 %v5725_v42, %v1315_v57  ;;  %v2501_v5 = vmul.f32 %v1746_v8, %v6131_v0  ;;  %v6217_v48 = vld [vmem:[%s5705_s13 + $0x38] sm:$0xff]  ;;  %v1748_v57 = vld [vmem:[%s8481_s3 + $0xa8] sm:$0xff] }
 0x1fc   : > { %v4759_v17 = vpop.eup %4758  ;;  %v3235_v62 = vmul.f32 %v2760_v33, %v5835_v21  ;;  %v3525_v2 = vsel %vm3524_vm9, %v4757_v35, %v3521_v60  ;;  %vm3527_vm10 = vcmp.eq.f32.partialorder %v3526_v50, 8.507059e+37  ;;  %v1490_v54 = vadd.f32 %v1489_v18, %v5423_v6  ;;  %v1741_v21 = vld [vmem:[%s8481_s3 + $0x70] sm:$0xff] }
 0x1fd   : > { %v4761_v4 = vpop.eup %4760  ;;  %v6158_v34 = vadd.f32 1.0, %v4759_v17  ;;  %v3530_v52 = vsel %vm3527_vm10, %v3529_v27, %v3525_v2  ;;  %v6171_v20 = vadd.f32 %v5754_v28, %v1401_v63  ;;  %v1404_v58 = vadd.f32 %v1403_v9, %v5434_v10  ;;  %v1316_v17 = vpop.f32.mrf.mxu1 }
 0x1fe   : > { %v4763_v19 = vpop.eup %4762  ;;  %v6163_v41 = vadd.f32 1.0, %v4761_v4  ;;  %v4001_v35 = vmul.f32 %v3969_v32, %v3530_v52  ;;  %v6176_v38 = vadd.f32 %v3235_v62, %v3203_v45  ;;  %v4549_v6 = vmul.f32 -1.442695, %v1861_v46  ;;  %v1749_v4 = vld [vmem:[%s8481_s3 + $0xb0] sm:$0xff] }
 0x1ff   : > { %4764 = vrcp.f32 %v6158_v34  ;;  %v1586_v55 = vadd.f32 %v5773_v31, %v6042_v29  ;;  %v6182_v26 = vadd.f32 1.0, %v4763_v19  ;;  %v2533_v61 = vadd.f32 %v2501_v5, %v1592_v43  ;;  %v1230_v27 = vpop.f32.mrf.mxu0 }
 0x200   : > { %4766 = vrcp.f32 %v6163_v41  ;;  %4033 = vst [vmem:[%s5887_s18 + $0x20] sm:$0xff] %v4001_v35  ;;  %v3970_v10 = vmax.f32 %v6096_v36, 0.0  ;;  %v3541_v51 = vand.u32 2147483647, %v6158_v34  ;;  %v3543_v32 = vand.u32 2147483648, %v6158_v34 }
 0x201   : > { %v3299_v50 = vmul.f32 %v6176_v38, %v1741_v21  ;;  %4067 = vst [vmem:[%s5887_s18 + $0x48] sm:$0xff] %v6176_v38  ;;  %4768 = vrcp.f32 %v6182_v26  ;;  %v2099_v29 = vand.u32 2147483647, %v6163_v41  ;;  %v3172_v44 = vmax.f32 %v6171_v20, 0.0  ;;  %v1405_v2 = vpop.f32.mrf.mxu2 }
 0x202   : > { %v6197_v1 = vadd.f32 %v5773_v31, %v1490_v54  ;;  %4770 = vpow2.f32 %v4549_v6  ;;  %v6202_v18 = vadd.f32 %v5754_v28, %v1404_v58  ;;  %v6205_v49 = vadd.f32 %v1492_v53, %v5436_v11 }
 0x203   : > { %v3331_v22 = vadd.f32 %v3299_v50, %v1586_v55  ;;  %vm3537_vm11 = vweird.f32 %v6158_v34  ;;  %vm2095_vm12 = vweird.f32 %v6163_v41  ;;  %v4581_v37 = vmul.f32 -1.442695, %v2533_v61 }
 0x204   : > { %v1228_v23 = vadd.f32 %v1227_v30, %v5438_v12  ;;  %vm6211_vm13 = vcmp.eq.f32.partialorder %v3541_v51, 8.507059e+37  ;;  %v3544_v59 = vor.u32 1.1754944e-38, %v3543_v32  ;;  %v2101_v11 = vand.u32 2147483648, %v6163_v41 }
 0x205   : > { %v4765_v7 = vpop.eup %4764  ;;  %v4611_v47 = vmul.f32 -1.442695, %v3331_v22  ;;  %v3971_v8 = vmax.f32 %v6176_v38, 0.0  ;;  %vm6224_vm14 = vcmp.eq.f32.partialorder %v2099_v29, 8.507059e+37  ;;  %4772 = vpow2.f32 %v4581_v37 }
 0x206   : > { %v4767_v40 = vpop.eup %4766  ;;  %v3533_v56 = vmul.f32 %v4765_v7, %v6158_v34  ;;  %vm2767_vm15 = vweird.f32 %v6182_v26  ;;  %v2773_v63 = vand.u32 2147483648, %v6182_v26  ;;  %v2771_v45 = vand.u32 2147483647, %v6182_v26 }
 0x207   : > { %v2091_v12 = vmul.f32 %v4767_v40, %v6163_v41  ;;  %4774 = vpow2.f32 %v4611_v47  ;;  %v4769_v60 = vpop.eup %4768  ;;  %v1595_v46 = vadd.f32 %v5723_v16, %v1228_v23  ;;  %v1830_v9 = vmul.f32 %v1748_v57, %v6217_v48  ;;  %v1494_v23 = vpop.f32.mrf.mxu3 }
 0x208   : > { %v3534_v39 = vsub.f32 1.0, %v3533_v56  ;;  %v4771_v62 = vpop.eup %4770  ;;  %vm3538_vm0 = vweird.f32 %v4765_v7  ;;  %v2763_v5 = vmul.f32 %v4769_v60, %v6182_v26  ;;  %v2102_v19 = vor.u32 1.1754944e-38, %v2101_v11 }
 0x209   : > { %v2092_v33 = vsub.f32 1.0, %v2091_v12  ;;  %vm2096_vm1 = vweird.f32 %v4767_v40  ;;  %v6237_v52 = vadd.f32 1.0, %v4771_v62  ;;  %v1317_v21 = vadd.f32 %v1316_v17, %v5440_v13  ;;  %vm3539_vm2 = vmor %vm3537_vm11, %vm3538_vm0  ;;  %v1751_v17 = vld [vmem:[%s8481_s3 + $0xc0] sm:$0xff] }
 0x20a   : > { %v3535_v43 = vmul.f32 %v4765_v7, %v3534_v39  ;;  %v2764_v35 = vsub.f32 1.0, %v2763_v5  ;;  %v2774_v6 = vor.u32 1.1754944e-38, %v2773_v63  ;;  %v2502_v25 = vmul.f32 %v1749_v4, %v6217_v48  ;;  %vm2097_vm4 = vmor %vm2095_vm12, %vm2096_vm1  ;;  %v8612_v62 = vld [vmem:[#allocation2_spill] sm:$0xff] }
 0x20b   : > { %v2093_v54 = vmul.f32 %v4767_v40, %v2092_v33  ;;  %v4773_v55 = vpop.eup %4772  ;;  %4776 = vrcp.f32 %v6237_v52  ;;  %v1862_v53 = vadd.f32 %v1830_v9, %v1595_v46  ;;  %v1406_v51 = vadd.f32 %v1405_v2, %v5442_v14 }
 0x20c   : > { %v3536_v58 = vadd.f32 %v4765_v7, %v3535_v43  ;;  %v2765_v13 = vmul.f32 %v4769_v60, %v2764_v35  ;;  %vm2768_vm5 = vweird.f32 %v4769_v60  ;;  %v6248_v30 = vadd.f32 1.0, %v4773_v55 }
 0x20d   : > { %v2094_v61 = vadd.f32 %v4767_v40, %v2093_v54  ;;  %v4775_v32 = vpop.eup %4774  ;;  %v1596_v37 = vadd.f32 %v5725_v42, %v1317_v21  ;;  %vm2769_vm6 = vmor %vm2767_vm15, %vm2768_vm5  ;;  %v2114_v56 = vand.u32 2147483647, %v6237_v52  ;;  %v4550_v3 = vmul.f32 -1.442695, %v1862_v53 }
 0x20e   : > { %v3540_v50 = vsel %vm3539_vm2, %v4765_v7, %v3536_v58  ;;  %v6252_v29 = vadd.f32 1.0, %v4775_v32  ;;  %v2766_v7 = vadd.f32 %v4769_v60, %v2765_v13  ;;  %4778 = vrcp.f32 %v6248_v30 }
 0x20f   : > { %v3545_v34 = vsel %vm6211_vm13, %v3544_v59, %v3540_v50  ;;  %v2098_v22 = vsel %vm2097_vm4, %v4767_v40, %v2094_v61  ;;  %v2116_v40 = vand.u32 2147483648, %v6237_v52  ;;  %vm2772_vm7 = vcmp.eq.f32.partialorder %v2771_v45, 8.507059e+37 }
 0x210   : > { %v4002_v14 = vmul.f32 %v3970_v10, %v3545_v34  ;;  %v2103_v41 = vsel %vm6224_vm14, %v2102_v19, %v2098_v22  ;;  %4780 = vrcp.f32 %v6252_v29  ;;  %v2770_v36 = vsel %vm2769_vm6, %v4769_v60, %v2766_v7  ;;  %v1752_v7 = vld [vmem:[%s8481_s3 + $0xc8] sm:$0xff] }
 0x211   : > { %v3204_v10 = vmul.f32 %v3172_v44, %v2103_v41  ;;  %v3173_v59 = vmax.f32 %v6202_v18, 0.0  ;;  %v4777_v47 = vpop.eup %4776  ;;  %v3558_v11 = vand.u32 2147483648, %v6252_v29  ;;  %v2775_v57 = vsel %vm2772_vm7, %v2774_v6, %v2770_v36  ;;  %v6281_v44 = vld [vmem:[%s5705_s13 + $0x40] sm:$0xff]  ;;  %v8616_v18 = vld [vmem:[#allocation4_spill] sm:$0xff] }
 0x212   : > { %4034 = vst [vmem:[%s5887_s18 + $0x30] sm:$0xff] %v4002_v14  ;;  %v6271_v26 = vadd.f32 %v5754_v28, %v1406_v51  ;;  %v6274_v12 = vadd.f32 %v1494_v23, %v5444_v15  ;;  %v3556_v39 = vand.u32 2147483647, %v6252_v29  ;;  %v3236_v63 = vmul.f32 %v2775_v57, %v6073_v24  ;;  %v1744_v15 = vld [vmem:[%s8481_s3 + $0x88] sm:$0xff] }
 0x213   : > { %v2106_v20 = vmul.f32 %v4777_v47, %v6237_v52  ;;  %vm2110_vm8 = vweird.f32 %v6237_v52  ;;  %vm6289_vm9 = vcmp.eq.f32.partialorder %v2114_v56, 8.507059e+37  ;;  %v2117_v33 = vor.u32 1.1754944e-38, %v2116_v40  ;;  %v8615_v14 = vld [vmem:[#allocation3_spill] sm:$0xff] }
 0x214   : > { %vm2782_vm10 = vweird.f32 %v6248_v30  ;;  %4782 = vpow2.f32 %v4550_v3  ;;  %v2534_v24 = vadd.f32 %v2502_v25, %v1596_v37  ;;  %v4779_v45 = vpop.eup %4778  ;;  %vm3552_vm11 = vweird.f32 %v6252_v29  ;;  %v1319_v25 = vpop.f32.mrf.mxu1 }
 0x215   : > { %v6295_v46 = vadd.f32 %v3236_v63, %v3204_v10  ;;  %v2107_v9 = vsub.f32 1.0, %v2106_v20  ;;  %v2786_v4 = vand.u32 2147483647, %v6248_v30  ;;  %v1231_v43 = vadd.f32 %v1230_v27, %v8612_v62  ;;  %v1408_v63 = vpop.f32.mrf.mxu2 }
 0x216   : > { %v4781_v5 = vpop.eup %4780  ;;  %v3559_v19 = vor.u32 1.1754944e-38, %v3558_v11  ;;  %v2778_v2 = vmul.f32 %v4779_v45, %v6248_v30  ;;  %v4582_v54 = vmul.f32 -1.442695, %v2534_v24  ;;  %v1831_v21 = vmul.f32 %v1751_v17, %v6281_v44 }
 0x217   : > { %v3548_v58 = vmul.f32 %v4781_v5, %v6252_v29  ;;  %4068 = vst [vmem:[%s5887_s18 + $0x58] sm:$0xff] %v6295_v46  ;;  %v3300_v35 = vmul.f32 %v6295_v46, %v1744_v15  ;;  %vm2111_vm12 = vweird.f32 %v4777_v47  ;;  %v2788_v6 = vand.u32 2147483648, %v6248_v30  ;;  %v1747_v29 = vld [vmem:[%s8481_s3 + $0xa0] sm:$0xff] }
 0x218   : > { %v2779_v55 = vsub.f32 1.0, %v2778_v2  ;;  %v2108_v61 = vmul.f32 %v4777_v47, %v2107_v9  ;;  %4784 = vpow2.f32 %v4582_v54  ;;  %v1599_v53 = vadd.f32 %v5723_v16, %v1231_v43  ;;  %vm2112_vm0 = vmor %vm2110_vm8, %vm2111_vm12  ;;  %v1232_v2 = vpop.f32.mrf.mxu0 }
 0x219   : > { %v3549_v51 = vsub.f32 1.0, %v3548_v58  ;;  %v3332_v32 = vadd.f32 %v3300_v35, %v6197_v1  ;;  %vm2783_vm13 = vweird.f32 %v4779_v45  ;;  %vm6308_vm14 = vcmp.eq.f32.partialorder %v2786_v4, 8.507059e+37  ;;  %v4655_v4 = vld [vmem:[%s5531_s9 + $0x68] sm:$0xff] }
 0x21a   : > { %v4783_v13 = vpop.eup %4782  ;;  %v2109_v34 = vadd.f32 %v4777_v47, %v2108_v61  ;;  %v2780_v22 = vmul.f32 %v4779_v45, %v2779_v55  ;;  %v1863_v37 = vadd.f32 %v1831_v21, %v1599_v53  ;;  %v1320_v41 = vadd.f32 %v1319_v25, %v8615_v14  ;;  %vm2784_vm1 = vmor %vm2782_vm10, %vm2783_vm13  ;;  %4492 = vmatmul.msk.bf16.gmra.mxu0 %vm1139_vm3, %v4655_v4  ;;  %v6380_v55 = vld [vmem:[%s5705_s13 + $0x48] sm:$0xff]  ;;  %v1754_v61 = vld [vmem:[%s8481_s3 + $0xd8] sm:$0xff]  ;;  %v1497_v14 = vpop.f32.mrf.mxu3 }
 0x21b   : > { %v3550_v23 = vmul.f32 %v4781_v5, %v3549_v51  ;;  %vm3553_vm15 = vweird.f32 %v4781_v5  ;;  %v4612_v56 = vmul.f32 -1.442695, %v3332_v32  ;;  %v6319_v1 = vadd.f32 1.0, %v4783_v13  ;;  %4508 = vmatmul.msk.bf16.gmra.mxu1 %vm1139_vm3, %v4655_v4  ;;  %4524 = vmatmul.msk.bf16.gmra.mxu2 %vm1139_vm3, %v4655_v4  ;;  %v8619_v32 = vld [vmem:[#allocation6_spill] sm:$0xff] }
 0x21c   : > { %v2113_v40 = vsel %vm2112_vm0, %v4777_v47, %v2109_v34  ;;  %v2781_v3 = vadd.f32 %v4779_v45, %v2780_v22  ;;  %v2789_v36 = vor.u32 1.1754944e-38, %v2788_v6  ;;  %v4551_v10 = vmul.f32 -1.442695, %v1863_v37  ;;  %vm3554_vm2 = vmor %vm3552_vm11, %vm3553_vm15  ;;  %4540 = vmatmul.msk.bf16.gmra.mxu3 %vm1139_vm3, %v4655_v4 }
 0x21d   : > { %v3551_v11 = vadd.f32 %v4781_v5, %v3550_v23  ;;  %4786 = vpow2.f32 %v4612_v56  ;;  %v2118_v57 = vsel %vm6289_vm9, %v2117_v33, %v2113_v40  ;;  %v2503_v27 = vmul.f32 %v1752_v7, %v6281_v44  ;;  %v1321_v40 = vpop.f32.mrf.mxu1 }
 0x21e   : > { %v4785_v52 = vpop.eup %4784  ;;  %v2785_v47 = vsel %vm2784_vm1, %v4779_v45, %v2781_v3  ;;  %v3205_v20 = vmul.f32 %v3173_v59, %v2118_v57  ;;  %4788 = vrcp.f32 %v6319_v1  ;;  %v1600_v17 = vadd.f32 %v5725_v42, %v1320_v41 }
 0x21f   : > { %v3555_v15 = vsel %vm3554_vm2, %v4781_v5, %v3551_v11  ;;  %vm3557_vm4 = vcmp.eq.f32.partialorder %v3556_v39, 8.507059e+37  ;;  %v2790_v30 = vsel %vm6308_vm14, %v2789_v36, %v2785_v47  ;;  %v6338_v60 = vadd.f32 1.0, %v4785_v52 }
 0x220   : > { %v3560_v33 = vsel %vm3557_vm4, %v3559_v19, %v3555_v15  ;;  %v3237_v24 = vmul.f32 %v2790_v30, %v6131_v0  ;;  %4790 = vpow2.f32 %v4551_v10  ;;  %v1409_v59 = vadd.f32 %v1408_v63, %v8616_v18  ;;  %v1755_v18 = vld [vmem:[%s8481_s3 + $0xe0] sm:$0xff] }
 0x221   : > { %v4003_v45 = vmul.f32 %v3971_v8, %v3560_v33  ;;  %4792 = vrcp.f32 %v6338_v60  ;;  %v2129_v39 = vand.u32 2147483647, %v6319_v1  ;;  %v2131_v9 = vand.u32 2147483648, %v6319_v1 }
 0x222   : > { %v6351_v62 = vadd.f32 %v3237_v24, %v3205_v20  ;;  %v2535_v0 = vadd.f32 %v2503_v27, %v1600_v17  ;;  %v3972_v38 = vmax.f32 %v6295_v46, 0.0  ;;  %v1594_v8 = vadd.f32 %v5773_v31, %v6205_v49  ;;  %v8622_v27 = vld [vmem:[#allocation5_spill] sm:$0xff]  ;;  %v8623_v20 = vld [vmem:[#allocation7_spill] sm:$0xff] }
 0x223   : > { %v4787_v43 = vpop.eup %4786  ;;  %4035 = vst [vmem:[%s5887_s18 + $0x40] sm:$0xff] %v4003_v45  ;;  %v3174_v5 = vmax.f32 %v6271_v26, 0.0  ;;  %v6360_v19 = vadd.f32 %v5773_v31, %v6274_v12  ;;  %vm2125_vm5 = vweird.f32 %v6319_v1  ;;  %v6370_v49 = vadd.f32 %v5754_v28, %v1409_v59  ;;  %v1750_v26 = vld [vmem:[%s8481_s3 + $0xb8] sm:$0xff] }
 0x224   : > { %v4789_v54 = vpop.eup %4788  ;;  %v6363_v21 = vadd.f32 1.0, %v4787_v43  ;;  %4069 = vst [vmem:[%s5887_s18 + $0x68] sm:$0xff] %v6351_v62  ;;  %v3301_v58 = vmul.f32 %v6351_v62, %v1747_v29  ;;  %vm6375_vm6 = vcmp.eq.f32.partialorder %v2129_v39, 8.507059e+37  ;;  %v2132_v6 = vor.u32 1.1754944e-38, %v2131_v9 }
 0x225   : > { %v2121_v12 = vmul.f32 %v4789_v54, %v6319_v1  ;;  %v4583_v25 = vmul.f32 -1.442695, %v2535_v0  ;;  %vm2797_vm7 = vweird.f32 %v6338_v60  ;;  %v2801_v51 = vand.u32 2147483647, %v6338_v60 }
 0x226   : > { %v4791_v53 = vpop.eup %4790  ;;  %4794 = vrcp.f32 %v6363_v21  ;;  %v1233_v50 = vadd.f32 %v1232_v2, %v8619_v32  ;;  %v3333_v34 = vadd.f32 %v3301_v58, %v1594_v8  ;;  %v2803_v7 = vand.u32 2147483648, %v6338_v60 }
 0x227   : > { %v4793_v13 = vpop.eup %4792  ;;  %v2122_v22 = vsub.f32 1.0, %v2121_v12  ;;  %v6390_v37 = vadd.f32 1.0, %v4791_v53  ;;  %4796 = vpow2.f32 %v4583_v25  ;;  %v3175_v23 = vmax.f32 %v6370_v49, 0.0 }
 0x228   : > { %v2793_v41 = vmul.f32 %v4793_v13, %v6338_v60  ;;  %v1832_v56 = vmul.f32 %v1754_v61, %v6380_v55  ;;  %v4613_v3 = vmul.f32 -1.442695, %v3333_v34  ;;  %vm2126_vm8 = vweird.f32 %v4789_v54 }
 0x229   : > { %v2123_v36 = vmul.f32 %v4789_v54, %v2122_v22  ;;  %4798 = vrcp.f32 %v6390_v37  ;;  %v3973_v10 = vmax.f32 %v6351_v62, 0.0  ;;  %vm6398_vm9 = vcmp.eq.f32.partialorder %v2801_v51, 8.507059e+37  ;;  %vm2127_vm10 = vmor %vm2125_vm5, %vm2126_vm8 }
 0x22a   : > { %v2794_v11 = vsub.f32 1.0, %v2793_v41  ;;  %v1498_v63 = vadd.f32 %v1497_v14, %v8622_v27  ;;  %4800 = vpow2.f32 %v4613_v3  ;;  %v1603_v47 = vadd.f32 %v5723_v16, %v1233_v50 }
 0x22b   : > { %v2124_v52 = vadd.f32 %v4789_v54, %v2123_v36  ;;  %v1322_v17 = vadd.f32 %v1321_v40, %v8623_v20  ;;  %v3571_v30 = vand.u32 2147483647, %v6363_v21  ;;  %vm2798_vm11 = vweird.f32 %v4793_v13  ;;  %v1410_v40 = vpop.f32.mrf.mxu2  ;;  %v1235_v20 = vpop.f32.mrf.mxu0 }
 0x22c   : > { %v4795_v15 = vpop.eup %4794  ;;  %v2795_v33 = vmul.f32 %v4793_v13, %v2794_v11  ;;  %v2804_v24 = vor.u32 1.1754944e-38, %v2803_v7  ;;  %vm3567_vm12 = vweird.f32 %v6363_v21  ;;  %v1864_v39 = vadd.f32 %v1832_v56, %v1603_v47  ;;  %vm2799_vm13 = vmor %vm2797_vm7, %vm2798_vm11 }
 0x22d   : > { %v4797_v59 = vpop.eup %4796  ;;  %v3563_v45 = vmul.f32 %v4795_v15, %v6363_v21  ;;  %v2128_v29 = vsel %vm2127_vm10, %v4789_v54, %v2124_v52  ;;  %v3573_v9 = vand.u32 2147483648, %v6363_v21  ;;  %v1604_v58 = vadd.f32 %v5725_v42, %v1322_v17 }
 0x22e   : > { %v2133_v1 = vsel %vm6375_vm6, %v2132_v6, %v2128_v29  ;;  %v2796_v4 = vadd.f32 %v4793_v13, %v2795_v33  ;;  %v6416_v0 = vadd.f32 1.0, %v4797_v59  ;;  %v4552_v2 = vmul.f32 -1.442695, %v1864_v39 }
 0x22f   : > { %v6418_v43 = vpop.eup %4798  ;;  %v3564_v8 = vsub.f32 1.0, %v3563_v45  ;;  %v2504_v54 = vmul.f32 %v1755_v18, %v6380_v55  ;;  %vm6424_vm14 = vcmp.eq.f32.partialorder %v3571_v30, 8.507059e+37  ;;  %vm3568_vm15 = vweird.f32 %v4795_v15  ;;  %v6486_v45 = vld [vmem:[%s5705_s13 + $0x50] sm:$0xff] }
 0x230   : > { %v2800_v35 = vsel %vm2799_vm13, %v4793_v13, %v2796_v4  ;;  %4802 = vrcp.f32 %v6416_v0  ;;  %v2136_v6 = vmul.f32 %v6418_v43, %v6390_v37  ;;  %v4801_v25 = vpop.eup %4800  ;;  %v3206_v53 = vmul.f32 %v3174_v5, %v2133_v1  ;;  %vm3569_vm0 = vmor %vm3567_vm12, %vm3568_vm15  ;;  %v8633_v1 = vld [vmem:[#allocation10_spill] sm:$0xff] }
 0x231   : > { %v3565_v61 = vmul.f32 %v4795_v15, %v3564_v8  ;;  %v2805_v60 = vsel %vm6398_vm9, %v2804_v24, %v2800_v35  ;;  %v6435_v51 = vadd.f32 1.0, %v4801_v25  ;;  %v2144_v13 = vand.u32 2147483647, %v6390_v37 }
 0x232   : > { %v3238_v32 = vmul.f32 %v2805_v60, %v6217_v48  ;;  %v2137_v50 = vsub.f32 1.0, %v2136_v6  ;;  %v2146_v22 = vand.u32 2147483648, %v6390_v37  ;;  %4804 = vpow2.f32 %v4552_v2 }
 0x233   : > { %v3566_v34 = vadd.f32 %v4795_v15, %v3565_v61  ;;  %v2536_v14 = vadd.f32 %v2504_v54, %v1604_v58  ;;  %v3574_v41 = vor.u32 1.1754944e-38, %v3573_v9  ;;  %4806 = vrcp.f32 %v6435_v51  ;;  %v1324_v58 = vpop.f32.mrf.mxu1  ;;  %v1758_v61 = vld [vmem:[%s8481_s3 + $0xf8] sm:$0xff] }
 0x234   : > { %vm2140_vm1 = vweird.f32 %v6390_v37  ;;  %v6448_v48 = vadd.f32 %v5773_v31, %v1498_v63  ;;  %v6450_v7 = vadd.f32 %v3238_v32, %v3206_v53  ;;  %v2138_v56 = vmul.f32 %v6418_v43, %v2137_v50 }
 0x235   : > { %v3570_v5 = vsel %vm3569_vm0, %v4795_v15, %v3566_v34  ;;  %v2816_v21 = vand.u32 2147483647, %v6416_v0  ;;  %vm2141_vm2 = vweird.f32 %v6418_v43  ;;  %vm6457_vm4 = vcmp.eq.f32.partialorder %v2144_v13, 8.507059e+37  ;;  %v8628_v15 = vld [vmem:[#allocation8_spill] sm:$0xff]  ;;  %v8636_v13 = vld [vmem:[#allocation11_spill] sm:$0xff] }
 0x236   : > { %v4803_v3 = vpop.eup %4802  ;;  %v3575_v36 = vsel %vm6424_vm14, %v3574_v41, %v3570_v5  ;;  %v4584_v57 = vmul.f32 -1.442695, %v2536_v14  ;;  %4070 = vst [vmem:[%s5887_s18 + $0x78] sm:$0xff] %v6450_v7  ;;  %v3302_v63 = vmul.f32 %v6450_v7, %v1750_v26  ;;  %v2147_v47 = vor.u32 1.1754944e-38, %v2146_v22  ;;  %vm6476_vm6 = vmor %vm2140_vm1, %vm2141_vm2  ;;  %v1499_v5 = vpop.f32.mrf.mxu3 }
 0x237   : > { %v4004_v27 = vmul.f32 %v3972_v38, %v3575_v36  ;;  %v2808_v52 = vmul.f32 %v4803_v3, %v6416_v0  ;;  %v2139_v17 = vadd.f32 %v6418_v43, %v2138_v56  ;;  %vm2812_vm5 = vweird.f32 %v6416_v0 }
 0x238   : > { %4808 = vpow2.f32 %v4584_v57  ;;  %v1411_v30 = vadd.f32 %v1410_v40, %v8628_v15  ;;  %v4805_v33 = vpop.eup %4804  ;;  %v3334_v46 = vadd.f32 %v3302_v63, %v6360_v19  ;;  %vm6480_vm7 = vcmp.eq.f32.partialorder %v2816_v21, 8.507059e+37  ;;  %v1757_v19 = vld [vmem:[%s8481_s3 + $0xf0] sm:$0xff] }
 0x239   : > { %4036 = vst [vmem:[%s5887_s18 + $0x50] sm:$0xff] %v4004_v27  ;;  %v2809_v38 = vsub.f32 1.0, %v2808_v52  ;;  %v2818_v59 = vand.u32 2147483648, %v6416_v0  ;;  %v4807_v29 = vpop.eup %4806  ;;  %v3586_v39 = vand.u32 2147483647, %v6435_v51  ;;  %v2143_v37 = vsel %vm6476_vm6, %v6418_v43, %v2139_v17 }
 0x23a   : > { %v6495_v9 = vadd.f32 1.0, %v4805_v33  ;;  %v1236_v4 = vadd.f32 %v1235_v20, %v8633_v1  ;;  %v3578_v8 = vmul.f32 %v4807_v29, %v6435_v51  ;;  %vm3582_vm8 = vweird.f32 %v6435_v51  ;;  %v8637_v20 = vld [vmem:[#allocation9_spill] sm:$0xff]  ;;  %v4656_v33 = vld [vmem:[%s5531_s9 + $0x70] sm:$0xff] }
 0x23b   : > { %v4614_v2 = vmul.f32 -1.442695, %v3334_v46  ;;  %vm2813_vm9 = vweird.f32 %v4803_v3  ;;  %v2148_v54 = vsel %vm6457_vm4, %v2147_v47, %v2143_v37  ;;  %v2810_v12 = vmul.f32 %v4803_v3, %v2809_v38  ;;  %4493 = vmatmul.msk.bf16.gmra.mxu0 %vm1139_vm3, %v4656_v33  ;;  %4509 = vmatmul.msk.bf16.gmra.mxu1 %vm1139_vm3, %v4656_v33 }
 0x23c   : > { %4810 = vrcp.f32 %v6495_v9  ;;  %v1833_v35 = vmul.f32 %v1757_v19, %v6486_v45  ;;  %v3579_v43 = vsub.f32 1.0, %v3578_v8  ;;  %v3588_v6 = vand.u32 2147483648, %v6435_v51  ;;  %vm2814_vm12 = vmor %vm2812_vm5, %vm2813_vm9  ;;  %4525 = vmatmul.msk.bf16.gmra.mxu2 %vm1139_vm3, %v4656_v33  ;;  %4541 = vmatmul.msk.bf16.gmra.mxu3 %vm1139_vm3, %v4656_v33 }
 0x23d   : > { %4812 = vpow2.f32 %v4614_v2  ;;  %v2819_v25 = vor.u32 1.1754944e-38, %v2818_v59  ;;  %vm6508_vm10 = vcmp.eq.f32.partialorder %v3586_v39, 8.507059e+37  ;;  %v2811_v32 = vadd.f32 %v4803_v3, %v2810_v12 }
 0x23e   : > { %v4809_v60 = vpop.eup %4808  ;;  %v1607_v50 = vadd.f32 %v5723_v16, %v1236_v4  ;;  %v1325_v34 = vadd.f32 %v1324_v58, %v8636_v13  ;;  %v3580_v22 = vmul.f32 %v4807_v29, %v3579_v43  ;;  %vm3583_vm11 = vweird.f32 %v4807_v29  ;;  %v1237_v58 = vpop.f32.mrf.mxu0 }
 0x23f   : > { %v3207_v14 = vmul.f32 %v3175_v23, %v2148_v54  ;;  %v6519_v41 = vadd.f32 1.0, %v4809_v60  ;;  %v2815_v26 = vsel %vm2814_vm12, %v4803_v3, %v2811_v32  ;;  %v2505_v40 = vmul.f32 %v1758_v61, %v6486_v45  ;;  %vm3584_vm13 = vmor %vm3582_vm8, %vm3583_vm11  ;;  %v6587_v61 = vld [vmem:[%s5705_s13 + $0x58] sm:$0xff]  ;;  %v1413_v13 = vpop.f32.mrf.mxu2 }
 0x240   : > { %v1865_v56 = vadd.f32 %v1833_v35, %v1607_v50  ;;  %v1608_v21 = vadd.f32 %v5725_v42, %v1325_v34  ;;  %v3581_v36 = vadd.f32 %v4807_v29, %v3580_v22  ;;  %v3589_v11 = vor.u32 1.1754944e-38, %v3588_v6  ;;  %v8644_v34 = vld [vmem:[#allocation14_spill] sm:$0xff] }
 0x241   : > { %v2820_v57 = vsel %vm6480_vm7, %v2819_v25, %v2815_v26  ;;  %4814 = vrcp.f32 %v6519_v41  ;;  %v3974_v49 = vmax.f32 %v6450_v7, 0.0  ;;  %v6533_v3 = vadd.f32 %v5754_v28, %v1411_v30  ;;  %v1753_v30 = vld [vmem:[%s8481_s3 + $0xd0] sm:$0xff] }
 0x242   : > { %v6526_v0 = vpop.eup %4810  ;;  %v3239_v23 = vmul.f32 %v2820_v57, %v6281_v44  ;;  %v4553_v27 = vmul.f32 -1.442695, %v1865_v56  ;;  %v3585_v52 = vsel %vm3584_vm13, %v4807_v29, %v3581_v36  ;;  %v1500_v17 = vadd.f32 %v1499_v5, %v8637_v20 }
 0x243   : > { %v4813_v63 = vpop.eup %4812  ;;  %v2151_v47 = vmul.f32 %v6526_v0, %v6495_v9  ;;  %v2537_v15 = vadd.f32 %v2505_v40, %v1608_v21  ;;  %v3590_v51 = vsel %vm6508_vm10, %v3589_v11, %v3585_v52  ;;  %v2159_v38 = vand.u32 2147483647, %v6495_v9  ;;  %v1326_v21 = vpop.f32.mrf.mxu1  ;;  %v8655_v52 = vld [vmem:[#allocation18_spill] sm:$0xff] }
 0x244   : > { %v6541_v46 = vadd.f32 1.0, %v4813_v63  ;;  %v6543_v44 = vadd.f32 %v3239_v23, %v3207_v14  ;;  %v4005_v24 = vmul.f32 %v3973_v10, %v3590_v51  ;;  %v2161_v59 = vand.u32 2147483648, %v6495_v9  ;;  %v8645_v23 = vld [vmem:[#allocation12_spill] sm:$0xff] }
 0x245   : > { %v2152_v18 = vsub.f32 1.0, %v2151_v47  ;;  %4816 = vpow2.f32 %v4553_v27  ;;  %v2831_v19 = vand.u32 2147483647, %v6519_v41  ;;  %v2833_v29 = vand.u32 2147483648, %v6519_v41  ;;  %v1502_v47 = vpop.f32.mrf.mxu3 }
 0x246   : > { %4818 = vrcp.f32 %v6541_v46  ;;  %4071 = vst [vmem:[%s5887_s18 + $0x88] sm:$0xff] %v6543_v44  ;;  %v3176_v39 = vmax.f32 %v6533_v3, 0.0  ;;  %v3303_v10 = vmul.f32 %v6543_v44, %v1753_v30  ;;  %vm2156_vm14 = vweird.f32 %v6526_v0 }
 0x247   : > { %v4815_v62 = vpop.eup %4814  ;;  %4037 = vst [vmem:[%s5887_s18 + $0x60] sm:$0xff] %v4005_v24  ;;  %v2153_v37 = vmul.f32 %v6526_v0, %v2152_v18  ;;  %v4585_v1 = vmul.f32 -1.442695, %v2537_v15  ;;  %vm2155_vm15 = vweird.f32 %v6495_v9  ;;  %vm6568_vm0 = vcmp.eq.f32.partialorder %v2159_v38, 8.507059e+37 }
 0x248   : > { %v2823_v4 = vmul.f32 %v4815_v62, %v6519_v41  ;;  %v6573_v2 = vadd.f32 %v5773_v31, %v1500_v17  ;;  %v3335_v54 = vadd.f32 %v3303_v10, %v6448_v48  ;;  %v2162_v35 = vor.u32 1.1754944e-38, %v2161_v59  ;;  %vm6577_vm1 = vmor %vm2155_vm15, %vm2156_vm14  ;;  %v1760_v48 = vld [vmem:[%s8481_s3 + $0x108] sm:$0xff] }
 0x249   : > { %v2154_v12 = vadd.f32 %v6526_v0, %v2153_v37  ;;  %4820 = vpow2.f32 %v4585_v1  ;;  %vm2827_vm2 = vweird.f32 %v6519_v41  ;;  %vm6582_vm4 = vcmp.eq.f32.partialorder %v2831_v19, 8.507059e+37  ;;  %v8648_v17 = vld [vmem:[#allocation15_spill] sm:$0xff]  ;;  %v1761_v41 = vld [vmem:[%s8481_s3 + $0x110] sm:$0xff] }
 0x24a   : > { %v2824_v43 = vsub.f32 1.0, %v2823_v4  ;;  %v2834_v25 = vor.u32 1.1754944e-38, %v2833_v29  ;;  %vm3597_vm5 = vweird.f32 %v6541_v46  ;;  %v3601_v53 = vand.u32 2147483647, %v6541_v46 }
 0x24b   : > { %v4817_v60 = vpop.eup %4816  ;;  %v4615_v32 = vmul.f32 -1.442695, %v3335_v54  ;;  %v2158_v50 = vsel %vm6577_vm1, %v6526_v0, %v2154_v12  ;;  %v1238_v22 = vadd.f32 %v1237_v58, %v8644_v34  ;;  %v3603_v26 = vand.u32 2147483648, %v6541_v46  ;;  %v1756_v12 = vld [vmem:[%s8481_s3 + $0xe8] sm:$0xff] }
 0x24c   : > { %v4819_v14 = vpop.eup %4818  ;;  %v2825_v5 = vmul.f32 %v4815_v62, %v2824_v43  ;;  %vm2828_vm6 = vweird.f32 %v4815_v62  ;;  %v6599_v56 = vadd.f32 1.0, %v4817_v60  ;;  %v2163_v36 = vsel %vm6568_vm0, %v2162_v35, %v2158_v50 }
 0x24d   : > { %v3593_v40 = vmul.f32 %v4819_v14, %v6541_v46  ;;  %4822 = vpow2.f32 %v4615_v32  ;;  %v1834_v11 = vmul.f32 %v1760_v48, %v6587_v61  ;;  %v3975_v57 = vmax.f32 %v6543_v44, 0.0  ;;  %vm2829_vm8 = vmor %vm2827_vm2, %vm2828_vm6 }
 0x24e   : > { %v2826_v0 = vadd.f32 %v4815_v62, %v2825_v5  ;;  %4824 = vrcp.f32 %v6599_v56  ;;  %v1414_v3 = vadd.f32 %v1413_v13, %v8645_v23  ;;  %vm6608_vm7 = vcmp.eq.f32.partialorder %v3601_v53, 8.507059e+37  ;;  %v1415_v53 = vpop.f32.mrf.mxu2  ;;  %v1240_v5 = vpop.f32.mrf.mxu0 }
 0x24f   : > { %v4821_v27 = vpop.eup %4820  ;;  %v3594_v63 = vsub.f32 1.0, %v3593_v40  ;;  %v1611_v20 = vadd.f32 %v5723_v16, %v1238_v22  ;;  %v1327_v15 = vadd.f32 %v1326_v21, %v8648_v17  ;;  %v3604_v33 = vor.u32 1.1754944e-38, %v3603_v26  ;;  %v8654_v40 = vld [vmem:[#allocation16_spill] sm:$0xff] }
 0x250   : > { %v2830_v51 = vsel %vm2829_vm8, %v4815_v62, %v2826_v0  ;;  %v3208_v30 = vmul.f32 %v3176_v39, %v2163_v36  ;;  %v6616_v38 = vadd.f32 1.0, %v4821_v27  ;;  %vm3598_vm9 = vweird.f32 %v4819_v14  ;;  %v8649_v39 = vld [vmem:[#allocation13_spill] sm:$0xff]  ;;  %v1763_v0 = vld [vmem:[%s8481_s3 + $0x120] sm:$0xff] }
 0x251   : > { %v3595_v24 = vmul.f32 %v4819_v14, %v3594_v63  ;;  %v2835_v18 = vsel %vm6582_vm4, %v2834_v25, %v2830_v51  ;;  %v1866_v59 = vadd.f32 %v1834_v11, %v1611_v20  ;;  %v6626_v29 = vadd.f32 %v5754_v28, %v1414_v3  ;;  %vm3599_vm10 = vmor %vm3597_vm5, %vm3598_vm9  ;;  %v6671_v11 = vld [vmem:[%s5705_s13 + $0x60] sm:$0xff]  ;;  %v1329_v20 = vpop.f32.mrf.mxu1 }
 0x252   : > { %v3240_v19 = vmul.f32 %v2835_v18, %v6380_v55  ;;  %4826 = vrcp.f32 %v6616_v38  ;;  %v6629_v62 = vadd.f32 %v1502_v47, %v8649_v39  ;;  %v2174_v1 = vand.u32 2147483647, %v6599_v56  ;;  %v1764_v18 = vld [vmem:[%s8481_s3 + $0x128] sm:$0xff] }
 0x253   : > { %v4823_v10 = vpop.eup %4822  ;;  %v3596_v37 = vadd.f32 %v4819_v14, %v3595_v24  ;;  %v2176_v4 = vand.u32 2147483648, %v6599_v56  ;;  %v1612_v8 = vadd.f32 %v5725_v42, %v1327_v15  ;;  %v4554_v35 = vmul.f32 -1.442695, %v1866_v59  ;;  %v8656_v39 = vld [vmem:[#allocation19_spill] sm:$0xff] }
 0x254   : > { %v4825_v58 = vpop.eup %4824  ;;  %v6636_v55 = vadd.f32 1.0, %v4823_v10  ;;  %v6638_v54 = vadd.f32 %v3240_v19, %v3208_v30  ;;  %v2506_v43 = vmul.f32 %v1761_v41, %v6587_v61  ;;  %vm2170_vm11 = vweird.f32 %v6599_v56 }
 0x255   : > { %v3600_v6 = vsel %vm3599_vm10, %v4819_v14, %v3596_v37  ;;  %v2166_v9 = vmul.f32 %v4825_v58, %v6599_v56  ;;  %v2846_v25 = vand.u32 2147483647, %v6616_v38  ;;  %v2848_v48 = vand.u32 2147483648, %v6616_v38 }
 0x256   : > { %v3605_v46 = vsel %vm6608_vm7, %v3604_v33, %v3600_v6  ;;  %4828 = vrcp.f32 %v6636_v55  ;;  %4072 = vst [vmem:[%s5887_s18 + $0x98] sm:$0xff] %v6638_v54  ;;  %v3177_v60 = vmax.f32 %v6626_v29, 0.0  ;;  %v3304_v50 = vmul.f32 %v6638_v54, %v1756_v12  ;;  %v1504_v6 = vpop.f32.mrf.mxu3 }
 0x257   : > { %v4006_v32 = vmul.f32 %v3974_v49, %v3605_v46  ;;  %vm6657_vm12 = vcmp.eq.f32.partialorder %v2174_v1, 8.507059e+37  ;;  %v2177_v34 = vor.u32 1.1754944e-38, %v2176_v4  ;;  %v2167_v14 = vsub.f32 1.0, %v2166_v9  ;;  %v1418_v49 = vpop.f32.mrf.mxu2 }
 0x258   : > { %v4827_v22 = vpop.eup %4826  ;;  %vm2842_vm13 = vweird.f32 %v6616_v38  ;;  %4830 = vpow2.f32 %v4554_v35  ;;  %v2538_v26 = vadd.f32 %v2506_v43, %v1612_v8  ;;  %v3336_v21 = vadd.f32 %v3304_v50, %v6573_v2 }
 0x259   : > { %4038 = vst [vmem:[%s5887_s18 + $0x70] sm:$0xff] %v4006_v32  ;;  %v2838_v7 = vmul.f32 %v4827_v22, %v6616_v38  ;;  %vm6665_vm14 = vcmp.eq.f32.partialorder %v2846_v25, 8.507059e+37  ;;  %v1416_v36 = vadd.f32 %v1415_v53, %v8654_v40  ;;  %v2168_v23 = vmul.f32 %v4825_v58, %v2167_v14  ;;  %v1759_v14 = vld [vmem:[%s8481_s3 + $0x100] sm:$0xff] }
 0x25a   : > { %vm2171_vm15 = vweird.f32 %v4825_v58  ;;  %v2849_v3 = vor.u32 1.1754944e-38, %v2848_v48  ;;  %v4586_v27 = vmul.f32 -1.442695, %v2538_v26  ;;  %vm3612_vm0 = vweird.f32 %v6636_v55 }
 0x25b   : > { %v4616_v2 = vmul.f32 -1.442695, %v3336_v21  ;;  %v2839_v63 = vsub.f32 1.0, %v2838_v7  ;;  %v1241_v47 = vadd.f32 %v1240_v5, %v8655_v52  ;;  %v3616_v15 = vand.u32 2147483647, %v6636_v55  ;;  %vm2172_vm1 = vmor %vm2170_vm11, %vm2171_vm15  ;;  %v8659_v5 = vld [vmem:[#allocation17_spill] sm:$0xff] }
 0x25c   : > { %v4829_v17 = vpop.eup %4828  ;;  %v2169_v33 = vadd.f32 %v4825_v58, %v2168_v23  ;;  %4832 = vpow2.f32 %v4586_v27  ;;  %v1835_v51 = vmul.f32 %v1763_v0, %v6671_v11  ;;  %vm2843_vm2 = vweird.f32 %v4827_v22  ;;  %v4657_v23 = vld [vmem:[%s5531_s9 + $0x78] sm:$0xff] }
 0x25d   : > { %v3608_v30 = vmul.f32 %v4829_v17, %v6636_v55  ;;  %4834 = vpow2.f32 %v4616_v2  ;;  %v2840_v24 = vmul.f32 %v4827_v22, %v2839_v63  ;;  %v3618_v41 = vand.u32 2147483648, %v6636_v55  ;;  %vm2844_vm5 = vmor %vm2842_vm13, %vm2843_vm2  ;;  %4494 = vmatmul.msk.bf16.gmra.mxu0 %vm1139_vm3, %v4657_v23  ;;  %4510 = vmatmul.msk.bf16.gmra.mxu1 %vm1139_vm3, %v4657_v23 }
 0x25e   : > { %v4831_v59 = vpop.eup %4830  ;;  %v2173_v19 = vsel %vm2172_vm1, %v4825_v58, %v2169_v33  ;;  %v1615_v29 = vadd.f32 %v5723_v16, %v1241_v47  ;;  %v1330_v10 = vadd.f32 %v1329_v20, %v8656_v39  ;;  %vm3613_vm4 = vweird.f32 %v4829_v17  ;;  %v8660_v20 = vld [vmem:[#allocation20_spill] sm:$0xff]  ;;  %4526 = vmatmul.msk.bf16.gmra.mxu2 %vm1139_vm3, %v4657_v23  ;;  %4542 = vmatmul.msk.bf16.gmra.mxu3 %vm1139_vm3, %v4657_v23 }
 0x25f   : > { %v3609_v37 = vsub.f32 1.0, %v3608_v30  ;;  %v2178_v1 = vsel %vm6657_vm12, %v2177_v34, %v2173_v19  ;;  %v2841_v56 = vadd.f32 %v4827_v22, %v2840_v24  ;;  %v6692_v4 = vadd.f32 1.0, %v4831_v59  ;;  %vm3614_vm7 = vmor %vm3612_vm0, %vm3613_vm4 }
 0x260   : > { %v3209_v8 = vmul.f32 %v3177_v60, %v2178_v1  ;;  %v1867_v12 = vadd.f32 %v1835_v51, %v1615_v29  ;;  %v2507_v35 = vmul.f32 %v1764_v18, %v6671_v11  ;;  %v1616_v9 = vadd.f32 %v5725_v42, %v1330_v10  ;;  %v1242_v1 = vpop.f32.mrf.mxu0 }
 0x261   : > { %v3610_v58 = vmul.f32 %v4829_v17, %v3609_v37  ;;  %v2845_v43 = vsel %vm2844_vm5, %v4827_v22, %v2841_v56  ;;  %4836 = vrcp.f32 %v6692_v4  ;;  %vm6699_vm6 = vcmp.eq.f32.partialorder %v3616_v15, 8.507059e+37 }
 0x262   : > { %v4833_v25 = vpop.eup %4832  ;;  %v3619_v48 = vor.u32 1.1754944e-38, %v3618_v41  ;;  %v2850_v38 = vsel %vm6665_vm14, %v2849_v3, %v2845_v43  ;;  %v4555_v60 = vmul.f32 -1.442695, %v1867_v12  ;;  %v6709_v34 = vadd.f32 %v5754_v28, %v1416_v36 }
 0x263   : > { %v4835_v53 = vpop.eup %4834  ;;  %v3611_v32 = vadd.f32 %v4829_v17, %v3610_v58  ;;  %v3241_v50 = vmul.f32 %v2850_v38, %v6486_v45  ;;  %v6706_v13 = vadd.f32 1.0, %v4833_v25  ;;  %v2189_v26 = vand.u32 2147483647, %v6692_v4  ;;  %v1766_v58 = vld [vmem:[%s8481_s3 + $0x138] sm:$0xff]  ;;  %v8667_v38 = vld [vmem:[#allocation22_spill] sm:$0xff] }
 0x264   : > { %v6714_v22 = vadd.f32 1.0, %v4835_v53  ;;  %v1505_v45 = vadd.f32 %v1504_v6, %v8659_v5  ;;  %4838 = vpow2.f32 %v4555_v60  ;;  %v2539_v55 = vadd.f32 %v2507_v35, %v1616_v9  ;;  %v6768_v35 = vld [vmem:[%s5705_s13 + $0x68] sm:$0xff] }
 0x265   : > { %v3615_v21 = vsel %vm3614_vm7, %v4829_v17, %v3611_v32  ;;  %v6721_v7 = vadd.f32 %v3241_v50, %v3209_v8  ;;  %4840 = vrcp.f32 %v6706_v13  ;;  %v1610_v36 = vadd.f32 %v5773_v31, %v6629_v62 }
 0x266   : > { %v3620_v40 = vsel %vm6699_vm6, %v3619_v48, %v3615_v21  ;;  %4842 = vrcp.f32 %v6714_v22  ;;  %v2191_v0 = vand.u32 2147483648, %v6692_v4  ;;  %v3976_v2 = vmax.f32 %v6638_v54, 0.0 }
 0x267   : > { %v4837_v3 = vpop.eup %4836  ;;  %v4007_v27 = vmul.f32 %v3975_v57, %v3620_v40  ;;  %4073 = vst [vmem:[%s5887_s18 + $0xa8] sm:$0xff] %v6721_v7  ;;  %v3305_v63 = vmul.f32 %v6721_v7, %v1759_v14  ;;  %v3178_v52 = vmax.f32 %v6709_v34, 0.0  ;;  %vm2185_vm8 = vweird.f32 %v6692_v4 }
 0x268   : > { %v2181_v47 = vmul.f32 %v4837_v3, %v6692_v4  ;;  %v6741_v62 = vadd.f32 %v5773_v31, %v1505_v45  ;;  %v1419_v17 = vadd.f32 %v1418_v49, %v8660_v20  ;;  %v3631_v44 = vand.u32 2147483647, %v6714_v22  ;;  %v1331_v49 = vpop.f32.mrf.mxu1  ;;  %v1245_v48 = vpop.f32.mrf.mxu0 }
 0x269   : > { %4039 = vst [vmem:[%s5887_s18 + $0x80] sm:$0xff] %v4007_v27  ;;  %v3337_v57 = vadd.f32 %v3305_v63, %v1610_v36  ;;  %vm6748_vm9 = vcmp.eq.f32.partialorder %v2189_v26, 8.507059e+37  ;;  %v4587_v33 = vmul.f32 -1.442695, %v2539_v55  ;;  %v3633_v30 = vand.u32 2147483648, %v6714_v22  ;;  %v1507_v27 = vpop.f32.mrf.mxu3 }
 0x26a   : > { %v4839_v51 = vpop.eup %4838  ;;  %v2182_v24 = vsub.f32 1.0, %v2181_v47  ;;  %v2192_v18 = vor.u32 1.1754944e-38, %v2191_v0  ;;  %vm2857_vm10 = vweird.f32 %v6706_v13  ;;  %v2861_v19 = vand.u32 2147483647, %v6706_v13 }
 0x26b   : > { %v4841_v59 = vpop.eup %4840  ;;  %v4617_v41 = vmul.f32 -1.442695, %v3337_v57  ;;  %v6757_v29 = vadd.f32 1.0, %v4839_v51  ;;  %4844 = vpow2.f32 %v4587_v33  ;;  %vm3627_vm11 = vweird.f32 %v6714_v22  ;;  %v8668_v57 = vld [vmem:[#allocation23_spill] sm:$0xff] }
 0x26c   : > { %v4843_v39 = vpop.eup %4842  ;;  %v2853_v10 = vmul.f32 %v4841_v59, %v6706_v13  ;;  %v2183_v37 = vmul.f32 %v4837_v3, %v2182_v24  ;;  %vm2186_vm3 = vweird.f32 %v4837_v3  ;;  %vm6762_vm12 = vcmp.eq.f32.partialorder %v3631_v44, 8.507059e+37 }
 0x26d   : > { %v3623_v56 = vmul.f32 %v4843_v39, %v6714_v22  ;;  %v3977_v12 = vmax.f32 %v6721_v7, 0.0  ;;  %4846 = vpow2.f32 %v4617_v41  ;;  %v2863_v9 = vand.u32 2147483648, %v6706_v13  ;;  %vm2187_vm13 = vmor %vm2185_vm8, %vm2186_vm3  ;;  %v1767_v22 = vld [vmem:[%s8481_s3 + $0x140] sm:$0xff] }
 0x26e   : > { %v2854_v43 = vsub.f32 1.0, %v2853_v10  ;;  %v2184_v6 = vadd.f32 %v4837_v3, %v2183_v37  ;;  %4848 = vrcp.f32 %v6757_v29  ;;  %v3634_v46 = vor.u32 1.1754944e-38, %v3633_v30  ;;  %v8669_v30 = vld [vmem:[#allocation21_spill] sm:$0xff] }
 0x26f   : > { %v3624_v25 = vsub.f32 1.0, %v3623_v56  ;;  %vm6777_vm14 = vcmp.eq.f32.partialorder %v2861_v19, 8.507059e+37  ;;  %v1243_v60 = vadd.f32 %v1242_v1, %v8667_v38  ;;  %vm2858_vm15 = vweird.f32 %v4841_v59  ;;  %v1420_v19 = vpop.f32.mrf.mxu2 }
 0x270   : > { %v2188_v53 = vsel %vm2187_vm13, %v4837_v3, %v2184_v6  ;;  %v2855_v32 = vmul.f32 %v4841_v59, %v2854_v43  ;;  %v1836_v50 = vmul.f32 %v1766_v58, %v6768_v35  ;;  %vm3628_vm0 = vweird.f32 %v4843_v39  ;;  %vm2859_vm1 = vmor %vm2857_vm10, %vm2858_vm15  ;;  %v8672_v43 = vld [vmem:[#allocation24_spill] sm:$0xff] }
 0x271   : > { %v4845_v34 = vpop.eup %4844  ;;  %v3625_v14 = vmul.f32 %v4843_v39, %v3624_v25  ;;  %v2193_v26 = vsel %vm6748_vm9, %v2192_v18, %v2188_v53  ;;  %v1619_v4 = vadd.f32 %v5723_v16, %v1243_v60  ;;  %v2864_v45 = vor.u32 1.1754944e-38, %v2863_v9  ;;  %vm3629_vm2 = vmor %vm3627_vm11, %vm3628_vm0 }
 0x272   : > { %v2856_v5 = vadd.f32 %v4841_v59, %v2855_v32  ;;  %v6786_v21 = vadd.f32 1.0, %v4845_v34  ;;  %v6789_v55 = vadd.f32 %v5754_v28, %v1419_v17  ;;  %v3210_v0 = vmul.f32 %v3178_v52, %v2193_v26 }
 0x273   : > { %v4847_v40 = vpop.eup %4846  ;;  %v3626_v36 = vadd.f32 %v4843_v39, %v3625_v14  ;;  %v2204_v23 = vand.u32 2147483647, %v6757_v29  ;;  %v2206_v3 = vand.u32 2147483648, %v6757_v29  ;;  %v1868_v17 = vadd.f32 %v1836_v50, %v1619_v4 }
 0x274   : > { %v6795_v63 = vpop.eup %4848  ;;  %v6800_v47 = vadd.f32 1.0, %v4847_v40  ;;  %v2860_v20 = vsel %vm2859_vm1, %v4841_v59, %v2856_v5  ;;  %4850 = vrcp.f32 %v6786_v21  ;;  %v1332_v15 = vadd.f32 %v1331_v49, %v8668_v57  ;;  %v6855_v5 = vld [vmem:[%s5705_s13 + $0x70] sm:$0xff] }
 0x275   : > { %v3630_v13 = vsel %vm3629_vm2, %v4843_v39, %v3626_v36  ;;  %v2865_v52 = vsel %vm6777_vm14, %v2864_v45, %v2860_v20  ;;  %v2196_v44 = vmul.f32 %v6795_v63, %v6757_v29  ;;  %v3179_v51 = vmax.f32 %v6789_v55, 0.0  ;;  %v1762_v39 = vld [vmem:[%s8481_s3 + $0x118] sm:$0xff]  ;;  %v1769_v45 = vld [vmem:[%s8481_s3 + $0x150] sm:$0xff]  ;;  %v8673_v36 = vld [vmem:[#allocation26_spill] sm:$0xff]  ;;  %v1334_v20 = vpop.f32.mrf.mxu1 }
 0x276   : > { %v3635_v33 = vsel %vm6762_vm12, %v3634_v46, %v3630_v13  ;;  %4852 = vrcp.f32 %v6800_v47  ;;  %v6816_v24 = vadd.f32 %v1507_v27, %v8669_v30  ;;  %v3242_v59 = vmul.f32 %v2865_v52, %v6587_v61  ;;  %v1509_v27 = vpop.f32.mrf.mxu3 }
 0x277   : > { %v4008_v18 = vmul.f32 %v3976_v2, %v3635_v33  ;;  %v2197_v41 = vsub.f32 1.0, %v2196_v44  ;;  %vm2200_vm4 = vweird.f32 %v6757_v29  ;;  %vm6825_vm5 = vcmp.eq.f32.partialorder %v2204_v23, 8.507059e+37 }
 0x278   : > { %v2207_v37 = vor.u32 1.1754944e-38, %v2206_v3  ;;  %v4556_v1 = vmul.f32 -1.442695, %v1868_v17  ;;  %v2508_v54 = vmul.f32 %v1767_v22, %v6768_v35  ;;  %v3648_v61 = vand.u32 2147483648, %v6800_v47  ;;  %v1423_v22 = vpop.f32.mrf.mxu2 }
 0x279   : > { %4040 = vst [vmem:[%s5887_s18 + $0x90] sm:$0xff] %v4008_v18  ;;  %v6832_v2 = vadd.f32 %v3242_v59, %v3210_v0  ;;  %v2198_v56 = vmul.f32 %v6795_v63, %v2197_v41  ;;  %v1620_v8 = vadd.f32 %v5725_v42, %v1332_v15  ;;  %vm2201_vm6 = vweird.f32 %v6795_v63  ;;  %v1770_v15 = vld [vmem:[%s8481_s3 + $0x158] sm:$0xff]  ;;  %v8674_v18 = vld [vmem:[#allocation27_spill] sm:$0xff] }
 0x27a   : > { %v4851_v58 = vpop.eup %4850  ;;  %vm2872_vm7 = vweird.f32 %v6786_v21  ;;  %4854 = vpow2.f32 %v4556_v1  ;;  %v1421_v6 = vadd.f32 %v1420_v19, %v8672_v43  ;;  %vm3642_vm8 = vweird.f32 %v6800_v47  ;;  %vm2202_vm9 = vmor %vm2200_vm4, %vm2201_vm6  ;;  %v8675_v1 = vld [vmem:[#allocation28_spill] sm:$0xff]  ;;  %v8676_v43 = vld [vmem:[#allocation25_spill] sm:$0xff] }
 0x27b   : > { %4074 = vst [vmem:[%s5887_s18 + $0xb8] sm:$0xff] %v6832_v2  ;;  %v3306_v9 = vmul.f32 %v6832_v2, %v1762_v39  ;;  %v2868_v25 = vmul.f32 %v4851_v58, %v6786_v21  ;;  %v2199_v46 = vadd.f32 %v6795_v63, %v2198_v56  ;;  %v3646_v60 = vand.u32 2147483647, %v6800_v47 }
 0x27c   : > { %v4853_v38 = vpop.eup %4852  ;;  %v2876_v53 = vand.u32 2147483647, %v6786_v21  ;;  %v2878_v32 = vand.u32 2147483648, %v6786_v21  ;;  %v2540_v50 = vadd.f32 %v2508_v54, %v1620_v8  ;;  %v3649_v14 = vor.u32 1.1754944e-38, %v3648_v61 }
 0x27d   : > { %v3638_v34 = vmul.f32 %v4853_v38, %v6800_v47  ;;  %v3338_v26 = vadd.f32 %v3306_v9, %v6741_v62  ;;  %v2869_v4 = vsub.f32 1.0, %v2868_v25  ;;  %v2203_v49 = vsel %vm2202_vm9, %v6795_v63, %v2199_v46  ;;  %v1765_v47 = vld [vmem:[%s8481_s3 + $0x130] sm:$0xff] }
 0x27e   : > { %vm2873_vm10 = vweird.f32 %v4851_v58  ;;  %v4588_v40 = vmul.f32 -1.442695, %v2540_v50  ;;  %v1246_v0 = vadd.f32 %v1245_v48, %v8673_v36  ;;  %vm3643_vm11 = vweird.f32 %v4853_v38 }
 0x27f   : > { %v3639_v23 = vsub.f32 1.0, %v3638_v34  ;;  %v4618_v62 = vmul.f32 -1.442695, %v3338_v26  ;;  %v2870_v3 = vmul.f32 %v4851_v58, %v2869_v4  ;;  %v2208_v17 = vsel %vm6825_vm5, %v2207_v37, %v2203_v49  ;;  %vm2874_vm3 = vmor %vm2872_vm7, %vm2873_vm10  ;;  %v1512_v34 = vpop.f32.mrf.mxu3 }
 0x280   : > { %v4855_v29 = vpop.eup %4854  ;;  %4856 = vpow2.f32 %v4588_v40  ;;  %v1623_v13 = vadd.f32 %v5723_v16, %v1246_v0  ;;  %v1837_v52 = vmul.f32 %v1769_v45, %v6855_v5  ;;  %vm2877_vm12 = vcmp.eq.f32.partialorder %v2876_v53, 8.507059e+37  ;;  %vm3644_vm13 = vmor %vm3642_vm8, %vm3643_vm11 }
 0x281   : > { %v3640_v63 = vmul.f32 %v4853_v38, %v3639_v23  ;;  %4858 = vpow2.f32 %v4618_v62  ;;  %v2871_v44 = vadd.f32 %v4851_v58, %v2870_v3  ;;  %v6866_v57 = vadd.f32 1.0, %v4855_v29  ;;  %v8677_v62 = vld [vmem:[#allocation29_spill] sm:$0xff] }
 0x282   : > { %v2879_v33 = vor.u32 1.1754944e-38, %v2878_v32  ;;  %v1869_v30 = vadd.f32 %v1837_v52, %v1623_v13  ;;  %v1335_v59 = vadd.f32 %v1334_v20, %v8674_v18  ;;  %v3211_v39 = vmul.f32 %v3179_v51, %v2208_v17  ;;  %v6942_v18 = vld [vmem:[%s5705_s13 + $0x78] sm:$0xff]  ;;  %v8688_v52 = vld [vmem:[#allocation32_spill] sm:$0xff] }
 0x283   : > { %v3641_v41 = vadd.f32 %v4853_v38, %v3640_v63  ;;  %v2875_v19 = vsel %vm2874_vm3, %v4851_v58, %v2871_v44  ;;  %4860 = vrcp.f32 %v6866_v57  ;;  %v2509_v21 = vmul.f32 %v1770_v15, %v6855_v5 }
 0x284   : > { %v2880_v10 = vsel %vm2877_vm12, %v2879_v33, %v2875_v19  ;;  %v4557_v37 = vmul.f32 -1.442695, %v1869_v30  ;;  %v1424_v54 = vadd.f32 %v1423_v22, %v8675_v1  ;;  %vm3647_vm14 = vcmp.eq.f32.partialorder %v3646_v60, 8.507059e+37 }
 0x285   : > { %v3645_v61 = vsel %vm3644_vm13, %v4853_v38, %v3641_v41  ;;  %v3243_v56 = vmul.f32 %v2880_v10, %v6671_v11  ;;  %v1624_v8 = vadd.f32 %v5725_v42, %v1335_v59  ;;  %v6889_v58 = vadd.f32 %v5754_v28, %v1421_v6  ;;  %v1772_v59 = vld [vmem:[%s8481_s3 + $0x168] sm:$0xff]  ;;  %v1336_v41 = vpop.f32.mrf.mxu1 }
 0x286   : > { %v4857_v55 = vpop.eup %4856  ;;  %v3650_v51 = vsel %vm3647_vm14, %v3649_v14, %v3645_v61  ;;  %v1510_v9 = vadd.f32 %v1509_v27, %v8676_v43  ;;  %4862 = vpow2.f32 %v4557_v37  ;;  %v2221_v38 = vand.u32 2147483648, %v6866_v57  ;;  %v1247_v14 = vpop.f32.mrf.mxu0  ;;  %v8678_v27 = vld [vmem:[#allocation30_spill] sm:$0xff]  ;;  %v1773_v61 = vld [vmem:[%s8481_s3 + $0x170] sm:$0xff] }
 0x287   : > { %v4859_v25 = vpop.eup %4858  ;;  %v4009_v46 = vmul.f32 %v3977_v12, %v3650_v51  ;;  %v6894_v11 = vadd.f32 %v3243_v56, %v3211_v39  ;;  %v6896_v48 = vadd.f32 1.0, %v4857_v55  ;;  %v2541_v53 = vadd.f32 %v2509_v21, %v1624_v8  ;;  %v7026_v55 = vld [vmem:[%s5705_s13 + $0x80] sm:$0xff] }
 0x288   : > { %v6899_v60 = vadd.f32 1.0, %v4859_v25  ;;  %v6902_v6 = vadd.f32 %v5754_v28, %v1424_v54  ;;  %v1618_v7 = vadd.f32 %v5773_v31, %v6816_v24  ;;  %v2219_v50 = vand.u32 2147483647, %v6866_v57 }
 0x289   : > { %v6904_v32 = vpop.eup %4860  ;;  %4041 = vst [vmem:[%s5887_s18 + $0xa0] sm:$0xff] %v4009_v46  ;;  %v3307_v12 = vmul.f32 %v6894_v11, %v1765_v47  ;;  %4864 = vrcp.f32 %v6896_v48  ;;  %v3978_v26 = vmax.f32 %v6832_v2, 0.0  ;;  %v3180_v4 = vmax.f32 %v6889_v58, 0.0  ;;  %v8685_v47 = vld [vmem:[#allocation31_spill] sm:$0xff] }
 0x28a   : > { %4866 = vrcp.f32 %v6899_v60  ;;  %4075 = vst [vmem:[%s5887_s18 + $0xc8] sm:$0xff] %v6894_v11  ;;  %v6918_v45 = vadd.f32 %v5773_v31, %v1510_v9  ;;  %v2211_v49 = vmul.f32 %v6904_v32, %v6866_v57  ;;  %vm2215_vm15 = vweird.f32 %v6866_v57 }
 0x28b   : > { %v3339_v24 = vadd.f32 %v3307_v12, %v1618_v7  ;;  %v2222_v40 = vor.u32 1.1754944e-38, %v2221_v38  ;;  %v4589_v0 = vmul.f32 -1.442695, %v2541_v53  ;;  %v3181_v23 = vmax.f32 %v6902_v6, 0.0 }
 0x28c   : > { %v4863_v36 = vpop.eup %4862  ;;  %v6925_v3 = vadd.f32 %v1512_v34, %v8677_v62  ;;  %v1248_v20 = vadd.f32 %v1247_v14, %v8678_v27  ;;  %v3661_v29 = vand.u32 2147483647, %v6899_v60  ;;  %v2212_v13 = vsub.f32 1.0, %v2211_v49  ;;  %v1425_v49 = vpop.f32.mrf.mxu2 }
 0x28d   : > { %v4619_v17 = vmul.f32 -1.442695, %v3339_v24  ;;  %vm6929_vm0 = vcmp.eq.f32.partialorder %v2219_v50, 8.507059e+37  ;;  %v6933_v63 = vadd.f32 1.0, %v4863_v36  ;;  %v3663_v44 = vand.u32 2147483648, %v6899_v60  ;;  %v1339_v46 = vpop.f32.mrf.mxu1 }
 0x28e   : > { %v3979_v15 = vmax.f32 %v6894_v11, 0.0  ;;  %vm2887_vm1 = vweird.f32 %v6896_v48  ;;  %4868 = vpow2.f32 %v4589_v0  ;;  %v2213_v33 = vmul.f32 %v6904_v32, %v2212_v13 }
 0x28f   : > { %v4865_v22 = vpop.eup %4864  ;;  %4870 = vpow2.f32 %v4619_v17  ;;  %vm2216_vm2 = vweird.f32 %v6904_v32  ;;  %v2891_v30 = vand.u32 2147483647, %v6896_v48  ;;  %vm3657_vm4 = vweird.f32 %v6899_v60 }
 0x290   : > { %v4867_v19 = vpop.eup %4866  ;;  %v2883_v39 = vmul.f32 %v4865_v22, %v6896_v48  ;;  %4872 = vrcp.f32 %v6933_v63  ;;  %v1627_v10 = vadd.f32 %v5723_v16, %v1248_v20  ;;  %vm6952_vm5 = vcmp.eq.f32.partialorder %v3661_v29, 8.507059e+37  ;;  %vm6965_vm6 = vmor %vm2215_vm15, %vm2216_vm2 }
 0x291   : > { %v3653_v37 = vmul.f32 %v4867_v19, %v6899_v60  ;;  %v2214_v1 = vadd.f32 %v6904_v32, %v2213_v33  ;;  %v2893_v54 = vand.u32 2147483648, %v6896_v48  ;;  %v3664_v56 = vor.u32 1.1754944e-38, %v3663_v44 }
 0x292   : > { %v2884_v8 = vsub.f32 1.0, %v2883_v39  ;;  %v1838_v51 = vmul.f32 %v1772_v59, %v6942_v18  ;;  %v1337_v43 = vadd.f32 %v1336_v41, %v8685_v47  ;;  %vm2888_vm7 = vweird.f32 %v4865_v22 }
 0x293   : > { %v3654_v9 = vsub.f32 1.0, %v3653_v37  ;;  %v2218_v25 = vsel %vm6965_vm6, %v6904_v32, %v2214_v1  ;;  %vm6974_vm8 = vcmp.eq.f32.partialorder %v2891_v30, 8.507059e+37  ;;  %v2510_v12 = vmul.f32 %v1773_v61, %v6942_v18  ;;  %vm2889_vm10 = vmor %vm2887_vm1, %vm2888_vm7 }
 0x294   : > { %v4869_v38 = vpop.eup %4868  ;;  %v2885_v57 = vmul.f32 %v4865_v22, %v2884_v8  ;;  %v1870_v53 = vadd.f32 %v1838_v51, %v1627_v10  ;;  %v1628_v7 = vadd.f32 %v5725_v42, %v1337_v43  ;;  %vm3658_vm9 = vweird.f32 %v4867_v19  ;;  %v1768_v10 = vld [vmem:[%s8481_s3 + $0x148] sm:$0xff]  ;;  %v1775_v51 = vld [vmem:[%s8481_s3 + $0x180] sm:$0xff] }
 0x295   : > { %v4871_v50 = vpop.eup %4870  ;;  %v3655_v34 = vmul.f32 %v4867_v19, %v3654_v9  ;;  %v2894_v14 = vor.u32 1.1754944e-38, %v2893_v54  ;;  %v6980_v24 = vadd.f32 1.0, %v4869_v38  ;;  %v2223_v0 = vsel %vm6929_vm0, %v2222_v40, %v2218_v25  ;;  %vm3659_vm11 = vmor %vm3657_vm4, %vm3658_vm9  ;;  %v1250_v54 = vpop.f32.mrf.mxu0 }
 0x296   : > { %v4873_v32 = vpop.eup %4872  ;;  %v6982_v36 = vadd.f32 1.0, %v4871_v50  ;;  %v2886_v62 = vadd.f32 %v4865_v22, %v2885_v57  ;;  %v2234_v27 = vand.u32 2147483647, %v6933_v63  ;;  %v2236_v17 = vand.u32 2147483648, %v6933_v63 }
 0x297   : > { %v3656_v20 = vadd.f32 %v4867_v19, %v3655_v34  ;;  %4874 = vrcp.f32 %v6980_v24  ;;  %v2226_v29 = vmul.f32 %v4873_v32, %v6933_v63  ;;  %v4558_v40 = vmul.f32 -1.442695, %v1870_v53 }
 0x298   : > { %4876 = vrcp.f32 %v6982_v36  ;;  %v2542_v13 = vadd.f32 %v2510_v12, %v1628_v7  ;;  %v1426_v44 = vadd.f32 %v1425_v49, %v8688_v52  ;;  %v2890_v30 = vsel %vm2889_vm10, %v4865_v22, %v2886_v62  ;;  %v8691_v7 = vld [vmem:[#allocation34_spill] sm:$0xff]  ;;  %v1341_v52 = vpop.f32.mrf.mxu1 }
 0x299   : > { %v3660_v33 = vsel %vm3659_vm11, %v4867_v19, %v3656_v20  ;;  %v3212_v48 = vmul.f32 %v3180_v4, %v2223_v0  ;;  %v2227_v59 = vsub.f32 1.0, %v2226_v29  ;;  %v2895_v60 = vsel %vm6974_vm8, %v2894_v14, %v2890_v30 }
 0x29a   : > { %v3665_v41 = vsel %vm6952_vm5, %v3664_v56, %v3660_v33  ;;  %vm2230_vm3 = vweird.f32 %v6933_v63  ;;  %vm7004_vm12 = vcmp.eq.f32.partialorder %v2234_v27, 8.507059e+37  ;;  %v3678_v58 = vand.u32 2147483648, %v6982_v36  ;;  %v8692_v27 = vld [vmem:[#allocation35_spill] sm:$0xff] }
 0x29b   : > { %v4010_v22 = vmul.f32 %v3978_v26, %v3665_v41  ;;  %v3244_v4 = vmul.f32 %v2895_v60, %v6768_v35  ;;  %v2228_v19 = vmul.f32 %v4873_v32, %v2227_v59  ;;  %vm2231_vm13 = vweird.f32 %v4873_v32  ;;  %v1514_v59 = vpop.f32.mrf.mxu3 }
 0x29c   : > { %v2237_v37 = vor.u32 1.1754944e-38, %v2236_v17  ;;  %4878 = vpow2.f32 %v4558_v40  ;;  %v4590_v21 = vmul.f32 -1.442695, %v2542_v13  ;;  %vm3672_vm14 = vweird.f32 %v6982_v36  ;;  %vm2232_vm0 = vmor %vm2230_vm3, %vm2231_vm13 }
 0x29d   : > { %v4875_v1 = vpop.eup %4874  ;;  %4042 = vst [vmem:[%s5887_s18 + $0xb0] sm:$0xff] %v4010_v22  ;;  %v7017_v2 = vadd.f32 %v3244_v4, %v3212_v48  ;;  %v2229_v26 = vadd.f32 %v4873_v32, %v2228_v19  ;;  %v7020_v35 = vadd.f32 %v5754_v28, %v1426_v44  ;;  %v3676_v56 = vand.u32 2147483647, %v6982_v36  ;;  %v1771_v4 = vld [vmem:[%s8481_s3 + $0x160] sm:$0xff]  ;;  %v8695_v19 = vld [vmem:[#allocation33_spill] sm:$0xff] }
 0x29e   : > { %v4877_v61 = vpop.eup %4876  ;;  %v2898_v8 = vmul.f32 %v4875_v1, %v6980_v24  ;;  %vm2902_vm15 = vweird.f32 %v6980_v24  ;;  %4880 = vpow2.f32 %v4590_v21  ;;  %v3679_v43 = vor.u32 1.1754944e-38, %v3678_v58  ;;  %v1252_v21 = vpop.f32.mrf.mxu0 }
 0x29f   : > { %v3668_v47 = vmul.f32 %v4877_v61, %v6982_v36  ;;  %4076 = vst [vmem:[%s5887_s18 + $0xd8] sm:$0xff] %v7017_v2  ;;  %v3308_v9 = vmul.f32 %v7017_v2, %v1768_v10  ;;  %v2906_v25 = vand.u32 2147483647, %v6980_v24  ;;  %v2233_v57 = vsel %vm2232_vm0, %v4873_v32, %v2229_v26 }
 0x2a0   : > { %v2899_v38 = vsub.f32 1.0, %v2898_v8  ;;  %v2908_v53 = vand.u32 2147483648, %v6980_v24  ;;  %v1251_v12 = vadd.f32 %v1250_v54, %v8691_v7  ;;  %v2238_v14 = vsel %vm7004_vm12, %v2237_v37, %v2233_v57 }
 0x2a1   : > { %v3669_v50 = vsub.f32 1.0, %v3668_v47  ;;  %v3340_v34 = vadd.f32 %v3308_v9, %v6918_v45  ;;  %v1839_v49 = vmul.f32 %v1775_v51, %v7026_v55  ;;  %vm2903_vm1 = vweird.f32 %v4875_v1  ;;  %v1776_v45 = vld [vmem:[%s8481_s3 + $0x188] sm:$0xff] }
 0x2a2   : > { %v4879_v0 = vpop.eup %4878  ;;  %v2900_v63 = vmul.f32 %v4875_v1, %v2899_v38  ;;  %v1631_v62 = vadd.f32 %v5723_v16, %v1251_v12  ;;  %v1340_v20 = vadd.f32 %v1339_v46, %v8692_v27  ;;  %vm3673_vm2 = vweird.f32 %v4877_v61  ;;  %vm2904_vm5 = vmor %vm2902_vm15, %vm2903_vm1 }
 0x2a3   : > { %v3670_v32 = vmul.f32 %v4877_v61, %v3669_v50  ;;  %v4620_v29 = vmul.f32 -1.442695, %v3340_v34  ;;  %v7047_v17 = vadd.f32 1.0, %v4879_v0  ;;  %vm7052_vm4 = vcmp.eq.f32.partialorder %v2906_v25, 8.507059e+37  ;;  %vm3674_vm6 = vmor %vm3672_vm14, %vm3673_vm2  ;;  %v8696_v25 = vld [vmem:[#allocation38_spill] sm:$0xff]  ;;  %v7107_v50 = vld [vmem:[%s5705_s13 + $0x88] sm:$0xff] }
 0x2a4   : > { %v4881_v40 = vpop.eup %4880  ;;  %v2901_v13 = vadd.f32 %v4875_v1, %v2900_v63  ;;  %v2909_v44 = vor.u32 1.1754944e-38, %v2908_v53  ;;  %v3213_v33 = vmul.f32 %v3181_v23, %v2238_v14  ;;  %v1871_v41 = vadd.f32 %v1839_v49, %v1631_v62  ;;  %v1778_v34 = vld [vmem:[%s8481_s3 + $0x198] sm:$0xff]  ;;  %v1517_v62 = vpop.f32.mrf.mxu3 }
 0x2a5   : > { %v3671_v30 = vadd.f32 %v4877_v61, %v3670_v32  ;;  %4882 = vpow2.f32 %v4620_v29  ;;  %v7061_v48 = vadd.f32 1.0, %v4881_v40  ;;  %v1632_v6 = vadd.f32 %v5725_v42, %v1340_v20 }
 0x2a6   : > { %v2905_v60 = vsel %vm2904_vm5, %v4875_v1, %v2901_v13  ;;  %4884 = vrcp.f32 %v7047_v17  ;;  %v2511_v23 = vmul.f32 %v1776_v45, %v7026_v55  ;;  %vm3677_vm7 = vcmp.eq.f32.partialorder %v3676_v56, 8.507059e+37 }
 0x2a7   : > { %v3675_v39 = vsel %vm3674_vm6, %v4877_v61, %v3671_v30  ;;  %v2910_v24 = vsel %vm7052_vm4, %v2909_v44, %v2905_v60  ;;  %4886 = vrcp.f32 %v7061_v48  ;;  %v1515_v10 = vadd.f32 %v1514_v59, %v8695_v19  ;;  %v8700_v30 = vld [vmem:[#allocation37_spill] sm:$0xff] }
 0x2a8   : > { %v3680_v22 = vsel %vm3677_vm7, %v3679_v43, %v3675_v39  ;;  %v3245_v58 = vmul.f32 %v2910_v24, %v6855_v5  ;;  %v4559_v37 = vmul.f32 -1.442695, %v1871_v41  ;;  %v2249_v26 = vand.u32 2147483647, %v7047_v17  ;;  %v1428_v5 = vpop.f32.mrf.mxu2 }
 0x2a9   : > { %v4011_v36 = vmul.f32 %v3979_v15, %v3680_v22  ;;  %v2251_v54 = vand.u32 2147483648, %v7047_v17  ;;  %v2543_v61 = vadd.f32 %v2511_v23, %v1632_v6  ;;  %v3980_v11 = vmax.f32 %v7017_v2, 0.0  ;;  %v8703_v22 = vld [vmem:[#allocation39_spill] sm:$0xff] }
 0x2aa   : > { %v7079_v1 = vadd.f32 %v3245_v58, %v3213_v33  ;;  %v1626_v15 = vadd.f32 %v5773_v31, %v6925_v3  ;;  %v3182_v8 = vmax.f32 %v7020_v35, 0.0  ;;  %4888 = vpow2.f32 %v4559_v37  ;;  %v8697_v35 = vld [vmem:[#allocation36_spill] sm:$0xff] }
 0x2ab   : > { %v4883_v56 = vpop.eup %4882  ;;  %4043 = vst [vmem:[%s5887_s18 + $0xc0] sm:$0xff] %v4011_v36  ;;  %v4591_v9 = vmul.f32 -1.442695, %v2543_v61  ;;  %v1253_v46 = vadd.f32 %v1252_v21, %v8696_v25  ;;  %vm2245_vm8 = vweird.f32 %v7047_v17  ;;  %v7097_v3 = vadd.f32 %v5773_v31, %v1515_v10 }
 0x2ac   : > { %v4885_v51 = vpop.eup %4884  ;;  %v7088_v47 = vadd.f32 1.0, %v4883_v56  ;;  %4077 = vst [vmem:[%s5887_s18 + $0xe8] sm:$0xff] %v7079_v1  ;;  %v3309_v43 = vmul.f32 %v7079_v1, %v1771_v4  ;;  %v1429_v53 = vadd.f32 %v1428_v5, %v8697_v35  ;;  %vm7101_vm9 = vcmp.eq.f32.partialorder %v2249_v26, 8.507059e+37 }
 0x2ad   : > { %v4887_v38 = vpop.eup %4886  ;;  %v2241_v57 = vmul.f32 %v4885_v51, %v7047_v17  ;;  %v2252_v12 = vor.u32 1.1754944e-38, %v2251_v54  ;;  %vm2917_vm10 = vweird.f32 %v7061_v48  ;;  %v2921_v63 = vand.u32 2147483647, %v7061_v48  ;;  %v1779_v17 = vld [vmem:[%s8481_s3 + $0x1a0] sm:$0xff] }
 0x2ae   : > { %4890 = vrcp.f32 %v7088_v47  ;;  %v3341_v14 = vadd.f32 %v3309_v43, %v1626_v15  ;;  %v2913_v49 = vmul.f32 %v4887_v38, %v7061_v48  ;;  %vm2246_vm11 = vweird.f32 %v4885_v51 }
 0x2af   : > { %v2242_v0 = vsub.f32 1.0, %v2241_v57  ;;  %v2923_v27 = vand.u32 2147483648, %v7061_v48  ;;  %4892 = vpow2.f32 %v4591_v9  ;;  %v1635_v20 = vadd.f32 %v5723_v16, %v1253_v46  ;;  %vm2247_vm12 = vmor %vm2245_vm8, %vm2246_vm11 }
 0x2b0   : > { %v4889_v32 = vpop.eup %4888  ;;  %v4621_v29 = vmul.f32 -1.442695, %v3341_v14  ;;  %v2914_v45 = vsub.f32 1.0, %v2913_v49  ;;  %v1840_v13 = vmul.f32 %v1778_v34, %v7107_v50  ;;  %vm2918_vm3 = vweird.f32 %v4887_v38  ;;  %v1430_v49 = vpop.f32.mrf.mxu2 }
 0x2b1   : > { %v2243_v40 = vmul.f32 %v4885_v51, %v2242_v0  ;;  %v7117_v44 = vadd.f32 1.0, %v4889_v32  ;;  %v7120_v33 = vadd.f32 %v5754_v28, %v1429_v53  ;;  %v1518_v59 = vadd.f32 %v1517_v62, %v8700_v30  ;;  %vm2919_vm14 = vmor %vm2917_vm10, %vm2918_vm3 }
 0x2b2   : > { %4894 = vpow2.f32 %v4621_v29  ;;  %v2915_v60 = vmul.f32 %v4887_v38, %v2914_v45  ;;  %v1872_v6 = vadd.f32 %v1840_v13, %v1635_v20  ;;  %vm7126_vm13 = vcmp.eq.f32.partialorder %v2921_v63, 8.507059e+37  ;;  %v1519_v45 = vpop.f32.mrf.mxu3 }
 0x2b3   : > { %v2244_v41 = vadd.f32 %v4885_v51, %v2243_v40  ;;  %v2924_v24 = vor.u32 1.1754944e-38, %v2923_v27  ;;  %4896 = vrcp.f32 %v7117_v44  ;;  %v1342_v58 = vadd.f32 %v1341_v52, %v8703_v22  ;;  %v8706_v40 = vld [vmem:[#allocation40_spill] sm:$0xff] }
 0x2b4   : > { %v4891_v23 = vpop.eup %4890  ;;  %v3981_v4 = vmax.f32 %v7079_v1, 0.0  ;;  %v2916_v10 = vadd.f32 %v4887_v38, %v2915_v60  ;;  %v3691_v21 = vand.u32 2147483647, %v7088_v47  ;;  %v3693_v26 = vand.u32 2147483648, %v7088_v47 }
 0x2b5   : > { %v3683_v36 = vmul.f32 %v4891_v23, %v7088_v47  ;;  %v2248_v19 = vsel %vm2247_vm12, %v4885_v51, %v2244_v41  ;;  %v4893_v37 = vpop.eup %4892  ;;  %v4560_v61 = vmul.f32 -1.442695, %v1872_v6  ;;  %v1636_v9 = vadd.f32 %v5725_v42, %v1342_v58 }
 0x2b6   : > { %v2253_v54 = vsel %vm7101_vm9, %v2252_v12, %v2248_v19  ;;  %v2920_v56 = vsel %vm2919_vm14, %v4887_v38, %v2916_v10  ;;  %v7144_v51 = vadd.f32 1.0, %v4893_v37  ;;  %v2512_v25 = vmul.f32 %v1779_v17, %v7107_v50  ;;  %v1774_v38 = vld [vmem:[%s8481_s3 + $0x178] sm:$0xff]  ;;  %v1255_v10 = vpop.f32.mrf.mxu0 }
 0x2b7   : > { %v3684_v5 = vsub.f32 1.0, %v3683_v36  ;;  %v3214_v15 = vmul.f32 %v3182_v8, %v2253_v54  ;;  %v2925_v43 = vsel %vm7126_vm13, %v2924_v24, %v2920_v56  ;;  %4898 = vpow2.f32 %v4560_v61  ;;  %v7210_v54 = vld [vmem:[%s5705_s13 + $0x90] sm:$0xff] }
 0x2b8   : > { %v4895_v46 = vpop.eup %4894  ;;  %vm3688_vm15 = vweird.f32 %v4891_v23  ;;  %v3246_v48 = vmul.f32 %v2925_v43, %v6942_v18  ;;  %4900 = vrcp.f32 %v7144_v51  ;;  %v2264_v53 = vand.u32 2147483647, %v7117_v44  ;;  %v1781_v61 = vld [vmem:[%s8481_s3 + $0x1b0] sm:$0xff] }
 0x2b9   : > { %v3685_v57 = vmul.f32 %v4891_v23, %v3684_v5  ;;  %v7152_v35 = vpop.eup %4896  ;;  %v7154_v8 = vadd.f32 1.0, %v4895_v46  ;;  %v3183_v7 = vmax.f32 %v7120_v33, 0.0  ;;  %v7162_v12 = vadd.f32 %v5773_v31, %v1518_v59 }
 0x2ba   : > { %vm3687_vm0 = vweird.f32 %v7088_v47  ;;  %v7165_v18 = vadd.f32 %v3246_v48, %v3214_v15  ;;  %v2256_v14 = vmul.f32 %v7152_v35, %v7117_v44  ;;  %vm3692_vm2 = vcmp.eq.f32.partialorder %v3691_v21, 8.507059e+37  ;;  %v1344_v21 = vpop.f32.mrf.mxu1 }
 0x2bb   : > { %v3686_v34 = vadd.f32 %v4891_v23, %v3685_v57  ;;  %vm3689_vm1 = vmor %vm3687_vm0, %vm3688_vm15  ;;  %v3694_v0 = vor.u32 1.1754944e-38, %v3693_v26  ;;  %4902 = vrcp.f32 %v7154_v8  ;;  %v2544_v63 = vadd.f32 %v2512_v25, %v1636_v9  ;;  %v1782_v9 = vld [vmem:[%s8481_s3 + $0x1b8] sm:$0xff]  ;;  %v8713_v57 = vld [vmem:[#allocation42_spill] sm:$0xff] }
 0x2bc   : > { %4078 = vst [vmem:[%s5887_s18 + $0xf8] sm:$0xff] %v7165_v18  ;;  %v3310_v27 = vmul.f32 %v7165_v18, %v1774_v38  ;;  %v2257_v20 = vsub.f32 1.0, %v2256_v14  ;;  %v2266_v47 = vand.u32 2147483648, %v7117_v44  ;;  %vm2260_vm4 = vweird.f32 %v7117_v44 }
 0x2bd   : > { %v3690_v62 = vsel %vm3689_vm1, %v4891_v23, %v3686_v34  ;;  %v4899_v32 = vpop.eup %4898  ;;  %vm7175_vm5 = vcmp.eq.f32.partialorder %v2264_v53, 8.507059e+37  ;;  %v1431_v13 = vadd.f32 %v1430_v49, %v8706_v40  ;;  %vm2261_vm6 = vweird.f32 %v7152_v35 }
 0x2be   : > { %v3695_v29 = vsel %vm3692_vm2, %v3694_v0, %v3690_v62  ;;  %v4901_v52 = vpop.eup %4900  ;;  %v3342_v59 = vadd.f32 %v3310_v27, %v7097_v3  ;;  %v2258_v41 = vmul.f32 %v7152_v35, %v2257_v20  ;;  %v2936_v6 = vand.u32 2147483647, %v7144_v51  ;;  %vm7194_vm7 = vmor %vm2260_vm4, %vm2261_vm6 }
 0x2bf   : > { %v4012_v30 = vmul.f32 %v3980_v11, %v3695_v29  ;;  %v2928_v60 = vmul.f32 %v4901_v52, %v7144_v51  ;;  %v7187_v23 = vadd.f32 1.0, %v4899_v32  ;;  %v4592_v39 = vmul.f32 -1.442695, %v2544_v63 }
 0x2c0   : > { %v3706_v24 = vand.u32 2147483647, %v7154_v8  ;;  %v4622_v22 = vmul.f32 -1.442695, %v3342_v59  ;;  %v2259_v2 = vadd.f32 %v7152_v35, %v2258_v41  ;;  %v2267_v11 = vor.u32 1.1754944e-38, %v2266_v47  ;;  %v1433_v41 = vpop.f32.mrf.mxu2 }
 0x2c1   : > { %4044 = vst [vmem:[%s5887_s18 + $0xd0] sm:$0xff] %v4012_v30  ;;  %v4903_v58 = vpop.eup %4902  ;;  %v2929_v3 = vsub.f32 1.0, %v2928_v60  ;;  %vm2932_vm8 = vweird.f32 %v7144_v51  ;;  %4904 = vrcp.f32 %v7187_v23  ;;  %v7201_v19 = vadd.f32 %v5754_v28, %v1431_v13 }
 0x2c2   : > { %v3698_v17 = vmul.f32 %v4903_v58, %v7154_v8  ;;  %4906 = vpow2.f32 %v4622_v22  ;;  %v2263_v37 = vsel %vm7194_vm7, %v7152_v35, %v2259_v2  ;;  %v2938_v44 = vand.u32 2147483648, %v7144_v51  ;;  %v8714_v35 = vld [vmem:[#allocation43_spill] sm:$0xff]  ;;  %v1257_v22 = vpop.f32.mrf.mxu0 }
 0x2c3   : > { %vm3702_vm9 = vweird.f32 %v7154_v8  ;;  %v2930_v26 = vmul.f32 %v4901_v52, %v2929_v3  ;;  %vm2933_vm10 = vweird.f32 %v4901_v52  ;;  %4908 = vpow2.f32 %v4592_v39 }
 0x2c4   : > { %v3699_v5 = vsub.f32 1.0, %v3698_v17  ;;  %vm7215_vm11 = vcmp.eq.f32.partialorder %v3706_v24, 8.507059e+37  ;;  %v3708_v15 = vand.u32 2147483648, %v7154_v8  ;;  %vm7220_vm3 = vcmp.eq.f32.partialorder %v2936_v6, 8.507059e+37  ;;  %vm2934_vm13 = vmor %vm2932_vm8, %vm2933_vm10  ;;  %v1777_v8 = vld [vmem:[%s8481_s3 + $0x190] sm:$0xff] }
 0x2c5   : > { %v2268_v25 = vsel %vm7175_vm5, %v2267_v11, %v2263_v37  ;;  %v2931_v46 = vadd.f32 %v4901_v52, %v2930_v26  ;;  %v1256_v48 = vadd.f32 %v1255_v10, %v8713_v57  ;;  %v1345_v38 = vadd.f32 %v1344_v21, %v8714_v35  ;;  %v8716_v37 = vld [vmem:[#allocation41_spill] sm:$0xff]  ;;  %v8719_v35 = vld [vmem:[#allocation46_spill] sm:$0xff] }
 0x2c6   : > { %v3700_v53 = vmul.f32 %v4903_v58, %v3699_v5  ;;  %vm3703_vm12 = vweird.f32 %v4903_v58  ;;  %v2939_v34 = vor.u32 1.1754944e-38, %v2938_v44  ;;  %v1841_v14 = vmul.f32 %v1781_v61, %v7210_v54  ;;  %v7283_v26 = vld [vmem:[%s5705_s13 + $0x98] sm:$0xff] }
 0x2c7   : > { %v7235_v49 = vpop.eup %4904  ;;  %v2935_v0 = vsel %vm2934_vm13, %v4901_v52, %v2931_v46  ;;  %v1639_v63 = vadd.f32 %v5723_v16, %v1256_v48  ;;  %v1640_v62 = vadd.f32 %v5725_v42, %v1345_v38  ;;  %v2513_v27 = vmul.f32 %v1782_v9, %v7210_v54  ;;  %vm3704_vm14 = vmor %vm3702_vm9, %vm3703_vm12 }
 0x2c8   : > { %v4907_v20 = vpop.eup %4906  ;;  %v3701_v47 = vadd.f32 %v4903_v58, %v3700_v53  ;;  %v2940_v32 = vsel %vm7220_vm3, %v2939_v34, %v2935_v0  ;;  %v3215_v51 = vmul.f32 %v3183_v7, %v2268_v25  ;;  %v2271_v29 = vmul.f32 %v7235_v49, %v7187_v23  ;;  %v1346_v53 = vpop.f32.mrf.mxu1 }
 0x2c9   : > { %v4909_v40 = vpop.eup %4908  ;;  %v3709_v13 = vor.u32 1.1754944e-38, %v3708_v15  ;;  %v7249_v52 = vadd.f32 1.0, %v4907_v20  ;;  %v3247_v30 = vmul.f32 %v2940_v32, %v7026_v55  ;;  %v2279_v59 = vand.u32 2147483647, %v7187_v23  ;;  %v1784_v15 = vld [vmem:[%s8481_s3 + $0x1c8] sm:$0xff] }
 0x2ca   : > { %v3705_v60 = vsel %vm3704_vm14, %v4903_v58, %v3701_v47  ;;  %v7253_v33 = vadd.f32 1.0, %v4909_v40  ;;  %v2272_v7 = vsub.f32 1.0, %v2271_v29  ;;  %v2281_v6 = vand.u32 2147483648, %v7187_v23  ;;  %v8715_v58 = vld [vmem:[#allocation44_spill] sm:$0xff]  ;;  %v8724_v29 = vld [vmem:[#allocation47_spill] sm:$0xff] }
 0x2cb   : > { %v3710_v39 = vsel %vm7215_vm11, %v3709_v13, %v3705_v60  ;;  %4910 = vrcp.f32 %v7249_v52  ;;  %v1873_v55 = vadd.f32 %v1841_v14, %v1639_v63  ;;  %v2545_v24 = vadd.f32 %v2513_v27, %v1640_v62  ;;  %v1522_v62 = vpop.f32.mrf.mxu3  ;;  %v1785_v40 = vld [vmem:[%s8481_s3 + $0x1d0] sm:$0xff] }
 0x2cc   : > { %v4013_v2 = vmul.f32 %v3981_v4, %v3710_v39  ;;  %v7264_v11 = vadd.f32 %v3247_v30, %v3215_v51  ;;  %4912 = vrcp.f32 %v7253_v33  ;;  %v1434_v3 = vadd.f32 %v1433_v41, %v8715_v58  ;;  %v7332_v39 = vld [vmem:[%s5705_s13 + $0xa0] sm:$0xff] }
 0x2cd   : > { %v3982_v36 = vmax.f32 %v7165_v18, 0.0  ;;  %v2273_v10 = vmul.f32 %v7235_v49, %v2272_v7  ;;  %v3184_v17 = vmax.f32 %v7201_v19, 0.0  ;;  %v7272_v44 = vadd.f32 %v1519_v45, %v8716_v37  ;;  %v8727_v37 = vld [vmem:[#allocation50_spill] sm:$0xff] }
 0x2ce   : > { %4045 = vst [vmem:[%s5887_s18 + $0xe0] sm:$0xff] %v4013_v2  ;;  %v3721_v21 = vand.u32 2147483647, %v7249_v52  ;;  %v3311_v1 = vmul.f32 %v7264_v11, %v1777_v8  ;;  %vm2275_vm15 = vweird.f32 %v7187_v23  ;;  %vm7278_vm0 = vcmp.eq.f32.partialorder %v2279_v59, 8.507059e+37  ;;  %v1260_v59 = vpop.f32.mrf.mxu0  ;;  %v1787_v8 = vld [vmem:[%s8481_s3 + $0x1e0] sm:$0xff] }
 0x2cf   : > { %4079 = vst [vmem:[%s5887_s18 + $0x108] sm:$0xff] %v7264_v11  ;;  %v2274_v61 = vadd.f32 %v7235_v49, %v2273_v10  ;;  %vm2276_vm1 = vweird.f32 %v7235_v49  ;;  %v4561_v5 = vmul.f32 -1.442695, %v1873_v55  ;;  %v4593_v56 = vmul.f32 -1.442695, %v2545_v24 }
 0x2d0   : > { %vm3717_vm2 = vweird.f32 %v7249_v52  ;;  %v3343_v43 = vadd.f32 %v3311_v1, %v7162_v12  ;;  %v2282_v9 = vor.u32 1.1754944e-38, %v2281_v6  ;;  %v7295_v25 = vadd.f32 %v5754_v28, %v1434_v3  ;;  %vm7309_vm5 = vmor %vm2275_vm15, %vm2276_vm1  ;;  %v1435_v6 = vpop.f32.mrf.mxu2 }
 0x2d1   : > { %v4911_v46 = vpop.eup %4910  ;;  %v3723_v57 = vand.u32 2147483648, %v7249_v52  ;;  %v2951_v48 = vand.u32 2147483647, %v7253_v33  ;;  %4914 = vpow2.f32 %v4561_v5  ;;  %v1258_v38 = vadd.f32 %v1257_v22, %v8719_v35  ;;  %v8728_v5 = vld [vmem:[#allocation48_spill] sm:$0xff] }
 0x2d2   : > { %v4913_v34 = vpop.eup %4912  ;;  %v3713_v14 = vmul.f32 %v4911_v46, %v7249_v52  ;;  %vm7301_vm4 = vcmp.eq.f32.partialorder %v3721_v21, 8.507059e+37  ;;  %v4623_v12 = vmul.f32 -1.442695, %v3343_v43  ;;  %v1842_v27 = vmul.f32 %v1784_v15, %v7283_v26 }
 0x2d3   : > { %v2943_v20 = vmul.f32 %v4913_v34, %v7253_v33  ;;  %v2278_v47 = vsel %vm7309_vm5, %v7235_v49, %v2274_v61  ;;  %v2953_v32 = vand.u32 2147483648, %v7253_v33  ;;  %4916 = vpow2.f32 %v4593_v56 }
 0x2d4   : > { %v3714_v51 = vsub.f32 1.0, %v3713_v14  ;;  %4918 = vpow2.f32 %v4623_v12  ;;  %v1643_v23 = vadd.f32 %v5723_v16, %v1258_v38  ;;  %v1347_v45 = vadd.f32 %v1346_v53, %v8724_v29  ;;  %v1524_v38 = vpop.f32.mrf.mxu3  ;;  %v1349_v14 = vpop.f32.mrf.mxu1  ;;  %v8729_v12 = vld [vmem:[#allocation45_spill] sm:$0xff] }
 0x2d5   : > { %v3724_v13 = vor.u32 1.1754944e-38, %v3723_v57  ;;  %v2944_v30 = vsub.f32 1.0, %v2943_v20  ;;  %vm2947_vm6 = vweird.f32 %v7253_v33  ;;  %vm7325_vm7 = vcmp.eq.f32.partialorder %v2951_v48, 8.507059e+37  ;;  %v1780_v20 = vld [vmem:[%s8481_s3 + $0x1a8] sm:$0xff] }
 0x2d6   : > { %v3715_v41 = vmul.f32 %v4911_v46, %v3714_v51  ;;  %vm3718_vm8 = vweird.f32 %v4911_v46  ;;  %v2283_v60 = vsel %vm7278_vm0, %v2282_v9, %v2278_v47  ;;  %v1874_v7 = vadd.f32 %v1842_v27, %v1643_v23  ;;  %v8731_v51 = vld [vmem:[#allocation51_spill] sm:$0xff] }
 0x2d7   : > { %v4915_v55 = vpop.eup %4914  ;;  %v2945_v24 = vmul.f32 %v4913_v34, %v2944_v30  ;;  %vm2948_vm9 = vweird.f32 %v4913_v34  ;;  %v1644_v22 = vadd.f32 %v5725_v42, %v1347_v45  ;;  %v2514_v2 = vmul.f32 %v1785_v40, %v7283_v26  ;;  %vm3719_vm10 = vmor %vm3717_vm2, %vm3718_vm8 }
 0x2d8   : > { %v3716_v58 = vadd.f32 %v4911_v46, %v3715_v41  ;;  %v2954_v3 = vor.u32 1.1754944e-38, %v2953_v32  ;;  %v7339_v10 = vadd.f32 1.0, %v4915_v55  ;;  %v1261_v21 = vadd.f32 %v1260_v59, %v8727_v37  ;;  %vm2949_vm11 = vmor %vm2947_vm6, %vm2948_vm9  ;;  %v1788_v37 = vld [vmem:[%s8481_s3 + $0x1e8] sm:$0xff] }
 0x2d9   : > { %v4917_v1 = vpop.eup %4916  ;;  %v2946_v4 = vadd.f32 %v4913_v34, %v2945_v24  ;;  %v3216_v61 = vmul.f32 %v3184_v17, %v2283_v60  ;;  %v1436_v56 = vadd.f32 %v1435_v6, %v8728_v5  ;;  %v1843_v15 = vmul.f32 %v1787_v8, %v7332_v39 }
 0x2da   : > { %v4919_v43 = vpop.eup %4918  ;;  %v3720_v9 = vsel %vm3719_vm10, %v4911_v46, %v3716_v58  ;;  %4920 = vrcp.f32 %v7339_v10  ;;  %v7353_v57 = vadd.f32 1.0, %v4917_v1  ;;  %v4562_v52 = vmul.f32 -1.442695, %v1874_v7 }
 0x2db   : > { %v3725_v19 = vsel %vm7301_vm4, %v3724_v13, %v3720_v9  ;;  %v7357_v17 = vadd.f32 1.0, %v4919_v43  ;;  %v2950_v48 = vsel %vm2949_vm11, %v4913_v34, %v2946_v4  ;;  %v2546_v35 = vadd.f32 %v2514_v2, %v1644_v22 }
 0x2dc   : > { %v4014_v46 = vmul.f32 %v3982_v36, %v3725_v19  ;;  %v2955_v33 = vsel %vm7325_vm7, %v2954_v3, %v2950_v48  ;;  %4922 = vrcp.f32 %v7353_v57  ;;  %v1647_v53 = vadd.f32 %v5723_v16, %v1261_v21 }
 0x2dd   : > { %4924 = vrcp.f32 %v7357_v17  ;;  %v1638_v0 = vadd.f32 %v5773_v31, %v7272_v44  ;;  %v7369_v34 = vadd.f32 %v1522_v62, %v8729_v12  ;;  %v3983_v18 = vmax.f32 %v7264_v11, 0.0  ;;  %v8730_v62 = vld [vmem:[#allocation49_spill] sm:$0xff]  ;;  %v1438_v12 = vpop.f32.mrf.mxu2 }
 0x2de   : > { %4046 = vst [vmem:[%s5887_s18 + $0xf0] sm:$0xff] %v4014_v46  ;;  %v3248_v36 = vmul.f32 %v2955_v33, %v7107_v50  ;;  %v2294_v63 = vand.u32 2147483647, %v7339_v10  ;;  %v3185_v27 = vmax.f32 %v7295_v25, 0.0  ;;  %v2296_v47 = vand.u32 2147483648, %v7339_v10 }
 0x2df   : > { %v7381_v44 = vadd.f32 %v5754_v28, %v1436_v56  ;;  %v7384_v32 = vadd.f32 %v1524_v38, %v8730_v62  ;;  %v1350_v23 = vadd.f32 %v1349_v14, %v8731_v51  ;;  %4926 = vpow2.f32 %v4562_v52 }
 0x2e0   : > { %v4921_v50 = vpop.eup %4920  ;;  %v7387_v29 = vadd.f32 %v3248_v36, %v3216_v61  ;;  %v4594_v45 = vmul.f32 -1.442695, %v2546_v35  ;;  %v1875_v40 = vadd.f32 %v1843_v15, %v1647_v53  ;;  %v3736_v13 = vand.u32 2147483647, %v7357_v17 }
 0x2e1   : > { %v3738_v30 = vand.u32 2147483648, %v7357_v17  ;;  %v2286_v49 = vmul.f32 %v4921_v50, %v7339_v10  ;;  %vm2290_vm3 = vweird.f32 %v7339_v10  ;;  %vm3732_vm12 = vweird.f32 %v7357_v17 }
 0x2e2   : > { %v4923_v59 = vpop.eup %4922  ;;  %4080 = vst [vmem:[%s5887_s18 + $0x118] sm:$0xff] %v7387_v29  ;;  %v3312_v41 = vmul.f32 %v7387_v29, %v1780_v20  ;;  %vm7397_vm13 = vcmp.eq.f32.partialorder %v2294_v63, 8.507059e+37  ;;  %4928 = vpow2.f32 %v4594_v45  ;;  %v4563_v7 = vmul.f32 -1.442695, %v1875_v40  ;;  %v1262_v45 = vpop.f32.mrf.mxu0 }
 0x2e3   : > { %v4925_v6 = vpop.eup %4924  ;;  %v2958_v8 = vmul.f32 %v4923_v59, %v7353_v57  ;;  %v2287_v55 = vsub.f32 1.0, %v2286_v49  ;;  %v2297_v24 = vor.u32 1.1754944e-38, %v2296_v47  ;;  %vm2962_vm14 = vweird.f32 %v7353_v57 }
 0x2e4   : > { %v3728_v22 = vmul.f32 %v4925_v6, %v7357_v17  ;;  %v3344_v2 = vadd.f32 %v3312_v41, %v1638_v0  ;;  %v2966_v58 = vand.u32 2147483647, %v7353_v57  ;;  %v2968_v3 = vand.u32 2147483648, %v7353_v57  ;;  %v1783_v41 = vld [vmem:[%s8481_s3 + $0x1c0] sm:$0xff] }
 0x2e5   : > { %v2959_v21 = vsub.f32 1.0, %v2958_v8  ;;  %v2288_v1 = vmul.f32 %v4921_v50, %v2287_v55  ;;  %vm2291_vm15 = vweird.f32 %v4921_v50  ;;  %4930 = vpow2.f32 %v4563_v7  ;;  %v4927_v4 = vpop.eup %4926 }
 0x2e6   : > { %v3729_v61 = vsub.f32 1.0, %v3728_v22  ;;  %v4624_v5 = vmul.f32 -1.442695, %v3344_v2  ;;  %vm2963_vm0 = vweird.f32 %v4923_v59  ;;  %v1648_v56 = vadd.f32 %v5725_v42, %v1350_v23  ;;  %vm2292_vm2 = vmor %vm2290_vm3, %vm2291_vm15 }
 0x2e7   : > { %v2289_v15 = vadd.f32 %v4921_v50, %v2288_v1  ;;  %v2960_v43 = vmul.f32 %v4923_v59, %v2959_v21  ;;  %v7410_v9 = vadd.f32 1.0, %v4927_v4  ;;  %v2515_v52 = vmul.f32 %v1788_v37, %v7332_v39  ;;  %vm2964_vm4 = vmor %vm2962_vm14, %vm2963_vm0  ;;  %v7471_v21 = vld [vmem:[%s5705_s13 + $0xa8] sm:$0xff]  ;;  %v1790_v1 = vld [vmem:[%s8481_s3 + $0x1f8] sm:$0xff] }
 0x2e8   : > { %v4929_v19 = vpop.eup %4928  ;;  %v3730_v48 = vmul.f32 %v4925_v6, %v3729_v61  ;;  %vm3733_vm1 = vweird.f32 %v4925_v6  ;;  %v3739_v35 = vor.u32 1.1754944e-38, %v3738_v30  ;;  %4932 = vpow2.f32 %v4624_v5  ;;  %v1351_v5 = vpop.f32.mrf.mxu1 }
 0x2e9   : > { %v2293_v46 = vsel %vm2292_vm2, %v4921_v50, %v2289_v15  ;;  %v2961_v33 = vadd.f32 %v4923_v59, %v2960_v43  ;;  %4934 = vrcp.f32 %v7410_v9  ;;  %v7417_v38 = vadd.f32 1.0, %v4929_v19  ;;  %vm3734_vm6 = vmor %vm3732_vm12, %vm3733_vm1  ;;  %v8734_v50 = vld [vmem:[#allocation52_spill] sm:$0xff] }
 0x2ea   : > { %v3731_v53 = vadd.f32 %v4925_v6, %v3730_v48  ;;  %v2298_v14 = vsel %vm7397_vm13, %v2297_v24, %v2293_v46  ;;  %vm2967_vm5 = vcmp.eq.f32.partialorder %v2966_v58, 8.507059e+37  ;;  %v2969_v0 = vor.u32 1.1754944e-38, %v2968_v3 }
 0x2eb   : > { %v4931_v36 = vpop.eup %4930  ;;  %v2965_v10 = vsel %vm2964_vm4, %v4923_v59, %v2961_v33  ;;  %v3217_v63 = vmul.f32 %v3185_v27, %v2298_v14  ;;  %4936 = vrcp.f32 %v7417_v38  ;;  %v2547_v20 = vadd.f32 %v2515_v52, %v1648_v56  ;;  %v1527_v27 = vpop.f32.mrf.mxu3 }
 0x2ec   : > { %v3735_v47 = vsel %vm3734_vm6, %v4925_v6, %v3731_v53  ;;  %vm3737_vm7 = vcmp.eq.f32.partialorder %v3736_v13, 8.507059e+37  ;;  %v2970_v62 = vsel %vm2967_vm5, %v2969_v0, %v2965_v10  ;;  %v1642_v57 = vadd.f32 %v5773_v31, %v7369_v34  ;;  %v8736_v6 = vld [vmem:[#allocation54_spill] sm:$0xff]  ;;  %v8741_v0 = vld [vmem:[#allocation55_spill] sm:$0xff] }
 0x2ed   : > { %v3740_v51 = vsel %vm3737_vm7, %v3739_v35, %v3735_v47  ;;  %v3249_v23 = vmul.f32 %v2970_v62, %v7210_v54  ;;  %v7435_v17 = vadd.f32 %v5773_v31, %v7384_v32  ;;  %v1439_v25 = vadd.f32 %v1438_v12, %v8734_v50 }
 0x2ee   : > { %v4933_v40 = vpop.eup %4932  ;;  %v4015_v13 = vmul.f32 %v3983_v18, %v3740_v51  ;;  %v3984_v30 = vmax.f32 %v7387_v29, 0.0  ;;  %v3186_v34 = vmax.f32 %v7381_v44, 0.0  ;;  %v7442_v49 = vadd.f32 1.0, %v4931_v36  ;;  %v8735_v44 = vld [vmem:[#allocation53_spill] sm:$0xff]  ;;  %v1791_v51 = vld [vmem:[%s8481_s3 + $0x200] sm:$0xff] }
 0x2ef   : > { %v4935_v54 = vpop.eup %4934  ;;  %v7444_v59 = vadd.f32 1.0, %v4933_v40  ;;  %v7446_v32 = vadd.f32 %v3249_v23, %v3217_v63  ;;  %v2309_v60 = vand.u32 2147483647, %v7410_v9  ;;  %v4595_v11 = vmul.f32 -1.442695, %v2547_v20 }
 0x2f0   : > { %4047 = vst [vmem:[%s5887_s18 + $0x100] sm:$0xff] %v4015_v13  ;;  %v2301_v18 = vmul.f32 %v4935_v54, %v7410_v9  ;;  %4938 = vrcp.f32 %v7442_v49  ;;  %v7456_v7 = vadd.f32 %v1527_v27, %v8735_v44  ;;  %v1263_v8 = vadd.f32 %v1262_v45, %v8736_v6 }
 0x2f1   : > { %v4937_v55 = vpop.eup %4936  ;;  %4940 = vrcp.f32 %v7444_v59  ;;  %4081 = vst [vmem:[%s5887_s18 + $0x128] sm:$0xff] %v7446_v32  ;;  %v2311_v24 = vand.u32 2147483648, %v7410_v9  ;;  %v2981_v22 = vand.u32 2147483647, %v7417_v38  ;;  %v7465_v2 = vadd.f32 %v5754_v28, %v1439_v25 }
 0x2f2   : > { %v3313_v58 = vmul.f32 %v7446_v32, %v1783_v41  ;;  %v2973_v3 = vmul.f32 %v4937_v55, %v7417_v38  ;;  %v2302_v37 = vsub.f32 1.0, %v2301_v18  ;;  %vm2305_vm8 = vweird.f32 %v7410_v9 }
 0x2f3   : > { %vm7476_vm9 = vcmp.eq.f32.partialorder %v2309_v60, 8.507059e+37  ;;  %vm2977_vm10 = vweird.f32 %v7417_v38  ;;  %v2983_v61 = vand.u32 2147483648, %v7417_v38  ;;  %4942 = vpow2.f32 %v4595_v11 }
 0x2f4   : > { %v3345_v56 = vadd.f32 %v3313_v58, %v1642_v57  ;;  %v2974_v15 = vsub.f32 1.0, %v2973_v3  ;;  %v2303_v43 = vmul.f32 %v4935_v54, %v2302_v37  ;;  %vm2306_vm11 = vweird.f32 %v4935_v54 }
 0x2f5   : > { %v2312_v52 = vor.u32 1.1754944e-38, %v2311_v24  ;;  %vm7482_vm3 = vcmp.eq.f32.partialorder %v2981_v22, 8.507059e+37  ;;  %v1651_v48 = vadd.f32 %v5723_v16, %v1263_v8  ;;  %v1844_v35 = vmul.f32 %v1790_v1, %v7471_v21  ;;  %vm2307_vm12 = vmor %vm2305_vm8, %vm2306_vm11 }
 0x2f6   : > { %v7488_v46 = vpop.eup %4938  ;;  %v4625_v33 = vmul.f32 -1.442695, %v3345_v56  ;;  %v2304_v53 = vadd.f32 %v4935_v54, %v2303_v43  ;;  %v2975_v14 = vmul.f32 %v4937_v55, %v2974_v15  ;;  %v1352_v12 = vadd.f32 %v1351_v5, %v8741_v0 }
 0x2f7   : > { %v4941_v36 = vpop.eup %4940  ;;  %v3751_v10 = vand.u32 2147483647, %v7444_v59  ;;  %vm2978_vm13 = vweird.f32 %v4937_v55  ;;  %v2984_v63 = vor.u32 1.1754944e-38, %v2983_v61  ;;  %v2316_v20 = vmul.f32 %v7488_v46, %v7442_v49 }
 0x2f8   : > { %v3743_v47 = vmul.f32 %v4941_v36, %v7444_v59  ;;  %v3753_v62 = vand.u32 2147483648, %v7444_v59  ;;  %4944 = vpow2.f32 %v4625_v33  ;;  %v2308_v57 = vsel %vm2307_vm12, %v4935_v54, %v2304_v53  ;;  %vm2979_vm14 = vmor %vm2977_vm10, %vm2978_vm13  ;;  %v1354_v53 = vpop.f32.mrf.mxu1 }
 0x2f9   : > { %v4943_v23 = vpop.eup %4942  ;;  %v2313_v9 = vsel %vm7476_vm9, %v2312_v52, %v2308_v57  ;;  %v2976_v50 = vadd.f32 %v4937_v55, %v2975_v14  ;;  %v2317_v25 = vsub.f32 1.0, %v2316_v20  ;;  %v1876_v27 = vadd.f32 %v1844_v35, %v1651_v48  ;;  %v1440_v35 = vpop.f32.mrf.mxu2  ;;  %v8746_v20 = vld [vmem:[#allocation56_spill] sm:$0xff] }
 0x2fa   : > { %v3744_v45 = vsub.f32 1.0, %v3743_v47  ;;  %v3218_v40 = vmul.f32 %v3186_v34, %v2313_v9  ;;  %v7505_v13 = vadd.f32 1.0, %v4943_v23  ;;  %v1652_v54 = vadd.f32 %v5725_v42, %v1352_v12  ;;  %v8750_v9 = vld [vmem:[#allocation59_spill] sm:$0xff] }
 0x2fb   : > { %v2980_v41 = vsel %vm2979_vm14, %v4937_v55, %v2976_v50  ;;  %v2318_v60 = vmul.f32 %v7488_v46, %v2317_v25  ;;  %v4564_v11 = vmul.f32 -1.442695, %v1876_v27  ;;  %v2516_v18 = vmul.f32 %v1791_v51, %v7471_v21 }
 0x2fc   : > { %v3745_v44 = vmul.f32 %v4941_v36, %v3744_v45  ;;  %vm3748_vm15 = vweird.f32 %v4941_v36  ;;  %v2985_v6 = vsel %vm7482_vm3, %v2984_v63, %v2980_v41  ;;  %4946 = vrcp.f32 %v7505_v13 }
 0x2fd   : > { %vm3747_vm0 = vweird.f32 %v7444_v59  ;;  %v3754_v38 = vor.u32 1.1754944e-38, %v3753_v62  ;;  %v3250_v34 = vmul.f32 %v2985_v6, %v7283_v26  ;;  %v2324_v8 = vand.u32 2147483647, %v7442_v49  ;;  %v1786_v59 = vld [vmem:[%s8481_s3 + $0x1d8] sm:$0xff]  ;;  %v8747_v62 = vld [vmem:[#allocation58_spill] sm:$0xff] }
 0x2fe   : > { %v4945_v55 = vpop.eup %4944  ;;  %v3746_v24 = vadd.f32 %v4941_v36, %v3745_v44  ;;  %v2326_v22 = vand.u32 2147483648, %v7442_v49  ;;  %4948 = vpow2.f32 %v4564_v11  ;;  %v2548_v58 = vadd.f32 %v2516_v18, %v1652_v54  ;;  %vm3749_vm1 = vmor %vm3747_vm0, %vm3748_vm15 }
 0x2ff   : > { %v7517_v3 = vadd.f32 1.0, %v4945_v55  ;;  %v7519_v37 = vadd.f32 %v3250_v34, %v3218_v40  ;;  %v2319_v26 = vadd.f32 %v7488_v46, %v2318_v60  ;;  %vm2321_vm2 = vweird.f32 %v7488_v46  ;;  %v1794_v40 = vld [vmem:[%s8481_s3 + $0x218] sm:$0xff]  ;;  %v1529_v60 = vpop.f32.mrf.mxu3 }
 0x300   : > { %v3750_v1 = vsel %vm3749_vm1, %v4941_v36, %v3746_v24  ;;  %vm3752_vm4 = vcmp.eq.f32.partialorder %v3751_v10, 8.507059e+37  ;;  %v7528_v4 = vadd.f32 %v5773_v31, %v7456_v7  ;;  %v4596_v61 = vmul.f32 -1.442695, %v2548_v58  ;;  %v7557_v36 = vld [vmem:[%s5705_s13 + $0xb0] sm:$0xff] }
 0x301   : > { %v3755_v5 = vsel %vm3752_vm4, %v3754_v38, %v3750_v1  ;;  %4950 = vrcp.f32 %v7517_v3  ;;  %4082 = vst [vmem:[%s5887_s18 + $0x138] sm:$0xff] %v7519_v37  ;;  %vm2320_vm5 = vweird.f32 %v7442_v49  ;;  %v3187_v56 = vmax.f32 %v7465_v2, 0.0  ;;  %v1265_v49 = vpop.f32.mrf.mxu0 }
 0x302   : > { %v4947_v15 = vpop.eup %4946  ;;  %v4016_v43 = vmul.f32 %v3984_v30, %v3755_v5  ;;  %v3985_v52 = vmax.f32 %v7446_v32, 0.0  ;;  %v3314_v7 = vmul.f32 %v7519_v37, %v1786_v59  ;;  %vm7539_vm6 = vmor %vm2320_vm5, %vm2321_vm2  ;;  %v2996_v48 = vand.u32 2147483647, %v7505_v13 }
 0x303   : > { %v2988_v33 = vmul.f32 %v4947_v15, %v7505_v13  ;;  %v2323_v29 = vsel %vm7539_vm6, %v7488_v46, %v2319_v26  ;;  %vm7548_vm7 = vcmp.eq.f32.partialorder %v2324_v8, 8.507059e+37  ;;  %v2327_v2 = vor.u32 1.1754944e-38, %v2326_v22  ;;  %v1793_v46 = vld [vmem:[%s8481_s3 + $0x210] sm:$0xff] }
 0x304   : > { %v4949_v14 = vpop.eup %4948  ;;  %4048 = vst [vmem:[%s5887_s18 + $0x110] sm:$0xff] %v4016_v43  ;;  %v3346_v0 = vadd.f32 %v3314_v7, %v7435_v17  ;;  %vm2992_vm8 = vweird.f32 %v7505_v13  ;;  %v2998_v12 = vand.u32 2147483648, %v7505_v13  ;;  %4952 = vpow2.f32 %v4596_v61 }
 0x305   : > { %v2989_v10 = vsub.f32 1.0, %v2988_v33  ;;  %v7562_v63 = vadd.f32 1.0, %v4949_v14  ;;  %v1441_v47 = vadd.f32 %v1440_v35, %v8746_v20  ;;  %v1266_v57 = vadd.f32 %v1265_v49, %v8747_v62  ;;  %v8753_v49 = vld [vmem:[#allocation57_spill] sm:$0xff] }
 0x306   : > { %v4626_v51 = vmul.f32 -1.442695, %v3346_v0  ;;  %v2328_v17 = vsel %vm7548_vm7, %v2327_v2, %v2323_v29  ;;  %vm7568_vm9 = vcmp.eq.f32.partialorder %v2996_v48, 8.507059e+37  ;;  %v1355_v50 = vadd.f32 %v1354_v53, %v8750_v9  ;;  %v1789_v2 = vld [vmem:[%s8481_s3 + $0x1f0] sm:$0xff] }
 0x307   : > { %v4951_v25 = vpop.eup %4950  ;;  %v2990_v27 = vmul.f32 %v4947_v15, %v2989_v10  ;;  %vm2993_vm10 = vweird.f32 %v4947_v15  ;;  %4954 = vrcp.f32 %v7562_v63  ;;  %v1845_v45 = vmul.f32 %v1793_v46, %v7557_v36 }
 0x308   : > { %v3758_v54 = vmul.f32 %v4951_v25, %v7517_v3  ;;  %vm3762_vm11 = vweird.f32 %v7517_v3  ;;  %4956 = vpow2.f32 %v4626_v51  ;;  %v2999_v41 = vor.u32 1.1754944e-38, %v2998_v12  ;;  %vm2994_vm3 = vmor %vm2992_vm8, %vm2993_vm10  ;;  %v1443_v51 = vpop.f32.mrf.mxu2 }
 0x309   : > { %v3766_v11 = vand.u32 2147483647, %v7517_v3  ;;  %v3768_v18 = vand.u32 2147483648, %v7517_v3  ;;  %v2991_v44 = vadd.f32 %v4947_v15, %v2990_v27  ;;  %v1655_v6 = vadd.f32 %v5723_v16, %v1266_v57 }
 0x30a   : > { %v4953_v38 = vpop.eup %4952  ;;  %v3759_v34 = vsub.f32 1.0, %v3758_v54  ;;  %v3986_v8 = vmax.f32 %v7519_v37, 0.0  ;;  %v1656_v55 = vadd.f32 %v5725_v42, %v1355_v50  ;;  %v2517_v24 = vmul.f32 %v1794_v40, %v7557_v36  ;;  %v7643_v40 = vld [vmem:[%s5705_s13 + $0xb8] sm:$0xff]  ;;  %v1796_v54 = vld [vmem:[%s8481_s3 + $0x228] sm:$0xff] }
 0x30b   : > { %v2995_v22 = vsel %vm2994_vm3, %v4947_v15, %v2991_v44  ;;  %v3219_v58 = vmul.f32 %v3187_v56, %v2328_v17  ;;  %v7589_v59 = vadd.f32 1.0, %v4953_v38  ;;  %v1877_v26 = vadd.f32 %v1845_v45, %v1655_v6  ;;  %v1532_v17 = vpop.f32.mrf.mxu3 }
 0x30c   : > { %v3760_v1 = vmul.f32 %v4951_v25, %v3759_v34  ;;  %vm3763_vm12 = vweird.f32 %v4951_v25  ;;  %v3000_v61 = vsel %vm7568_vm9, %v2999_v41, %v2995_v22  ;;  %v7594_v5 = vadd.f32 %v5754_v28, %v1441_v47  ;;  %v8758_v34 = vld [vmem:[#allocation62_spill] sm:$0xff] }
 0x30d   : > { %v7596_v43 = vpop.eup %4954  ;;  %vm7598_vm13 = vcmp.eq.f32.partialorder %v3766_v11, 8.507059e+37  ;;  %v3251_v15 = vmul.f32 %v3000_v61, %v7332_v39  ;;  %4958 = vrcp.f32 %v7589_v59  ;;  %v2549_v56 = vadd.f32 %v2517_v24, %v1656_v55  ;;  %vm3764_vm14 = vmor %vm3762_vm11, %vm3763_vm12  ;;  %v1797_v61 = vld [vmem:[%s8481_s3 + $0x230] sm:$0xff] }
 0x30e   : > { %v4957_v7 = vpop.eup %4956  ;;  %v3761_v19 = vadd.f32 %v4951_v25, %v3760_v1  ;;  %v2331_v48 = vmul.f32 %v7596_v43, %v7562_v63  ;;  %v2339_v35 = vand.u32 2147483647, %v7562_v63  ;;  %v1530_v33 = vadd.f32 %v1529_v60, %v8753_v49  ;;  %v8756_v60 = vld [vmem:[#allocation60_spill] sm:$0xff] }
 0x30f   : > { %v3769_v29 = vor.u32 1.1754944e-38, %v3768_v18  ;;  %v7610_v30 = vadd.f32 1.0, %v4957_v7  ;;  %v7612_v39 = vadd.f32 %v3251_v15, %v3219_v58  ;;  %v4565_v53 = vmul.f32 -1.442695, %v1877_v26  ;;  %v8757_v18 = vld [vmem:[#allocation61_spill] sm:$0xff]  ;;  %v8763_v15 = vld [vmem:[#allocation63_spill] sm:$0xff] }
 0x310   : > { %v3765_v14 = vsel %vm3764_vm14, %v4951_v25, %v3761_v19  ;;  %v2332_v0 = vsub.f32 1.0, %v2331_v48  ;;  %v2341_v12 = vand.u32 2147483648, %v7562_v63  ;;  %v3188_v46 = vmax.f32 %v7594_v5, 0.0 }
 0x311   : > { %v3770_v3 = vsel %vm7598_vm13, %v3769_v29, %v3765_v14  ;;  %4960 = vrcp.f32 %v7610_v30  ;;  %4083 = vst [vmem:[%s5887_s18 + $0x148] sm:$0xff] %v7612_v39  ;;  %vm2335_vm15 = vweird.f32 %v7562_v63  ;;  %v4597_v10 = vmul.f32 -1.442695, %v2549_v56 }
 0x312   : > { %v4017_v20 = vmul.f32 %v3985_v52, %v3770_v3  ;;  %v3315_v47 = vmul.f32 %v7612_v39, %v1789_v2  ;;  %vm7628_vm0 = vcmp.eq.f32.partialorder %v2339_v35, 8.507059e+37  ;;  %v7633_v57 = vadd.f32 %v5773_v31, %v1530_v33  ;;  %v1267_v52 = vpop.f32.mrf.mxu0 }
 0x313   : > { %v4959_v23 = vpop.eup %4958  ;;  %v2333_v9 = vmul.f32 %v7596_v43, %v2332_v0  ;;  %v3011_v50 = vand.u32 2147483647, %v7589_v59  ;;  %v3013_v32 = vand.u32 2147483648, %v7589_v59  ;;  %4962 = vpow2.f32 %v4565_v53 }
 0x314   : > { %4049 = vst [vmem:[%s5887_s18 + $0x120] sm:$0xff] %v4017_v20  ;;  %v3347_v25 = vadd.f32 %v3315_v47, %v7528_v4  ;;  %v3003_v27 = vmul.f32 %v4959_v23, %v7589_v59  ;;  %vm2336_vm1 = vweird.f32 %v7596_v43  ;;  %v2342_v45 = vor.u32 1.1754944e-38, %v2341_v12  ;;  %v1356_v4 = vpop.f32.mrf.mxu1  ;;  %v1445_v20 = vpop.f32.mrf.mxu2 }
 0x315   : > { %v2334_v41 = vadd.f32 %v7596_v43, %v2333_v9  ;;  %4964 = vpow2.f32 %v4597_v10  ;;  %v1444_v11 = vadd.f32 %v1443_v51, %v8756_v60  ;;  %v7651_v44 = vadd.f32 %v1532_v17, %v8757_v18  ;;  %vm7660_vm5 = vmor %vm2335_vm15, %vm2336_vm1 }
 0x316   : > { %v4627_v6 = vmul.f32 -1.442695, %v3347_v25  ;;  %v3004_v38 = vsub.f32 1.0, %v3003_v27  ;;  %vm3007_vm2 = vweird.f32 %v7589_v59  ;;  %v1268_v55 = vadd.f32 %v1267_v52, %v8758_v34  ;;  %v8766_v27 = vld [vmem:[#allocation64_spill] sm:$0xff]  ;;  %v8767_v34 = vld [vmem:[#allocation66_spill] sm:$0xff] }
 0x317   : > { %v4961_v24 = vpop.eup %4960  ;;  %vm3777_vm4 = vweird.f32 %v7610_v30  ;;  %vm7664_vm6 = vcmp.eq.f32.partialorder %v3011_v50, 8.507059e+37  ;;  %v3014_v26 = vor.u32 1.1754944e-38, %v3013_v32  ;;  %v1846_v1 = vmul.f32 %v1796_v54, %v7643_v40 }
 0x318   : > { %v3773_v13 = vmul.f32 %v4961_v24, %v7610_v30  ;;  %4966 = vpow2.f32 %v4627_v6  ;;  %v2338_v63 = vsel %vm7660_vm5, %v7596_v43, %v2334_v41  ;;  %v1357_v56 = vadd.f32 %v1356_v4, %v8763_v15 }
 0x319   : > { %v4963_v7 = vpop.eup %4962  ;;  %v3781_v19 = vand.u32 2147483647, %v7610_v30  ;;  %v3005_v48 = vmul.f32 %v4959_v23, %v3004_v38  ;;  %vm3008_vm7 = vweird.f32 %v4959_v23  ;;  %v1659_v35 = vadd.f32 %v5723_v16, %v1268_v55 }
 0x31a   : > { %v3774_v49 = vsub.f32 1.0, %v3773_v13  ;;  %v3783_v33 = vand.u32 2147483648, %v7610_v30  ;;  %v7680_v29 = vadd.f32 1.0, %v4963_v7  ;;  %v2518_v2 = vmul.f32 %v1797_v61, %v7643_v40  ;;  %vm3009_vm9 = vmor %vm3007_vm2, %vm3008_vm7  ;;  %v1270_v54 = vpop.f32.mrf.mxu0  ;;  %v7742_v61 = vld [vmem:[%s5705_s13 + $0xc0] sm:$0xff] }
 0x31b   : > { %v4965_v53 = vpop.eup %4964  ;;  %vm3778_vm8 = vweird.f32 %v4961_v24  ;;  %v2343_v43 = vsel %vm7628_vm0, %v2342_v45, %v2338_v63  ;;  %v3006_v14 = vadd.f32 %v4959_v23, %v3005_v48  ;;  %v1878_v0 = vadd.f32 %v1846_v1, %v1659_v35 }
 0x31c   : > { %v3775_v12 = vmul.f32 %v4961_v24, %v3774_v49  ;;  %4968 = vrcp.f32 %v7680_v29  ;;  %v7688_v3 = vadd.f32 1.0, %v4965_v53  ;;  %v1660_v10 = vadd.f32 %v5725_v42, %v1357_v56  ;;  %vm3779_vm11 = vmor %vm3777_vm4, %vm3778_vm8 }
 0x31d   : > { %vm7691_vm10 = vcmp.eq.f32.partialorder %v3781_v19, 8.507059e+37  ;;  %v3010_v51 = vsel %vm3009_vm9, %v4959_v23, %v3006_v14  ;;  %v7696_v62 = vadd.f32 %v5754_v28, %v1444_v11  ;;  %v4566_v17 = vmul.f32 -1.442695, %v1878_v0 }
 0x31e   : > { %v4967_v9 = vpop.eup %4966  ;;  %v3776_v50 = vadd.f32 %v4961_v24, %v3775_v12  ;;  %v3015_v59 = vsel %vm7664_vm6, %v3014_v26, %v3010_v51  ;;  %v3220_v32 = vmul.f32 %v3188_v46, %v2343_v43  ;;  %4970 = vrcp.f32 %v7688_v3  ;;  %v1795_v26 = vld [vmem:[%s8481_s3 + $0x220] sm:$0xff] }
 0x31f   : > { %v3784_v52 = vor.u32 1.1754944e-38, %v3783_v33  ;;  %v7706_v23 = vadd.f32 1.0, %v4967_v9  ;;  %v3252_v25 = vmul.f32 %v3015_v59, %v7471_v21  ;;  %v1446_v45 = vadd.f32 %v1445_v20, %v8766_v27  ;;  %v1792_v21 = vld [vmem:[%s8481_s3 + $0x208] sm:$0xff] }
 0x320   : > { %v3780_v41 = vsel %vm3779_vm11, %v4961_v24, %v3776_v50  ;;  %v2354_v60 = vand.u32 2147483647, %v7680_v29  ;;  %4972 = vpow2.f32 %v4566_v17  ;;  %v2550_v5 = vadd.f32 %v2518_v2, %v1660_v10  ;;  %v1359_v10 = vpop.f32.mrf.mxu1 }
 0x321   : > { %v3785_v46 = vsel %vm7691_vm10, %v3784_v52, %v3780_v41  ;;  %v3987_v30 = vmax.f32 %v7612_v39, 0.0  ;;  %4974 = vrcp.f32 %v7706_v23  ;;  %v2356_v11 = vand.u32 2147483648, %v7680_v29  ;;  %v1800_v41 = vld [vmem:[%s8481_s3 + $0x248] sm:$0xff] }
 0x322   : > { %v4969_v18 = vpop.eup %4968  ;;  %v4018_v4 = vmul.f32 %v3986_v8, %v3785_v46  ;;  %v7721_v6 = vadd.f32 %v3252_v25, %v3220_v32  ;;  %v3189_v38 = vmax.f32 %v7696_v62, 0.0  ;;  %v1271_v55 = vadd.f32 %v1270_v54, %v8767_v34  ;;  %v8770_v25 = vld [vmem:[#allocation67_spill] sm:$0xff] }
 0x323   : > { %v2346_v24 = vmul.f32 %v4969_v18, %v7680_v29  ;;  %vm2350_vm3 = vweird.f32 %v7680_v29  ;;  %v7729_v22 = vadd.f32 %v5773_v31, %v7651_v44  ;;  %v7732_v58 = vadd.f32 %v5754_v28, %v1446_v45  ;;  %v1799_v44 = vld [vmem:[%s8481_s3 + $0x240] sm:$0xff] }
 0x324   : > { %v4971_v37 = vpop.eup %4970  ;;  %4050 = vst [vmem:[%s5887_s18 + $0x130] sm:$0xff] %v4018_v4  ;;  %v3316_v8 = vmul.f32 %v7721_v6, %v1792_v21  ;;  %vm7736_vm12 = vcmp.eq.f32.partialorder %v2354_v60, 8.507059e+37  ;;  %vm3022_vm13 = vweird.f32 %v7688_v3  ;;  %v4598_v1 = vmul.f32 -1.442695, %v2550_v5  ;;  %v1534_v4 = vpop.f32.mrf.mxu3 }
 0x325   : > { %4084 = vst [vmem:[%s5887_s18 + $0x158] sm:$0xff] %v7721_v6  ;;  %v3018_v13 = vmul.f32 %v4971_v37, %v7688_v3  ;;  %v2347_v63 = vsub.f32 1.0, %v2346_v24  ;;  %v2357_v15 = vor.u32 1.1754944e-38, %v2356_v11  ;;  %v3028_v56 = vand.u32 2147483648, %v7688_v3 }
 0x326   : > { %v4973_v7 = vpop.eup %4972  ;;  %v3348_v19 = vadd.f32 %v3316_v8, %v7633_v57  ;;  %vm2351_vm14 = vweird.f32 %v4969_v18  ;;  %4976 = vpow2.f32 %v4598_v1  ;;  %v1663_v48 = vadd.f32 %v5723_v16, %v1271_v55 }
 0x327   : > { %v4975_v35 = vpop.eup %4974  ;;  %v3019_v49 = vsub.f32 1.0, %v3018_v13  ;;  %v2348_v33 = vmul.f32 %v4969_v18, %v2347_v63  ;;  %v7753_v2 = vadd.f32 1.0, %v4973_v7  ;;  %v1847_v53 = vmul.f32 %v1799_v44, %v7742_v61  ;;  %vm2352_vm1 = vmor %vm2350_vm3, %vm2351_vm14  ;;  %v8771_v63 = vld [vmem:[#allocation65_spill] sm:$0xff] }
 0x328   : > { %v3788_v43 = vmul.f32 %v4975_v35, %v7706_v23  ;;  %vm3792_vm15 = vweird.f32 %v7706_v23  ;;  %v4628_v14 = vmul.f32 -1.442695, %v3348_v19  ;;  %v3026_v0 = vand.u32 2147483647, %v7688_v3 }
 0x329   : > { %v2349_v12 = vadd.f32 %v4969_v18, %v2348_v33  ;;  %v3020_v57 = vmul.f32 %v4971_v37, %v3019_v49  ;;  %vm3023_vm0 = vweird.f32 %v4971_v37  ;;  %4978 = vrcp.f32 %v7753_v2 }
 0x32a   : > { %v3789_v20 = vsub.f32 1.0, %v3788_v43  ;;  %v3796_v47 = vand.u32 2147483647, %v7706_v23  ;;  %v3798_v51 = vand.u32 2147483648, %v7706_v23  ;;  %4980 = vpow2.f32 %v4628_v14  ;;  %vm3024_vm4 = vmor %vm3022_vm13, %vm3023_vm0  ;;  %v8774_v43 = vld [vmem:[#allocation68_spill] sm:$0xff] }
 0x32b   : > { %v2353_v62 = vsel %vm2352_vm1, %v4969_v18, %v2349_v12  ;;  %v3021_v17 = vadd.f32 %v4971_v37, %v3020_v57  ;;  %v3029_v9 = vor.u32 1.1754944e-38, %v3028_v56  ;;  %v1879_v50 = vadd.f32 %v1847_v53, %v1663_v48  ;;  %v1448_v56 = vpop.f32.mrf.mxu2 }
 0x32c   : > { %v4977_v59 = vpop.eup %4976  ;;  %v3790_v32 = vmul.f32 %v4975_v35, %v3789_v20  ;;  %vm3793_vm2 = vweird.f32 %v4975_v35  ;;  %v2358_v52 = vsel %vm7736_vm12, %v2357_v15, %v2353_v62  ;;  %v1360_v27 = vadd.f32 %v1359_v10, %v8770_v25 }
 0x32d   : > { %v3025_v45 = vsel %vm3024_vm4, %v4971_v37, %v3021_v17  ;;  %vm3027_vm5 = vcmp.eq.f32.partialorder %v3026_v0, 8.507059e+37  ;;  %v3221_v29 = vmul.f32 %v3189_v38, %v2358_v52  ;;  %v7771_v54 = vadd.f32 1.0, %v4977_v59  ;;  %vm3794_vm7 = vmor %vm3792_vm15, %vm3793_vm2  ;;  %v1802_v0 = vld [vmem:[%s8481_s3 + $0x258] sm:$0xff] }
 0x32e   : > { %v3791_v60 = vadd.f32 %v4975_v35, %v3790_v32  ;;  %vm3797_vm6 = vcmp.eq.f32.partialorder %v3796_v47, 8.507059e+37  ;;  %v3030_v5 = vsel %vm3027_vm5, %v3029_v9, %v3025_v45  ;;  %v4567_v46 = vmul.f32 -1.442695, %v1879_v50 }
 0x32f   : > { %v7776_v21 = vpop.eup %4978  ;;  %v3799_v3 = vor.u32 1.1754944e-38, %v3798_v51  ;;  %v3253_v11 = vmul.f32 %v3030_v5, %v7557_v36  ;;  %4982 = vrcp.f32 %v7771_v54  ;;  %v2369_v18 = vand.u32 2147483647, %v7753_v2  ;;  %v1361_v5 = vpop.f32.mrf.mxu1 }
 0x330   : > { %v4981_v38 = vpop.eup %4980  ;;  %v3795_v34 = vsel %vm3794_vm7, %v4975_v35, %v3791_v60  ;;  %v2361_v55 = vmul.f32 %v7776_v21, %v7753_v2  ;;  %v1664_v24 = vadd.f32 %v5725_v42, %v1360_v27  ;;  %v2519_v37 = vmul.f32 %v1800_v41, %v7742_v61  ;;  %v1272_v35 = vpop.f32.mrf.mxu0 }
 0x331   : > { %v3800_v23 = vsel %vm3797_vm6, %v3799_v3, %v3795_v34  ;;  %v7787_v8 = vadd.f32 1.0, %v4981_v38  ;;  %v7789_v36 = vadd.f32 %v3253_v11, %v3221_v29  ;;  %v2371_v1 = vand.u32 2147483648, %v7753_v2  ;;  %v1537_v11 = vpop.f32.mrf.mxu3  ;;  %v1803_v34 = vld [vmem:[%s8481_s3 + $0x260] sm:$0xff] }
 0x332   : > { %v4019_v44 = vmul.f32 %v3987_v30, %v3800_v23  ;;  %v2362_v13 = vsub.f32 1.0, %v2361_v55  ;;  %v7798_v15 = vadd.f32 %v1534_v4, %v8771_v63  ;;  %4984 = vpow2.f32 %v4567_v46 }
 0x333   : > { %v3988_v7 = vmax.f32 %v7721_v6, 0.0  ;;  %4986 = vrcp.f32 %v7787_v8  ;;  %4085 = vst [vmem:[%s5887_s18 + $0x168] sm:$0xff] %v7789_v36  ;;  %vm2365_vm8 = vweird.f32 %v7753_v2  ;;  %v3190_v19 = vmax.f32 %v7732_v58, 0.0  ;;  %v7817_v58 = vld [vmem:[%s5705_s13 + $0xc8] sm:$0xff]  ;;  %v1450_v63 = vpop.f32.mrf.mxu2 }
 0x334   : > { %4051 = vst [vmem:[%s5887_s18 + $0x140] sm:$0xff] %v4019_v44  ;;  %v3317_v39 = vmul.f32 %v7789_v36, %v1795_v26  ;;  %v2363_v30 = vmul.f32 %v7776_v21, %v2362_v13  ;;  %vm2366_vm9 = vweird.f32 %v7776_v21  ;;  %v2551_v48 = vadd.f32 %v2519_v37, %v1664_v24  ;;  %v8782_v37 = vld [vmem:[#allocation71_spill] sm:$0xff] }
 0x335   : > { %v4983_v49 = vpop.eup %4982  ;;  %vm7810_vm10 = vcmp.eq.f32.partialorder %v2369_v18, 8.507059e+37  ;;  %v2372_v53 = vor.u32 1.1754944e-38, %v2371_v1  ;;  %vm3037_vm11 = vweird.f32 %v7771_v54  ;;  %v1449_v14 = vadd.f32 %v1448_v56, %v8774_v43  ;;  %vm7831_vm3 = vmor %vm2365_vm8, %vm2366_vm9 }
 0x336   : > { %v3349_v12 = vadd.f32 %v3317_v39, %v7729_v22  ;;  %v3033_v57 = vmul.f32 %v4983_v49, %v7771_v54  ;;  %v2364_v10 = vadd.f32 %v7776_v21, %v2363_v30  ;;  %v3041_v20 = vand.u32 2147483647, %v7771_v54  ;;  %v8777_v22 = vld [vmem:[#allocation70_spill] sm:$0xff] }
 0x337   : > { %v3811_v47 = vand.u32 2147483647, %v7787_v8  ;;  %v3043_v62 = vand.u32 2147483648, %v7771_v54  ;;  %v4599_v17 = vmul.f32 -1.442695, %v2551_v48  ;;  %v1273_v9 = vadd.f32 %v1272_v35, %v8777_v22 }
 0x338   : > { %v4985_v50 = vpop.eup %4984  ;;  %v4629_v59 = vmul.f32 -1.442695, %v3349_v12  ;;  %v3034_v32 = vsub.f32 1.0, %v3033_v57  ;;  %v2368_v52 = vsel %vm7831_vm3, %v7776_v21, %v2364_v10  ;;  %v1848_v25 = vmul.f32 %v1802_v0, %v7817_v58  ;;  %v8783_v12 = vld [vmem:[#allocation72_spill] sm:$0xff] }
 0x339   : > { %v4987_v27 = vpop.eup %4986  ;;  %v3813_v2 = vand.u32 2147483648, %v7787_v8  ;;  %v7842_v45 = vadd.f32 1.0, %v4985_v50  ;;  %4988 = vpow2.f32 %v4599_v17  ;;  %v1667_v29 = vadd.f32 %v5723_v16, %v1273_v9  ;;  %v8784_v50 = vld [vmem:[#allocation69_spill] sm:$0xff]  ;;  %v7923_v21 = vld [vmem:[%s5705_s13 + $0xd0] sm:$0xff] }
 0x33a   : > { %v3803_v41 = vmul.f32 %v4987_v27, %v7787_v8  ;;  %4990 = vpow2.f32 %v4629_v59  ;;  %v3035_v60 = vmul.f32 %v4983_v49, %v3034_v32  ;;  %vm3038_vm12 = vweird.f32 %v4983_v49 }
 0x33b   : > { %v2373_v46 = vsel %vm7810_vm10, %v2372_v53, %v2368_v52  ;;  %vm7848_vm13 = vcmp.eq.f32.partialorder %v3041_v20, 8.507059e+37  ;;  %v3044_v3 = vor.u32 1.1754944e-38, %v3043_v62  ;;  %4992 = vrcp.f32 %v7842_v45  ;;  %vm3039_vm1 = vmor %vm3037_vm11, %vm3038_vm12 }
 0x33c   : > { %v3804_v18 = vsub.f32 1.0, %v3803_v41  ;;  %vm3807_vm14 = vweird.f32 %v7787_v8  ;;  %v3036_v4 = vadd.f32 %v4983_v49, %v3035_v60  ;;  %v1880_v38 = vadd.f32 %v1848_v25, %v1667_v29 }
 0x33d   : > { %vm3808_vm15 = vweird.f32 %v4987_v27  ;;  %vm7857_vm0 = vcmp.eq.f32.partialorder %v3811_v47, 8.507059e+37  ;;  %v3814_v24 = vor.u32 1.1754944e-38, %v3813_v2  ;;  %v1362_v23 = vadd.f32 %v1361_v5, %v8782_v37 }
 0x33e   : > { %v3805_v26 = vmul.f32 %v4987_v27, %v3804_v18  ;;  %v3040_v1 = vsel %vm3039_vm1, %v4983_v49, %v3036_v4  ;;  %v3222_v44 = vmul.f32 %v3190_v19, %v2373_v46  ;;  %v4568_v13 = vmul.f32 -1.442695, %v1880_v38  ;;  %vm3809_vm2 = vmor %vm3807_vm14, %vm3808_vm15  ;;  %v8787_v4 = vld [vmem:[#allocation73_spill] sm:$0xff] }
 0x33f   : > { %v4989_v56 = vpop.eup %4988  ;;  %v3045_v39 = vsel %vm7848_vm13, %v3044_v3, %v3040_v1  ;;  %v7868_v30 = vadd.f32 %v5754_v28, %v1449_v14  ;;  %v1668_v48 = vadd.f32 %v5725_v42, %v1362_v23  ;;  %v2520_v35 = vmul.f32 %v1803_v34, %v7817_v58  ;;  %v1798_v14 = vld [vmem:[%s8481_s3 + $0x238] sm:$0xff]  ;;  %v1805_v3 = vld [vmem:[%s8481_s3 + $0x270] sm:$0xff]  ;;  %v8788_v34 = vld [vmem:[#allocation74_spill] sm:$0xff] }
 0x340   : > { %v4991_v54 = vpop.eup %4990  ;;  %v3806_v33 = vadd.f32 %v4987_v27, %v3805_v26  ;;  %v3254_v53 = vmul.f32 %v3045_v39, %v7643_v40  ;;  %v7873_v43 = vadd.f32 1.0, %v4989_v56  ;;  %4994 = vpow2.f32 %v4568_v13  ;;  %v1364_v56 = vpop.f32.mrf.mxu1  ;;  %v1808_v13 = vld [vmem:[%s8481_s3 + $0x288] sm:$0xff] }
 0x341   : > { %v7875_v19 = vpop.eup %4992  ;;  %v7880_v49 = vadd.f32 1.0, %v4991_v54  ;;  %v2384_v0 = vand.u32 2147483647, %v7842_v45  ;;  %v2386_v40 = vand.u32 2147483648, %v7842_v45  ;;  %v1451_v57 = vadd.f32 %v1450_v63, %v8783_v12 }
 0x342   : > { %v3810_v10 = vsel %vm3809_vm2, %v4987_v27, %v3806_v33  ;;  %v7888_v20 = vadd.f32 %v3254_v53, %v3222_v44  ;;  %4996 = vrcp.f32 %v7873_v43  ;;  %v2376_v8 = vmul.f32 %v7875_v19, %v7842_v45  ;;  %v1806_v53 = vld [vmem:[%s8481_s3 + $0x278] sm:$0xff] }
 0x343   : > { %v3815_v47 = vsel %vm7857_vm0, %v3814_v24, %v3810_v10  ;;  %4998 = vrcp.f32 %v7880_v49  ;;  %v1662_v51 = vadd.f32 %v5773_v31, %v7798_v15  ;;  %v2552_v62 = vadd.f32 %v2520_v35, %v1668_v48  ;;  %v1539_v15 = vpop.f32.mrf.mxu3  ;;  %v8014_v44 = vld [vmem:[%s5705_s13 + $0xd8] sm:$0xff] }
 0x344   : > { %v4020_v17 = vmul.f32 %v3988_v7, %v3815_v47  ;;  %v3989_v22 = vmax.f32 %v7789_v36, 0.0  ;;  %4086 = vst [vmem:[%s5887_s18 + $0x178] sm:$0xff] %v7888_v20  ;;  %v3318_v9 = vmul.f32 %v7888_v20, %v1798_v14  ;;  %v7905_v59 = vadd.f32 %v1537_v11, %v8784_v50  ;;  %v1275_v7 = vpop.f32.mrf.mxu0 }
 0x345   : > { %v2377_v32 = vsub.f32 1.0, %v2376_v8  ;;  %vm2380_vm4 = vweird.f32 %v7842_v45  ;;  %vm7908_vm5 = vcmp.eq.f32.partialorder %v2384_v0, 8.507059e+37  ;;  %v3191_v6 = vmax.f32 %v7868_v30, 0.0 }
 0x346   : > { %v4995_v25 = vpop.eup %4994  ;;  %4052 = vst [vmem:[%s5887_s18 + $0x150] sm:$0xff] %v4020_v17  ;;  %v3826_v27 = vand.u32 2147483647, %v7880_v49  ;;  %v3350_v2 = vadd.f32 %v3318_v9, %v1662_v51  ;;  %v2387_v29 = vor.u32 1.1754944e-38, %v2386_v40  ;;  %v7916_v41 = vadd.f32 %v5754_v28, %v1451_v57  ;;  %v8793_v40 = vld [vmem:[#allocation75_spill] sm:$0xff]  ;;  %v1809_v51 = vld [vmem:[%s8481_s3 + $0x290] sm:$0xff] }
 0x347   : > { %v2378_v60 = vmul.f32 %v7875_v19, %v2377_v32  ;;  %vm2381_vm6 = vweird.f32 %v7875_v19  ;;  %v7920_v5 = vadd.f32 1.0, %v4995_v25  ;;  %v4600_v46 = vmul.f32 -1.442695, %v2552_v62 }
 0x348   : > { %v4997_v11 = vpop.eup %4996  ;;  %vm3822_vm7 = vweird.f32 %v7880_v49  ;;  %v4630_v18 = vmul.f32 -1.442695, %v3350_v2  ;;  %v7930_v38 = vadd.f32 %v1539_v15, %v8787_v4  ;;  %v1276_v55 = vadd.f32 %v1275_v7, %v8788_v34  ;;  %vm7946_vm9 = vmor %vm2380_vm4, %vm2381_vm6  ;;  %v8796_v34 = vld [vmem:[#allocation76_spill] sm:$0xff] }
 0x349   : > { %v4999_v24 = vpop.eup %4998  ;;  %v3828_v37 = vand.u32 2147483648, %v7880_v49  ;;  %v3048_v23 = vmul.f32 %v4997_v11, %v7873_v43  ;;  %v2379_v26 = vadd.f32 %v7875_v19, %v2378_v60  ;;  %5000 = vrcp.f32 %v7920_v5 }
 0x34a   : > { %v3818_v1 = vmul.f32 %v4999_v24, %v7880_v49  ;;  %vm7938_vm8 = vcmp.eq.f32.partialorder %v3826_v27, 8.507059e+37  ;;  %5002 = vpow2.f32 %v4630_v18  ;;  %v1849_v63 = vmul.f32 %v1805_v3, %v7923_v21 }
 0x34b   : > { %v3049_v39 = vsub.f32 1.0, %v3048_v23  ;;  %v2383_v48 = vsel %vm7946_vm9, %v7875_v19, %v2379_v26  ;;  %v3056_v35 = vand.u32 2147483647, %v7873_v43  ;;  %5004 = vpow2.f32 %v4600_v46  ;;  %v1801_v23 = vld [vmem:[%s8481_s3 + $0x250] sm:$0xff] }
 0x34c   : > { %v3819_v54 = vsub.f32 1.0, %v3818_v1  ;;  %vm3052_vm10 = vweird.f32 %v7873_v43  ;;  %v3058_v45 = vand.u32 2147483648, %v7873_v43  ;;  %v1671_v33 = vadd.f32 %v5723_v16, %v1276_v55  ;;  %v1453_v43 = vpop.f32.mrf.mxu2 }
 0x34d   : > { %v3829_v14 = vor.u32 1.1754944e-38, %v3828_v37  ;;  %v3050_v0 = vmul.f32 %v4997_v11, %v3049_v39  ;;  %vm3053_vm11 = vweird.f32 %v4997_v11  ;;  %v1365_v12 = vadd.f32 %v1364_v56, %v8793_v40  ;;  %v8799_v39 = vld [vmem:[#allocation77_spill] sm:$0xff]  ;;  %v1366_v40 = vpop.f32.mrf.mxu1 }
 0x34e   : > { %v3820_v19 = vmul.f32 %v4999_v24, %v3819_v54  ;;  %vm3823_vm3 = vweird.f32 %v4999_v24  ;;  %v2388_v57 = vsel %vm7908_vm5, %v2387_v29, %v2383_v48  ;;  %v1881_v10 = vadd.f32 %v1849_v63, %v1671_v33  ;;  %vm3054_vm13 = vmor %vm3052_vm10, %vm3053_vm11 }
 0x34f   : > { %v7964_v8 = vpop.eup %5000  ;;  %v3051_v47 = vadd.f32 %v4997_v11, %v3050_v0  ;;  %vm7966_vm12 = vcmp.eq.f32.partialorder %v3056_v35, 8.507059e+37  ;;  %v1672_v62 = vadd.f32 %v5725_v42, %v1365_v12  ;;  %v2521_v17 = vmul.f32 %v1806_v53, %v7923_v21  ;;  %vm3824_vm14 = vmor %vm3822_vm7, %vm3823_vm3  ;;  %v8800_v53 = vld [vmem:[#allocation78_spill] sm:$0xff] }
 0x350   : > { %v5003_v9 = vpop.eup %5002  ;;  %v3821_v50 = vadd.f32 %v4999_v24, %v3820_v19  ;;  %v3059_v32 = vor.u32 1.1754944e-38, %v3058_v45  ;;  %v2391_v52 = vmul.f32 %v7964_v8, %v7920_v5  ;;  %v2399_v15 = vand.u32 2147483647, %v7920_v5 }
 0x351   : > { %v5005_v7 = vpop.eup %5004  ;;  %v7980_v25 = vadd.f32 1.0, %v5003_v9  ;;  %v3055_v27 = vsel %vm3054_vm13, %v4997_v11, %v3051_v47  ;;  %v3223_v2 = vmul.f32 %v3191_v6, %v2388_v57  ;;  %v4569_v29 = vmul.f32 -1.442695, %v1881_v10 }
 0x352   : > { %v3825_v60 = vsel %vm3824_vm14, %v4999_v24, %v3821_v50  ;;  %v3060_v46 = vsel %vm7966_vm12, %v3059_v32, %v3055_v27  ;;  %v7986_v3 = vadd.f32 1.0, %v5005_v7  ;;  %v2392_v18 = vsub.f32 1.0, %v2391_v52  ;;  %v1542_v24 = vpop.f32.mrf.mxu3 }
 0x353   : > { %v3830_v49 = vsel %vm7938_vm8, %v3829_v14, %v3825_v60  ;;  %5006 = vrcp.f32 %v7980_v25  ;;  %v2401_v11 = vand.u32 2147483648, %v7920_v5  ;;  %v2553_v4 = vadd.f32 %v2521_v17, %v1672_v62 }
 0x354   : > { %v4021_v30 = vmul.f32 %v3989_v22, %v3830_v49  ;;  %v3255_v6 = vmul.f32 %v3060_v46, %v7742_v61  ;;  %5008 = vrcp.f32 %v7986_v3  ;;  %v1454_v55 = vadd.f32 %v1453_v43, %v8796_v34 }
 0x355   : > { %v1666_v37 = vadd.f32 %v5773_v31, %v7905_v59  ;;  %v2393_v26 = vmul.f32 %v7964_v8, %v2392_v18  ;;  %v3192_v36 = vmax.f32 %v7916_v41, 0.0  ;;  %v8006_v61 = vadd.f32 %v5773_v31, %v7930_v38  ;;  %v1277_v59 = vpop.f32.mrf.mxu0 }
 0x356   : > { %4053 = vst [vmem:[%s5887_s18 + $0x160] sm:$0xff] %v4021_v30  ;;  %v3990_v22 = vmax.f32 %v7888_v20, 0.0  ;;  %v8010_v1 = vadd.f32 %v3255_v6, %v3223_v2  ;;  %vm2395_vm15 = vweird.f32 %v7920_v5  ;;  %5010 = vpow2.f32 %v4569_v29  ;;  %v8803_v2 = vld [vmem:[#allocation79_spill] sm:$0xff] }
 0x357   : > { %vm8019_vm0 = vcmp.eq.f32.partialorder %v2399_v15, 8.507059e+37  ;;  %v2402_v38 = vor.u32 1.1754944e-38, %v2401_v11  ;;  %v4601_v56 = vmul.f32 -1.442695, %v2553_v4  ;;  %v8024_v48 = vadd.f32 %v1542_v24, %v8799_v39 }
 0x358   : > { %4087 = vst [vmem:[%s5887_s18 + $0x188] sm:$0xff] %v8010_v1  ;;  %v3319_v35 = vmul.f32 %v8010_v1, %v1801_v23  ;;  %v2394_v54 = vadd.f32 %v7964_v8, %v2393_v26  ;;  %vm2396_vm1 = vweird.f32 %v7964_v8  ;;  %v8032_v45 = vadd.f32 %v5754_v28, %v1454_v55 }
 0x359   : > { %v5007_v33 = vpop.eup %5006  ;;  %vm3837_vm2 = vweird.f32 %v7980_v25  ;;  %5012 = vpow2.f32 %v4601_v56  ;;  %v1278_v14 = vadd.f32 %v1277_v59, %v8800_v53  ;;  %v1850_v0 = vmul.f32 %v1808_v13, %v8014_v44  ;;  %vm8048_vm4 = vmor %vm2395_vm15, %vm2396_vm1  ;;  %v1455_v13 = vpop.f32.mrf.mxu2 }
 0x35a   : > { %v5009_v12 = vpop.eup %5008  ;;  %v3833_v19 = vmul.f32 %v5007_v33, %v7980_v25  ;;  %v3841_v57 = vand.u32 2147483647, %v7980_v25  ;;  %v3843_v10 = vand.u32 2147483648, %v7980_v25  ;;  %v3351_v47 = vadd.f32 %v3319_v35, %v1666_v37 }
 0x35b   : > { %v3063_v62 = vmul.f32 %v5009_v12, %v7986_v3  ;;  %v3071_v9 = vand.u32 2147483647, %v7986_v3  ;;  %v3073_v50 = vand.u32 2147483648, %v7986_v3  ;;  %v1675_v32 = vadd.f32 %v5723_v16, %v1278_v14 }
 0x35c   : > { %v5011_v52 = vpop.eup %5010  ;;  %v3834_v15 = vsub.f32 1.0, %v3833_v19  ;;  %v4631_v7 = vmul.f32 -1.442695, %v3351_v47  ;;  %v2398_v27 = vsel %vm8048_vm4, %v7964_v8, %v2394_v54  ;;  %v1367_v29 = vadd.f32 %v1366_v40, %v8803_v2  ;;  %v8807_v47 = vld [vmem:[#allocation81_spill] sm:$0xff] }
 0x35d   : > { %v3064_v5 = vsub.f32 1.0, %v3063_v62  ;;  %v8059_v43 = vadd.f32 1.0, %v5011_v52  ;;  %v1882_v60 = vadd.f32 %v1850_v0, %v1675_v32  ;;  %v2522_v46 = vmul.f32 %v1809_v51, %v8014_v44  ;;  %v8810_v52 = vld [vmem:[#allocation82_spill] sm:$0xff] }
 0x35e   : > { %v3835_v18 = vmul.f32 %v5007_v33, %v3834_v15  ;;  %vm3838_vm5 = vweird.f32 %v5007_v33  ;;  %5014 = vpow2.f32 %v4631_v7  ;;  %v1676_v49 = vadd.f32 %v5725_v42, %v1367_v29 }
 0x35f   : > { %v5013_v11 = vpop.eup %5012  ;;  %vm8063_vm6 = vcmp.eq.f32.partialorder %v3841_v57, 8.507059e+37  ;;  %v3065_v30 = vmul.f32 %v5009_v12, %v3064_v5  ;;  %vm3068_vm7 = vweird.f32 %v5009_v12  ;;  %5016 = vrcp.f32 %v8059_v43  ;;  %vm3839_vm8 = vmor %vm3837_vm2, %vm3838_vm5 }
 0x360   : > { %v3836_v8 = vadd.f32 %v5007_v33, %v3835_v18  ;;  %v2403_v6 = vsel %vm8019_vm0, %v2402_v38, %v2398_v27  ;;  %v8070_v34 = vadd.f32 1.0, %v5013_v11  ;;  %v4570_v55 = vmul.f32 -1.442695, %v1882_v60  ;;  %v8128_v18 = vld [vmem:[%s5705_s13 + $0xe0] sm:$0xff] }
 0x361   : > { %v3844_v24 = vor.u32 1.1754944e-38, %v3843_v10  ;;  %v3066_v37 = vadd.f32 %v5009_v12, %v3065_v30  ;;  %vm3067_vm9 = vweird.f32 %v7986_v3  ;;  %v2554_v23 = vadd.f32 %v2522_v46, %v1676_v49  ;;  %v1811_v49 = vld [vmem:[%s8481_s3 + $0x2a0] sm:$0xff] }
 0x362   : > { %v3840_v26 = vsel %vm3839_vm8, %v5007_v33, %v3836_v8  ;;  %vm3069_vm10 = vmor %vm3067_vm9, %vm3068_vm7  ;;  %vm3072_vm11 = vcmp.eq.f32.partialorder %v3071_v9, 8.507059e+37  ;;  %v3074_v59 = vor.u32 1.1754944e-38, %v3073_v50  ;;  %5018 = vrcp.f32 %v8070_v34  ;;  %v1544_v33 = vpop.f32.mrf.mxu3 }
 0x363   : > { %v3845_v63 = vsel %vm8063_vm6, %v3844_v24, %v3840_v26  ;;  %v3070_v38 = vsel %vm3069_vm10, %v5009_v12, %v3066_v37  ;;  %v3224_v25 = vmul.f32 %v3192_v36, %v2403_v6  ;;  %v2414_v56 = vand.u32 2147483647, %v8059_v43  ;;  %v8806_v12 = vld [vmem:[#allocation80_spill] sm:$0xff]  ;;  %v1369_v6 = vpop.f32.mrf.mxu1 }
 0x364   : > { %v5015_v39 = vpop.eup %5014  ;;  %v4022_v3 = vmul.f32 %v3990_v22, %v3845_v63  ;;  %v3075_v35 = vsel %vm3072_vm11, %v3074_v59, %v3070_v38  ;;  %5020 = vpow2.f32 %v4570_v55  ;;  %v4602_v54 = vmul.f32 -1.442695, %v2554_v23  ;;  %v1280_v22 = vpop.f32.mrf.mxu0 }
 0x365   : > { %v5017_v53 = vpop.eup %5016  ;;  %v8083_v14 = vadd.f32 1.0, %v5015_v39  ;;  %v3256_v0 = vmul.f32 %v3075_v35, %v7817_v58  ;;  %v2416_v40 = vand.u32 2147483648, %v8059_v43  ;;  %v1456_v41 = vadd.f32 %v1455_v13, %v8806_v12  ;;  %v1804_v58 = vld [vmem:[%s8481_s3 + $0x268] sm:$0xff] }
 0x366   : > { %4054 = vst [vmem:[%s5887_s18 + $0x170] sm:$0xff] %v4022_v3  ;;  %v3991_v36 = vmax.f32 %v8010_v1, 0.0  ;;  %v2406_v19 = vmul.f32 %v5017_v53, %v8059_v43  ;;  %v3193_v20 = vmax.f32 %v8032_v45, 0.0  ;;  %5022 = vpow2.f32 %v4602_v54 }
 0x367   : > { %5024 = vrcp.f32 %v8083_v14  ;;  %v3086_v57 = vand.u32 2147483647, %v8070_v34  ;;  %v8099_v10 = vadd.f32 %v5773_v31, %v8024_v48  ;;  %v8102_v51 = vadd.f32 %v1544_v33, %v8807_v47  ;;  %v1807_v47 = vld [vmem:[%s8481_s3 + $0x280] sm:$0xff] }
 0x368   : > { %v5019_v62 = vpop.eup %5018  ;;  %v8104_v45 = vadd.f32 %v3256_v0, %v3224_v25  ;;  %v2407_v17 = vsub.f32 1.0, %v2406_v19  ;;  %vm2410_vm3 = vweird.f32 %v8059_v43  ;;  %vm8107_vm12 = vcmp.eq.f32.partialorder %v2414_v56, 8.507059e+37  ;;  %v8813_v43 = vld [vmem:[#allocation83_spill] sm:$0xff] }
 0x369   : > { %v3078_v50 = vmul.f32 %v5019_v62, %v8070_v34  ;;  %v2417_v32 = vor.u32 1.1754944e-38, %v2416_v40  ;;  %v8113_v48 = vadd.f32 %v5754_v28, %v1456_v41  ;;  %v1281_v15 = vadd.f32 %v1280_v22, %v8810_v52  ;;  %v1812_v56 = vld [vmem:[%s8481_s3 + $0x2a8] sm:$0xff] }
 0x36a   : > { %v5021_v7 = vpop.eup %5020  ;;  %4088 = vst [vmem:[%s5887_s18 + $0x198] sm:$0xff] %v8104_v45  ;;  %v3320_v27 = vmul.f32 %v8104_v45, %v1804_v58  ;;  %v2408_v2 = vmul.f32 %v5017_v53, %v2407_v17  ;;  %vm2411_vm13 = vweird.f32 %v5017_v53  ;;  %vm3082_vm14 = vweird.f32 %v8070_v34 }
 0x36b   : > { %v3079_v29 = vsub.f32 1.0, %v3078_v50  ;;  %vm8120_vm15 = vcmp.eq.f32.partialorder %v3086_v57, 8.507059e+37  ;;  %v3088_v60 = vand.u32 2147483648, %v8070_v34  ;;  %v8125_v46 = vadd.f32 1.0, %v5021_v7  ;;  %vm2412_vm1 = vmor %vm2410_vm3, %vm2411_vm13 }
 0x36c   : > { %v5023_v11 = vpop.eup %5022  ;;  %v3856_v4 = vand.u32 2147483647, %v8083_v14  ;;  %v3352_v30 = vadd.f32 %v3320_v27, %v8006_v61  ;;  %v2409_v8 = vadd.f32 %v5017_v53, %v2408_v2  ;;  %vm3083_vm0 = vweird.f32 %v5019_v62  ;;  %v1282_v1 = vpop.f32.mrf.mxu0 }
 0x36d   : > { %v5025_v55 = vpop.eup %5024  ;;  %v3080_v24 = vmul.f32 %v5019_v62, %v3079_v29  ;;  %5026 = vrcp.f32 %v8125_v46  ;;  %v8139_v37 = vadd.f32 1.0, %v5023_v11  ;;  %v1679_v23 = vadd.f32 %v5723_v16, %v1281_v15  ;;  %vm3084_vm2 = vmor %vm3082_vm14, %vm3083_vm0 }
 0x36e   : > { %v3848_v26 = vmul.f32 %v5025_v55, %v8083_v14  ;;  %v4632_v59 = vmul.f32 -1.442695, %v3352_v30  ;;  %v2413_v13 = vsel %vm2412_vm1, %v5017_v53, %v2409_v8  ;;  %v1851_v61 = vmul.f32 %v1811_v49, %v8128_v18 }
 0x36f   : > { %v2418_v63 = vsel %vm8107_vm12, %v2417_v32, %v2413_v13  ;;  %v3081_v38 = vadd.f32 %v5019_v62, %v3080_v24  ;;  %5028 = vrcp.f32 %v8139_v37  ;;  %v1370_v25 = vadd.f32 %v1369_v6, %v8813_v43  ;;  %v8198_v13 = vld [vmem:[%s5705_s13 + $0xe8] sm:$0xff]  ;;  %v1371_v43 = vpop.f32.mrf.mxu1 }
 0x370   : > { %v3849_v39 = vsub.f32 1.0, %v3848_v26  ;;  %v3858_v3 = vand.u32 2147483648, %v8083_v14  ;;  %5030 = vpow2.f32 %v4632_v59  ;;  %v3089_v35 = vor.u32 1.1754944e-38, %v3088_v60  ;;  %v8816_v26 = vld [vmem:[#allocation84_spill] sm:$0xff] }
 0x371   : > { %vm3852_vm4 = vweird.f32 %v8083_v14  ;;  %v3085_v54 = vsel %vm3084_vm2, %v5019_v62, %v3081_v38  ;;  %v3225_v33 = vmul.f32 %v3193_v20, %v2418_v63  ;;  %v3194_v53 = vmax.f32 %v8113_v48, 0.0 }
 0x372   : > { %v3850_v0 = vmul.f32 %v5025_v55, %v3849_v39  ;;  %vm3853_vm5 = vweird.f32 %v5025_v55  ;;  %v3090_v40 = vsel %vm8120_vm15, %v3089_v35, %v3085_v54  ;;  %v2523_v12 = vmul.f32 %v1812_v56, %v8128_v18  ;;  %v8817_v56 = vld [vmem:[#allocation86_spill] sm:$0xff] }
 0x373   : > { %v5027_v41 = vpop.eup %5026  ;;  %vm8160_vm6 = vcmp.eq.f32.partialorder %v3856_v4, 8.507059e+37  ;;  %v3257_v34 = vmul.f32 %v3090_v40, %v7923_v21  ;;  %v1883_v22 = vadd.f32 %v1851_v61, %v1679_v23  ;;  %v1680_v58 = vadd.f32 %v5725_v42, %v1370_v25  ;;  %vm3854_vm8 = vmor %vm3852_vm4, %vm3853_vm5  ;;  %v1458_v4 = vpop.f32.mrf.mxu2 }
 0x374   : > { %v3851_v20 = vadd.f32 %v5025_v55, %v3850_v0  ;;  %v3859_v57 = vor.u32 1.1754944e-38, %v3858_v3  ;;  %v2421_v62 = vmul.f32 %v5027_v41, %v8125_v46  ;;  %vm2425_vm7 = vweird.f32 %v8125_v46 }
 0x375   : > { %v5029_v17 = vpop.eup %5028  ;;  %v8173_v9 = vadd.f32 %v3257_v34, %v3225_v33  ;;  %v2429_v21 = vand.u32 2147483647, %v8125_v46  ;;  %v2431_v50 = vand.u32 2147483648, %v8125_v46  ;;  %v4571_v32 = vmul.f32 -1.442695, %v1883_v22 }
 0x376   : > { %v5031_v52 = vpop.eup %5030  ;;  %v3855_v15 = vsel %vm3854_vm8, %v5025_v55, %v3851_v20  ;;  %v3093_v7 = vmul.f32 %v5029_v17, %v8139_v37  ;;  %v2422_v27 = vsub.f32 1.0, %v2421_v62  ;;  %v2555_v2 = vadd.f32 %v2523_v12, %v1680_v58  ;;  %v1815_v58 = vld [vmem:[%s8481_s3 + $0x2c0] sm:$0xff]  ;;  %v1810_v20 = vld [vmem:[%s8481_s3 + $0x298] sm:$0xff] }
 0x377   : > { %v3860_v29 = vsel %vm8160_vm6, %v3859_v57, %v3855_v15  ;;  %v8180_v5 = vadd.f32 1.0, %v5031_v52  ;;  %4089 = vst [vmem:[%s5887_s18 + $0x1a8] sm:$0xff] %v8173_v9  ;;  %v3321_v14 = vmul.f32 %v8173_v9, %v1807_v47  ;;  %vm2426_vm9 = vweird.f32 %v5027_v41 }
 0x378   : > { %v4023_v60 = vmul.f32 %v3991_v36, %v3860_v29  ;;  %v3094_v49 = vsub.f32 1.0, %v3093_v7  ;;  %v2423_v11 = vmul.f32 %v5027_v41, %v2422_v27  ;;  %5032 = vpow2.f32 %v4571_v32  ;;  %vm2427_vm11 = vmor %vm2425_vm7, %vm2426_vm9 }
 0x379   : > { %5034 = vrcp.f32 %v8180_v5  ;;  %vm3098_vm10 = vweird.f32 %v5029_v17  ;;  %v3101_v30 = vand.u32 2147483647, %v8139_v37  ;;  %v3103_v8 = vand.u32 2147483648, %v8139_v37 }
 0x37a   : > { %4055 = vst [vmem:[%s5887_s18 + $0x180] sm:$0xff] %v4023_v60  ;;  %v3353_v6 = vadd.f32 %v3321_v14, %v8099_v10  ;;  %v2424_v55 = vadd.f32 %v5027_v41, %v2423_v11  ;;  %v3095_v24 = vmul.f32 %v5029_v17, %v3094_v49  ;;  %v4603_v23 = vmul.f32 -1.442695, %v2555_v2  ;;  %v1814_v10 = vld [vmem:[%s8481_s3 + $0x2b8] sm:$0xff]  ;;  %v1547_v11 = vpop.f32.mrf.mxu3 }
 0x37b   : > { %vm2430_vm3 = vcmp.eq.f32.partialorder %v2429_v21, 8.507059e+37  ;;  %v2432_v36 = vor.u32 1.1754944e-38, %v2431_v50  ;;  %vm3097_vm12 = vweird.f32 %v8139_v37  ;;  %v1459_v59 = vadd.f32 %v1458_v4, %v8816_v26  ;;  %v8819_v26 = vld [vmem:[#allocation85_spill] sm:$0xff] }
 0x37c   : > { %v4633_v61 = vmul.f32 -1.442695, %v3353_v6  ;;  %v2428_v63 = vsel %vm2427_vm11, %v5027_v41, %v2424_v55  ;;  %v3096_v38 = vadd.f32 %v5029_v17, %v3095_v24  ;;  %5036 = vpow2.f32 %v4603_v23  ;;  %vm3099_vm13 = vmor %vm3097_vm12, %vm3098_vm10  ;;  %v8818_v41 = vld [vmem:[#allocation87_spill] sm:$0xff]  ;;  %v1460_v23 = vpop.f32.mrf.mxu2 }
 0x37d   : > { %v2433_v25 = vsel %vm2430_vm3, %v2432_v36, %v2428_v63  ;;  %vm3102_vm14 = vcmp.eq.f32.partialorder %v3101_v30, 8.507059e+37  ;;  %v3104_v46 = vor.u32 1.1754944e-38, %v3103_v8  ;;  %v1283_v37 = vadd.f32 %v1282_v1, %v8817_v56  ;;  %v8822_v56 = vld [vmem:[#allocation88_spill] sm:$0xff] }
 0x37e   : > { %v5033_v39 = vpop.eup %5032  ;;  %5038 = vpow2.f32 %v4633_v61  ;;  %v3100_v3 = vsel %vm3099_vm13, %v5029_v17, %v3096_v38  ;;  %v3226_v35 = vmul.f32 %v3194_v53, %v2433_v25  ;;  %v1852_v54 = vmul.f32 %v1814_v10, %v8198_v13  ;;  %v1285_v10 = vpop.f32.mrf.mxu0 }
 0x37f   : > { %v5035_v33 = vpop.eup %5034  ;;  %v3105_v0 = vsel %vm3102_vm14, %v3104_v46, %v3100_v3  ;;  %v8208_v40 = vadd.f32 1.0, %v5033_v39  ;;  %v1683_v12 = vadd.f32 %v5723_v16, %v1283_v37  ;;  %v1372_v19 = vadd.f32 %v1371_v43, %v8818_v41  ;;  %v8261_v39 = vld [vmem:[%s5705_s13 + $0xf0] sm:$0xff] }
 0x380   : > { %v3863_v34 = vmul.f32 %v5035_v33, %v8180_v5  ;;  %v3258_v22 = vmul.f32 %v3105_v0, %v8014_v44  ;;  %v3992_v48 = vmax.f32 %v8104_v45, 0.0  ;;  %v1678_v53 = vadd.f32 %v5773_v31, %v8102_v51  ;;  %v1817_v3 = vld [vmem:[%s8481_s3 + $0x2d0] sm:$0xff]  ;;  %v8823_v0 = vld [vmem:[#allocation90_spill] sm:$0xff] }
 0x381   : > { %5040 = vrcp.f32 %v8208_v40  ;;  %v8225_v57 = vadd.f32 %v5754_v28, %v1459_v59  ;;  %v3871_v62 = vand.u32 2147483647, %v8180_v5  ;;  %v1884_v45 = vadd.f32 %v1852_v54, %v1683_v12 }
 0x382   : > { %v5037_v44 = vpop.eup %5036  ;;  %v3864_v47 = vsub.f32 1.0, %v3863_v34  ;;  %v8228_v17 = vadd.f32 %v3258_v22, %v3226_v35  ;;  %v3873_v21 = vand.u32 2147483648, %v8180_v5  ;;  %v1684_v50 = vadd.f32 %v5725_v42, %v1372_v19 }
 0x383   : > { %v8231_v51 = vadd.f32 1.0, %v5037_v44  ;;  %v2524_v32 = vmul.f32 %v1815_v58, %v8198_v13  ;;  %vm3868_vm15 = vweird.f32 %v5035_v33  ;;  %v4572_v27 = vmul.f32 -1.442695, %v1884_v45 }
 0x384   : > { %v5039_v52 = vpop.eup %5038  ;;  %v3865_v15 = vmul.f32 %v5035_v33, %v3864_v47  ;;  %4090 = vst [vmem:[%s5887_s18 + $0x1b8] sm:$0xff] %v8228_v17  ;;  %v3322_v7 = vmul.f32 %v8228_v17, %v1810_v20  ;;  %vm3867_vm0 = vweird.f32 %v8180_v5  ;;  %v3993_v2 = vmax.f32 %v8173_v9, 0.0 }
 0x385   : > { %v8240_v29 = vadd.f32 1.0, %v5039_v52  ;;  %5042 = vrcp.f32 %v8231_v51  ;;  %v2444_v49 = vand.u32 2147483647, %v8208_v40  ;;  %vm3869_vm1 = vmor %vm3867_vm0, %vm3868_vm15  ;;  %v3874_v30 = vor.u32 1.1754944e-38, %v3873_v21 }
 0x386   : > { %v3866_v14 = vadd.f32 %v5035_v33, %v3865_v15  ;;  %v3354_v60 = vadd.f32 %v3322_v7, %v1678_v53  ;;  %5044 = vpow2.f32 %v4572_v27  ;;  %v2446_v8 = vand.u32 2147483648, %v8208_v40 }
 0x387   : > { %v5041_v4 = vpop.eup %5040  ;;  %5046 = vrcp.f32 %v8240_v29  ;;  %v2556_v5 = vadd.f32 %v2524_v32, %v1684_v50  ;;  %vm3872_vm2 = vcmp.eq.f32.partialorder %v3871_v62, 8.507059e+37  ;;  %vm2440_vm4 = vweird.f32 %v8208_v40  ;;  %v8348_v32 = vld [vmem:[%s5705_s13 + $0xf8] sm:$0xff] }
 0x388   : > { %v3870_v6 = vsel %vm3869_vm1, %v5035_v33, %v3866_v14  ;;  %v4634_v55 = vmul.f32 -1.442695, %v3354_v60  ;;  %v2436_v24 = vmul.f32 %v5041_v4, %v8208_v40  ;;  %v3195_v36 = vmax.f32 %v8225_v57, 0.0  ;;  %v1374_v14 = vpop.f32.mrf.mxu1 }
 0x389   : > { %v3875_v1 = vsel %vm3872_vm2, %v3874_v30, %v3870_v6  ;;  %v8250_v59 = vadd.f32 %v1547_v11, %v8819_v26  ;;  %vm8252_vm5 = vcmp.eq.f32.partialorder %v2444_v49, 8.507059e+37  ;;  %v2447_v25 = vor.u32 1.1754944e-38, %v2446_v8 }
 0x38a   : > { %v4024_v61 = vmul.f32 %v3992_v48, %v3875_v1  ;;  %5048 = vpow2.f32 %v4634_v55  ;;  %v2437_v63 = vsub.f32 1.0, %v2436_v24  ;;  %vm3112_vm6 = vweird.f32 %v8231_v51  ;;  %v8826_v1 = vld [vmem:[#allocation91_spill] sm:$0xff] }
 0x38b   : > { %v5043_v43 = vpop.eup %5042  ;;  %v4604_v46 = vmul.f32 -1.442695, %v2556_v5  ;;  %v8258_v37 = vadd.f32 %v1460_v23, %v8822_v56  ;;  %vm2441_vm7 = vweird.f32 %v5041_v4  ;;  %v1286_v12 = vadd.f32 %v1285_v10, %v8823_v0 }
 0x38c   : > { %v5045_v35 = vpop.eup %5044  ;;  %4056 = vst [vmem:[%s5887_s18 + $0x190] sm:$0xff] %v4024_v61  ;;  %v3108_v54 = vmul.f32 %v5043_v43, %v8231_v51  ;;  %v2438_v33 = vmul.f32 %v5041_v4, %v2437_v63  ;;  %v3886_v19 = vand.u32 2147483647, %v8240_v29  ;;  %v3116_v34 = vand.u32 2147483647, %v8231_v51  ;;  %vm2442_vm8 = vmor %vm2440_vm4, %vm2441_vm7  ;;  %v1818_v61 = vld [vmem:[%s8481_s3 + $0x2d8] sm:$0xff] }
 0x38d   : > { %v5047_v41 = vpop.eup %5046  ;;  %v8271_v22 = vadd.f32 1.0, %v5045_v35  ;;  %5050 = vpow2.f32 %v4604_v46  ;;  %v1853_v20 = vmul.f32 %v1817_v3, %v8261_v39  ;;  %v3888_v57 = vand.u32 2147483648, %v8240_v29 }
 0x38e   : > { %v3878_v58 = vmul.f32 %v5047_v41, %v8240_v29  ;;  %v3109_v48 = vsub.f32 1.0, %v3108_v54  ;;  %v2439_v53 = vadd.f32 %v5041_v4, %v2438_v33  ;;  %vm3113_vm9 = vweird.f32 %v5043_v43  ;;  %v1287_v33 = vpop.f32.mrf.mxu0 }
 0x38f   : > { %v3118_v44 = vand.u32 2147483648, %v8231_v51  ;;  %5052 = vrcp.f32 %v8271_v22  ;;  %v1687_v50 = vadd.f32 %v5723_v16, %v1286_v12  ;;  %vm3882_vm10 = vweird.f32 %v8240_v29  ;;  %vm3114_vm12 = vmor %vm3112_vm6, %vm3113_vm9 }
 0x390   : > { %v5049_v47 = vpop.eup %5048  ;;  %v3879_v62 = vsub.f32 1.0, %v3878_v58  ;;  %v2443_v45 = vsel %vm2442_vm8, %v5041_v4, %v2439_v53  ;;  %v3110_v21 = vmul.f32 %v5043_v43, %v3109_v48  ;;  %vm8282_vm11 = vcmp.eq.f32.partialorder %v3886_v19, 8.507059e+37  ;;  %v8829_v53 = vld [vmem:[#allocation94_spill] sm:$0xff] }
 0x391   : > { %v8286_v52 = vadd.f32 1.0, %v5049_v47  ;;  %v2448_v40 = vsel %vm8252_vm5, %v2447_v25, %v2443_v45  ;;  %vm3883_vm3 = vweird.f32 %v5047_v41  ;;  %v1885_v27 = vadd.f32 %v1853_v20, %v1687_v50 }
 0x392   : > { %v3880_v15 = vmul.f32 %v5047_v41, %v3879_v62  ;;  %v3111_v7 = vadd.f32 %v5043_v43, %v3110_v21  ;;  %v3889_v49 = vor.u32 1.1754944e-38, %v3888_v57  ;;  %vm3117_vm13 = vcmp.eq.f32.partialorder %v3116_v34, 8.507059e+37  ;;  %vm3884_vm14 = vmor %vm3882_vm10, %vm3883_vm3 }
 0x393   : > { %v5051_v60 = vpop.eup %5050  ;;  %5054 = vrcp.f32 %v8286_v52  ;;  %v3119_v11 = vor.u32 1.1754944e-38, %v3118_v44  ;;  %v3227_v8 = vmul.f32 %v3195_v36, %v2448_v40  ;;  %v2459_v24 = vand.u32 2147483647, %v8271_v22  ;;  %v1820_v40 = vld [vmem:[%s8481_s3 + $0x2e8] sm:$0xff] }
 0x394   : > { %v3881_v4 = vadd.f32 %v5047_v41, %v3880_v15  ;;  %v3115_v30 = vsel %vm3114_vm12, %v5043_v43, %v3111_v7  ;;  %v8294_v5 = vadd.f32 1.0, %v5051_v60  ;;  %v4573_v23 = vmul.f32 -1.442695, %v1885_v27 }
 0x395   : > { %v8296_v6 = vpop.eup %5052  ;;  %v3120_v55 = vsel %vm3117_vm13, %v3119_v11, %v3115_v30  ;;  %v1375_v51 = vadd.f32 %v1374_v14, %v8826_v1  ;;  %v3994_v63 = vmax.f32 %v8228_v17, 0.0  ;;  %v1682_v38 = vadd.f32 %v5773_v31, %v8250_v59  ;;  %v1821_v1 = vld [vmem:[%s8481_s3 + $0x2f0] sm:$0xff] }
 0x396   : > { %v3885_v26 = vsel %vm3884_vm14, %v5047_v41, %v3881_v4  ;;  %v3259_v10 = vmul.f32 %v3120_v55, %v8128_v18  ;;  %5056 = vrcp.f32 %v8294_v5  ;;  %v2451_v36 = vmul.f32 %v8296_v6, %v8271_v22  ;;  %v1813_v18 = vld [vmem:[%s8481_s3 + $0x2b0] sm:$0xff]  ;;  %v1376_v55 = vpop.f32.mrf.mxu1 }
 0x397   : > { %v3890_v29 = vsel %vm8282_vm11, %v3889_v49, %v3885_v26  ;;  %v2461_v43 = vand.u32 2147483648, %v8271_v22  ;;  %v8325_v56 = vadd.f32 %v5754_v28, %v8258_v37  ;;  %vm2455_vm15 = vweird.f32 %v8271_v22 }
 0x398   : > { %v4025_v25 = vmul.f32 %v3993_v2, %v3890_v29  ;;  %v8321_v46 = vadd.f32 %v3259_v10, %v3227_v8  ;;  %v2452_v3 = vsub.f32 1.0, %v2451_v36  ;;  %5058 = vpow2.f32 %v4573_v23  ;;  %v8832_v10 = vld [vmem:[#allocation95_spill] sm:$0xff] }
 0x399   : > { %v5055_v35 = vpop.eup %5054  ;;  %v1688_v59 = vadd.f32 %v5725_v42, %v1375_v51  ;;  %v2525_v54 = vmul.f32 %v1818_v61, %v8261_v39  ;;  %v3903_v2 = vand.u32 2147483648, %v8286_v52  ;;  %vm8334_vm0 = vcmp.eq.f32.partialorder %v2459_v24, 8.507059e+37 }
 0x39a   : > { %4057 = vst [vmem:[%s5887_s18 + $0x1a0] sm:$0xff] %v4025_v25  ;;  %v3893_v9 = vmul.f32 %v5055_v35, %v8286_v52  ;;  %v3323_v0 = vmul.f32 %v8321_v46, %v1813_v18  ;;  %vm3897_vm1 = vweird.f32 %v8286_v52  ;;  %v2453_v12 = vmul.f32 %v8296_v6, %v2452_v3 }
 0x39b   : > { %4091 = vst [vmem:[%s5887_s18 + $0x1c8] sm:$0xff] %v8321_v46  ;;  %v2462_v41 = vor.u32 1.1754944e-38, %v2461_v43  ;;  %v2557_v19 = vadd.f32 %v2525_v54, %v1688_v59  ;;  %vm2456_vm2 = vweird.f32 %v8296_v6  ;;  %v1288_v20 = vadd.f32 %v1287_v33, %v8829_v53  ;;  %v8833_v33 = vld [vmem:[#allocation89_spill] sm:$0xff] }
 0x39c   : > { %v5057_v34 = vpop.eup %5056  ;;  %v3894_v58 = vsub.f32 1.0, %v3893_v9  ;;  %v3355_v48 = vadd.f32 %v3323_v0, %v1682_v38  ;;  %v3901_v57 = vand.u32 2147483647, %v8286_v52  ;;  %v2454_v47 = vadd.f32 %v8296_v6, %v2453_v12  ;;  %vm8355_vm5 = vmor %vm2455_vm15, %vm2456_vm2  ;;  %v1549_v38 = vpop.f32.mrf.mxu3  ;;  %v1816_v0 = vld [vmem:[%s8481_s3 + $0x2c8] sm:$0xff] }
 0x39d   : > { %v3123_v44 = vmul.f32 %v5057_v34, %v8294_v5  ;;  %v4605_v62 = vmul.f32 -1.442695, %v2557_v19  ;;  %vm3898_vm4 = vweird.f32 %v5055_v35  ;;  %v3904_v21 = vor.u32 1.1754944e-38, %v3903_v2  ;;  %v1463_v2 = vpop.f32.mrf.mxu2 }
 0x39e   : > { %v3895_v45 = vmul.f32 %v5055_v35, %v3894_v58  ;;  %v4635_v50 = vmul.f32 -1.442695, %v3355_v48  ;;  %v5059_v15 = vpop.eup %5058  ;;  %v3133_v14 = vand.u32 2147483648, %v8294_v5  ;;  %v1691_v60 = vadd.f32 %v5723_v16, %v1288_v20  ;;  %vm3899_vm6 = vmor %vm3897_vm1, %vm3898_vm4 }
 0x39f   : > { %v3124_v7 = vsub.f32 1.0, %v3123_v44  ;;  %5060 = vpow2.f32 %v4605_v62  ;;  %v2458_v11 = vsel %vm8355_vm5, %v8296_v6, %v2454_v47  ;;  %v8364_v4 = vadd.f32 1.0, %v5059_v15 }
 0x3a0   : > { %v3896_v49 = vadd.f32 %v5055_v35, %v3895_v45  ;;  %5062 = vpow2.f32 %v4635_v50  ;;  %vm3128_vm7 = vweird.f32 %v5057_v34  ;;  %v3131_v30 = vand.u32 2147483647, %v8294_v5 }
 0x3a1   : > { %v3125_v22 = vmul.f32 %v5057_v34, %v3124_v7  ;;  %v1854_v8 = vmul.f32 %v1820_v40, %v8348_v32  ;;  %vm3902_vm8 = vcmp.eq.f32.partialorder %v3901_v57, 8.507059e+37  ;;  %vm3127_vm9 = vweird.f32 %v8294_v5 }
 0x3a2   : > { %v3900_v16 = vsel %vm3899_vm6, %v5055_v35, %v3896_v49  ;;  %5064 = vrcp.f32 %v8364_v4  ;;  %v2463_v24 = vsel %vm8334_vm0, %v2462_v41, %v2458_v11  ;;  %vm3129_vm10 = vmor %vm3127_vm9, %vm3128_vm7  ;;  %v3134_v26 = vor.u32 1.1754944e-38, %v3133_v14 }
 0x3a3   : > { %v3905_v6 = vsel %vm3902_vm8, %v3904_v21, %v3900_v16  ;;  %v3126_v52 = vadd.f32 %v5057_v34, %v3125_v22  ;;  %v1886_v23 = vadd.f32 %v1854_v8, %v1691_v60  ;;  %v3196_v5 = vmax.f32 %v8325_v56, 0.0 }
 0x3a4   : > { %v4026_v51 = vmul.f32 %v3994_v63, %v3905_v6  ;;  %v1377_v36 = vadd.f32 %v1376_v55, %v8832_v10  ;;  %vm3132_vm11 = vcmp.eq.f32.partialorder %v3131_v30, 8.507059e+37  ;;  %v2526_v17 = vmul.f32 %v1821_v1, %v8348_v32 }
 0x3a5   : > { %v5061_v61 = vpop.eup %5060  ;;  %v3130_v29 = vsel %vm3129_vm10, %v5057_v34, %v3126_v52  ;;  %v4574_v18 = vmul.f32 -1.442695, %v1886_v23  ;;  %v3228_v3 = vmul.f32 %v3196_v5, %v2463_v24  ;;  %v1550_v9 = vadd.f32 %v1549_v38, %v8833_v33 }
 0x3a6   : > { %v5063_v43 = vpop.eup %5062  ;;  %4058 = vst [vmem:[%s5887_s18 + $0x1b0] sm:$0xff] %v4026_v51  ;;  %v3135_v25 = vsel %vm3132_vm11, %v3134_v26, %v3130_v29  ;;  %v8383_v35 = vadd.f32 1.0, %v5061_v61  ;;  %v1692_v59 = vadd.f32 %v5725_v42, %v1377_v36  ;;  %v2474_v48 = vand.u32 2147483647, %v8364_v4 }
 0x3a7   : > { %v8386_v63 = vadd.f32 1.0, %v5063_v43  ;;  %v3260_v56 = vmul.f32 %v3135_v25, %v8198_v13  ;;  %5066 = vpow2.f32 %v4574_v18  ;;  %v8834_v13 = vld [vmem:[#allocation92_spill] sm:$0xff]  ;;  %v1686_v42 = vadd.f32 %v5773_v31, %v1550_v9  ;;  %v1552_v18 = vpop.f32.mrf.mxu3  ;;  %v1465_v9 = vpop.f32.mrf.mxu2 }
 0x3a8   : > { %v5065_v54 = vpop.eup %5064  ;;  %5068 = vrcp.f32 %v8383_v35  ;;  %v1464_v41 = vadd.f32 %v1463_v2, %v8834_v13  ;;  %v2558_v19 = vadd.f32 %v2526_v17, %v1692_v59  ;;  %v2476_v20 = vand.u32 2147483648, %v8364_v4 }
 0x3a9   : > { %5070 = vrcp.f32 %v8386_v63  ;;  %v8396_v37 = vadd.f32 %v3260_v56, %v3228_v3  ;;  %v2466_v12 = vmul.f32 %v5065_v54, %v8364_v4  ;;  %vm2471_vm3 = vweird.f32 %v5065_v54 }
 0x3aa   : > { %v4606_v57 = vmul.f32 -1.442695, %v2558_v19  ;;  %v1689_v40 = vadd.f32 %v5754_v28, %v1464_v41  ;;  %vm2470_vm12 = vweird.f32 %v8364_v4  ;;  %vm8412_vm13 = vcmp.eq.f32.partialorder %v2474_v48, 8.507059e+37  ;;  %v8840_v41 = vld [vmem:[#allocation96_spill] sm:$0xff] }
 0x3ab   : > { %4092 = vst [vmem:[%s5887_s18 + $0x1d8] sm:$0xff] %v8396_v37  ;;  %v3324_v34 = vmul.f32 %v8396_v37, %v1816_v0  ;;  %v2467_v58 = vsub.f32 1.0, %v2466_v12  ;;  %vm8416_vm14 = vmor %vm2470_vm12, %vm2471_vm3  ;;  %v2477_v11 = vor.u32 1.1754944e-38, %v2476_v20  ;;  %v3146_v22 = vand.u32 2147483647, %v8383_v35  ;;  %v1819_v0 = vld [vmem:[%s8481_s3 + $0x2e0] sm:$0xff] }
 0x3ac   : > { %5072 = vpow2.f32 %v4606_v57  ;;  %v3148_v8 = vand.u32 2147483648, %v8383_v35  ;;  %v3916_v55 = vand.u32 2147483647, %v8386_v63  ;;  %v3918_v16 = vand.u32 2147483648, %v8386_v63 }
 0x3ad   : > { %v5067_v53 = vpop.eup %5066  ;;  %v3356_v47 = vadd.f32 %v3324_v34, %v1686_v42  ;;  %v2468_v62 = vmul.f32 %v5065_v54, %v2467_v58  ;;  %v3995_v24 = vmax.f32 %v8321_v46, 0.0  ;;  %vm3912_vm1 = vweird.f32 %v8386_v63 }
 0x3ae   : > { %v5069_v44 = vpop.eup %5068  ;;  %v8406_v45 = vadd.f32 1.0, %v5067_v53  ;;  %vm3142_vm2 = vweird.f32 %v8383_v35  ;;  %v3197_v26 = vmax.f32 %v1689_v40, 0.0  ;;  %vm3147_vm5 = vcmp.eq.f32.partialorder %v3146_v22, 8.507059e+37 }
 0x3af   : > { %v5071_v21 = vpop.eup %5070  ;;  %v3138_v50 = vmul.f32 %v5069_v44, %v8383_v35  ;;  %v4636_v7 = vmul.f32 -1.442695, %v3356_v47  ;;  %v2469_v27 = vadd.f32 %v5065_v54, %v2468_v62  ;;  %vm3143_vm15 = vweird.f32 %v5069_v44 }
 0x3b0   : > { %v3908_v15 = vmul.f32 %v5071_v21, %v8386_v63  ;;  %5074 = vrcp.f32 %v8406_v45  ;;  %vm3913_vm0 = vweird.f32 %v5071_v21  ;;  %vm3144_vm4 = vmor %vm3142_vm2, %vm3143_vm15  ;;  %v3149_v10 = vor.u32 1.1754944e-38, %v3148_v8 }
 0x3b1   : > { %v3139_v60 = vsub.f32 1.0, %v3138_v50  ;;  %5076 = vpow2.f32 %v4636_v7  ;;  %v2473_v30 = vsel %vm8416_vm14, %v5065_v54, %v2469_v27  ;;  %vm3914_vm6 = vmor %vm3912_vm1, %vm3913_vm0  ;;  %vm3917_vm7 = vcmp.eq.f32.partialorder %v3916_v55, 8.507059e+37  ;;  %v8839_v54 = vld [vmem:[#allocation93_spill] sm:$0xff] }
 0x3b2   : > { %v3909_v4 = vsub.f32 1.0, %v3908_v15  ;;  %v2478_v23 = vsel %vm8412_vm13, %v2477_v11, %v2473_v30  ;;  %v5073_v1 = vpop.eup %5072  ;;  %v3919_v46 = vor.u32 1.1754944e-38, %v3918_v16  ;;  %v1553_v33 = vadd.f32 %v1552_v18, %v8839_v54 }
 0x3b3   : > { %v3140_v6 = vmul.f32 %v5069_v44, %v3139_v60  ;;  %v8432_v36 = vadd.f32 1.0, %v5073_v1  ;;  %v3229_v38 = vmul.f32 %v3197_v26, %v2478_v23  ;;  %v1466_v19 = vadd.f32 %v1465_v9, %v8840_v41 }
 0x3b4   : > { %v3910_v52 = vmul.f32 %v5071_v21, %v3909_v4  ;;  %v2491_v48 = vand.u32 2147483648, %v8406_v45  ;;  %vm2485_vm9 = vweird.f32 %v8406_v45  ;;  %v2489_v20 = vand.u32 2147483647, %v8406_v45 }
 0x3b5   : > { %v3141_v51 = vadd.f32 %v5069_v44, %v3140_v6  ;;  %5078 = vrcp.f32 %v8432_v36  ;;  %v3163_v27 = vand.u32 2147483648, %v8432_v36  ;;  %vm3157_vm12 = vweird.f32 %v8432_v36  ;;  %v1554_v6 = vpop.f32.mrf.mxu3 }
 0x3b6   : > { %v3911_v5 = vadd.f32 %v5071_v21, %v3910_v52  ;;  %v5075_v61 = vpop.eup %5074  ;;  %v2492_v7 = vor.u32 1.1754944e-38, %v2491_v48  ;;  %vm2490_vm11 = vcmp.eq.f32.partialorder %v2489_v20, 8.507059e+37  ;;  %v3996_v26 = vmax.f32 %v8396_v37, 0.0 }
 0x3b7   : > { %v3145_v29 = vsel %vm3144_vm4, %v5069_v44, %v3141_v51  ;;  %v5077_v43 = vpop.eup %5076  ;;  %v2481_v35 = vmul.f32 %v5075_v61, %v8406_v45  ;;  %vm2486_vm8 = vweird.f32 %v5075_v61  ;;  %v3161_v45 = vand.u32 2147483647, %v8432_v36 }
 0x3b8   : > { %v3915_v25 = vsel %vm3914_vm6, %v5071_v21, %v3911_v5  ;;  %v3150_v3 = vsel %vm3147_vm5, %v3149_v10, %v3145_v29  ;;  %v3484_v63 = vadd.f32 1.0, %v5077_v43  ;;  %vm8453_vm10 = vmor %vm2485_vm9, %vm2486_vm8  ;;  %v1693_v21 = vadd.f32 %v5754_v28, %v1466_v19  ;;  %v8843_v10 = vld [vmem:[#allocation97_spill] sm:$0xff] }
 0x3b9   : > { %v3920_v17 = vsel %vm3917_vm7, %v3919_v46, %v3915_v25  ;;  %v3261_v56 = vmul.f32 %v3150_v3, %v8261_v39  ;;  %v2482_v2 = vsub.f32 1.0, %v2481_v35  ;;  %v1690_v39 = vadd.f32 %v5773_v31, %v1553_v33 }
 0x3ba   : > { %v4027_v59 = vmul.f32 %v3995_v24, %v3920_v17  ;;  %5080 = vrcp.f32 %v3484_v63  ;;  %v3933_v11 = vand.u32 2147483648, %v3484_v63  ;;  %v3198_v28 = vmax.f32 %v1693_v21, 0.0 }
 0x3bb   : > { %v8442_v12 = vadd.f32 %v3261_v56, %v3229_v38  ;;  %v2483_v13 = vmul.f32 %v5075_v61, %v2482_v2  ;;  %v5079_v42 = vpop.eup %5078  ;;  %v3931_v30 = vand.u32 2147483647, %v3484_v63  ;;  %v3164_v8 = vor.u32 1.1754944e-38, %v3163_v27  ;;  %v1822_v38 = vld [vmem:[%s8481_s3 + $0x2f8] sm:$0xff] }
 0x3bc   : > { %4059 = vst [vmem:[%s5887_s18 + $0x1c0] sm:$0xff] %v4027_v59  ;;  %v3153_v53 = vmul.f32 %v5079_v42, %v8432_v36  ;;  %vm3158_vm3 = vweird.f32 %v5079_v42  ;;  %vm3162_vm15 = vcmp.eq.f32.partialorder %v3161_v45, 8.507059e+37  ;;  %vm3927_vm0 = vweird.f32 %v3484_v63 }
 0x3bd   : > { %4093 = vst [vmem:[%s5887_s18 + $0x1e8] sm:$0xff] %v8442_v12  ;;  %v3325_v34 = vmul.f32 %v8442_v12, %v1819_v0  ;;  %v2484_v58 = vadd.f32 %v5075_v61, %v2483_v13  ;;  %vm3159_vm14 = vmor %vm3157_vm12, %vm3158_vm3  ;;  %v3934_v23 = vor.u32 1.1754944e-38, %v3933_v11  ;;  %vm3932_vm2 = vcmp.eq.f32.partialorder %v3931_v30, 8.507059e+37 }
 0x3be   : > { %v3154_v62 = vsub.f32 1.0, %v3153_v53  ;;  %v1555_v36 = vadd.f32 %v1554_v6, %v8843_v10 }
 0x3bf   : > { %v3357_v57 = vadd.f32 %v3325_v34, %v1690_v39  ;;  %v2488_v50 = vsel %vm8453_vm10, %v5075_v61, %v2484_v58 }
 0x3c0   : > { %v5081_v47 = vpop.eup %5080  ;;  %v3155_v14 = vmul.f32 %v5079_v42, %v3154_v62  ;;  %v2493_v49 = vsel %vm2490_vm11, %v2492_v7, %v2488_v50 }
 0x3c1   : > { %v3923_v40 = vmul.f32 %v5081_v47, %v3484_v63  ;;  %v4637_v15 = vmul.f32 -1.442695, %v3357_v57  ;;  %vm3928_vm13 = vweird.f32 %v5081_v47  ;;  %v3230_v16 = vmul.f32 %v3198_v28, %v2493_v49 }
 0x3c2   : > { %v3156_v22 = vadd.f32 %v5079_v42, %v3155_v14  ;;  %vm3929_vm1 = vmor %vm3927_vm0, %vm3928_vm13 }
 0x3c3   : > { %v3924_v60 = vsub.f32 1.0, %v3923_v40  ;;  %5082 = vpow2.f32 %v4637_v15 }
 0x3c4   : > { %v3160_v55 = vsel %vm3159_vm14, %v5079_v42, %v3156_v22 }
 0x3c5   : > { %v3925_v4 = vmul.f32 %v5081_v47, %v3924_v60  ;;  %v3165_v52 = vsel %vm3162_vm15, %v3164_v8, %v3160_v55 }
 0x3c6   : > { %v3262_v1 = vmul.f32 %v3165_v52, %v8348_v32  ;;  %v1694_v32 = vadd.f32 %v5773_v31, %v1555_v36  ;;  %v3997_v31 = vmax.f32 %v8442_v12, 0.0 }
 0x3c7   : > { %v3926_v24 = vadd.f32 %v5081_v47, %v3925_v4 }
 0x3c8   : > { %v3294_v29 = vadd.f32 %v3262_v1, %v3230_v16 }
 0x3c9   : > { %v5083_v51 = vpop.eup %5082  ;;  %v3930_v5 = vsel %vm3929_vm1, %v5081_v47, %v3926_v24 }
 0x3ca   : > { %v3935_v61 = vsel %vm3932_vm2, %v3934_v23, %v3930_v5  ;;  %v3485_v46 = vadd.f32 1.0, %v5083_v51  ;;  %4094 = vst [vmem:[%s5887_s18 + $0x1f8] sm:$0xff] %v3294_v29  ;;  %v3326_v43 = vmul.f32 %v3294_v29, %v1822_v38  ;;  %v3998_v57 = vmax.f32 %v3294_v29, 0.0 }
 0x3cb   : > { %v4028_v18 = vmul.f32 %v3996_v26, %v3935_v61 }
 0x3cc   : > { %5084 = vrcp.f32 %v3485_v46  ;;  %v3358_v25 = vadd.f32 %v3326_v43, %v1694_v32  ;;  %v3948_v63 = vand.u32 2147483648, %v3485_v46  ;;  %v3946_v59 = vand.u32 2147483647, %v3485_v46 }
 0x3cd   : > { %4060 = vst [vmem:[%s5887_s18 + $0x1d0] sm:$0xff] %v4028_v18  ;;  %vm3942_vm5 = vweird.f32 %v3485_v46 }
 0x3ce   : > { %v4638_v37 = vmul.f32 -1.442695, %v3358_v25  ;;  %v3949_v9 = vor.u32 1.1754944e-38, %v3948_v63  ;;  %vm3947_vm7 = vcmp.eq.f32.partialorder %v3946_v59, 8.507059e+37 }
 0x3d0   : > { %5086 = vpow2.f32 %v4638_v37 }
 0x3d2   : > { %v5085_v3 = vpop.eup %5084 }
 0x3d3   : > { %v3938_v35 = vmul.f32 %v5085_v3, %v3485_v46  ;;  %vm3943_vm4 = vweird.f32 %v5085_v3 }
 0x3d4   : > { %vm3944_vm6 = vmor %vm3942_vm5, %vm3943_vm4 }
 0x3d5   : > { %v3939_v17 = vsub.f32 1.0, %v3938_v35 }
 0x3d6   : > { %v5087_v54 = vpop.eup %5086 }
 0x3d7   : > { %v3940_v56 = vmul.f32 %v5085_v3, %v3939_v17  ;;  %v3486_v2 = vadd.f32 1.0, %v5087_v54 }
 0x3d9   : > { %v3941_v33 = vadd.f32 %v5085_v3, %v3940_v56  ;;  %5088 = vrcp.f32 %v3486_v2  ;;  %v3963_v34 = vand.u32 2147483648, %v3486_v2  ;;  %v3961_v48 = vand.u32 2147483647, %v3486_v2 }
 0x3da   : > { %vm3957_vm9 = vweird.f32 %v3486_v2 }
 0x3db   : > { %v3945_v0 = vsel %vm3944_vm6, %v5085_v3, %v3941_v33  ;;  %v3964_v20 = vor.u32 1.1754944e-38, %v3963_v34  ;;  %vm3962_vm11 = vcmp.eq.f32.partialorder %v3961_v48, 8.507059e+37 }
 0x3dc   : > { %v3950_v13 = vsel %vm3947_vm7, %v3949_v9, %v3945_v0 }
 0x3dd   : > { %v4029_v41 = vmul.f32 %v3997_v31, %v3950_v13 }
 0x3df   : > { %4061 = vst [vmem:[%s5887_s18 + $0x1e0] sm:$0xff] %v4029_v41  ;;  %v5089_v19 = vpop.eup %5088 }
 0x3e0   : > { %v3953_v42 = vmul.f32 %v5089_v19, %v3486_v2  ;;  %vm3958_vm8 = vweird.f32 %v5089_v19 }
 0x3e1   : > { %vm3959_vm10 = vmor %vm3957_vm9, %vm3958_vm8 }
 0x3e2   : > { %v3954_v39 = vsub.f32 1.0, %v3953_v42 }
 0x3e4   : > { %v3955_v58 = vmul.f32 %v5089_v19, %v3954_v39 }
 0x3e6   : > { %v3956_v53 = vadd.f32 %v5089_v19, %v3955_v58 }
 0x3e8   : > { %v3960_v12 = vsel %vm3959_vm10, %v5089_v19, %v3956_v53 }
 0x3e9   : > { %v3965_v44 = vsel %vm3962_vm11, %v3964_v20, %v3960_v12 }
 0x3ea   : > { %v4030_v47 = vmul.f32 %v3998_v57, %v3965_v44 }
 0x3ec   : > { %4062 = vst [vmem:[%s5887_s18 + $0x1f0] sm:$0xff] %v4030_v47 }
 0x3ed PF: > { %s17_s24 = sadd.s32 1, %s5096_s24  }
 0x3ee   : > { %p14_p4 = scmp.ge.s32.totalorder %s17_s24, 4  }
 0x3f0   :  { %16 = sbr.rel (!%p14_p4) target bundleno = 1 (0x1), region = 84 }

</bundles_post_ra>
